<compile_context>
chip_gen: v7x
topology: tpu7x:2x2x1
jax: 0.10.0
libtpu: 0.0.40
codegen_flags: <defaults>
</compile_context>

<pallas_src>
import functools

import jax
import jax.numpy as jnp
from jax.experimental import pallas as pl
from jax.experimental.pallas import tpu as pltpu

V_TH = 1.0     # v_threshold
V_RESET = 0.0  # v_reset (hard reset)
NP = 128       # lane-dense padded output-channel width


def _round_up(x, m):
    return ((x + m - 1) // m) * m


# ----------------------------- Pallas kernels -------------------------------

def _matmul_affine_kernel(a_ref, w_ref, scale_ref, shift_ref, o_ref):
    # o = (a @ w) * scale + shift   (bf16 operands, f32 accumulation, per-column affine)
    acc = jnp.dot(a_ref[...], w_ref[...], preferred_element_type=jnp.float32)
    o_ref[...] = acc * scale_ref[...] + shift_ref[...]


def matmul_affine(a, w, scale, shift, *, tm=128):
    """Row-tiled fused matmul + per-column affine (folded BatchNorm).

    a: [M, K]  (any float dtype; cast to bf16, K zero-padded to w.shape[0])
    w: [Kp, Np] bf16, Np a multiple of 128 (lane-dense output)
    scale/shift: [Np] f32
    returns [M, Np] f32 (caller slices the valid columns).
    """
    M, K = a.shape
    Kp, Ncols = w.shape
    a = a.astype(jnp.bfloat16)
    if K != Kp:
        a = jnp.pad(a, ((0, 0), (0, Kp - K)))
    Mp = _round_up(M, tm)
    if Mp != M:
        a = jnp.pad(a, ((0, Mp - M), (0, 0)))
    scale2 = scale.reshape(1, Ncols).astype(jnp.float32)
    shift2 = shift.reshape(1, Ncols).astype(jnp.float32)
    out = pl.pallas_call(
        _matmul_affine_kernel,
        out_shape=jax.ShapeDtypeStruct((Mp, Ncols), jnp.float32),
        grid=(Mp // tm,),
        in_specs=[
            pl.BlockSpec((tm, Kp), lambda i: (i, 0)),
            pl.BlockSpec((Kp, Ncols), lambda i: (0, 0)),
            pl.BlockSpec((1, Ncols), lambda i: (0, 0)),
            pl.BlockSpec((1, Ncols), lambda i: (0, 0)),
        ],
        out_specs=pl.BlockSpec((tm, Ncols), lambda i: (i, 0)),
        compiler_params=pltpu.CompilerParams(dimension_semantics=("parallel",)),
    )(a, w, scale2, shift2)
    return out[:M]


def _if_static_kernel(x_ref, spk_ref):
    # Multi-step IF neuron whose input is identical at every timestep
    # (the .repeat(T, ...) of the PyTorch model, without materializing T copies).
    T = spk_ref.shape[0]
    x = x_ref[...]                              # (tr, 128) f32, loaded once
    v = jnp.zeros_like(x)
    for t in range(T):                          # T small & static -> unrolled
        v = v + x
        spike = v >= V_TH
        spk_ref[t] = spike.astype(spk_ref.dtype)
        v = jnp.where(spike, V_RESET, v)        # hard reset


def if_spikes_static(x, T, tr=72):
    """x: [R, L] f32 (L multiple of 128) -> spikes [T, R, L] bf16."""
    R, L = x.shape
    tr = min(tr, _round_up(R, 8))
    Rp = _round_up(R, tr)
    if Rp != R:
        x = jnp.pad(x, ((0, Rp - R), (0, 0)))   # zero rows never spike
    out = pl.pallas_call(
        _if_static_kernel,
        out_shape=jax.ShapeDtypeStruct((T, Rp, L), jnp.bfloat16),
        grid=(Rp // tr,),
        in_specs=[pl.BlockSpec((tr, L), lambda i: (i, 0))],
        out_specs=pl.BlockSpec((T, tr, L), lambda i: (0, i, 0)),
        compiler_params=pltpu.CompilerParams(dimension_semantics=("parallel",)),
    )(x)
    return out[:, :R]


def _if_seq_kernel(x_ref, spk_ref):
    # Multi-step IF neuron with a time-varying input sequence.
    T = x_ref.shape[0]
    v = jnp.zeros(x_ref.shape[1:], jnp.float32)
    for t in range(T):
        v = v + x_ref[t]
        spike = v >= V_TH
        spk_ref[t] = spike.astype(spk_ref.dtype)
        v = jnp.where(spike, V_RESET, v)


def if_spikes_seq(x, tr=16):
    """x: [T, R, L] f32 (L multiple of 128) -> spikes [T, R, L] bf16."""
    T, R, L = x.shape
    tr = min(tr, _round_up(R, 8))
    Rp = _round_up(R, tr)
    if Rp != R:
        x = jnp.pad(x, ((0, 0), (0, Rp - R), (0, 0)))
    out = pl.pallas_call(
        _if_seq_kernel,
        out_shape=jax.ShapeDtypeStruct((T, Rp, L), jnp.bfloat16),
        grid=(Rp // tr,),
        in_specs=[pl.BlockSpec((T, tr, L), lambda i: (0, i, 0))],
        out_specs=pl.BlockSpec((T, tr, L), lambda i: (0, i, 0)),
        compiler_params=pltpu.CompilerParams(dimension_semantics=("parallel",)),
    )(x)
    return out[:, :R]


def _fc_if_rate_kernel(x_ref, w_ref, o_ref):
    # Fused: per-timestep Linear (bf16 MXU) -> IF neuron -> spike count -> /T.
    T = x_ref.shape[0]
    w = w_ref[...]                                   # (K, 128) bf16
    v = jnp.zeros(o_ref.shape, jnp.float32)
    acc = jnp.zeros(o_ref.shape, jnp.float32)
    for t in range(T):
        y = jnp.dot(x_ref[t], w, preferred_element_type=jnp.float32)
        v = v + y
        spike = v >= V_TH
        acc = acc + spike.astype(jnp.float32)
        v = jnp.where(spike, V_RESET, v)
    o_ref[...] = acc * (1.0 / T)


def fc_if_rate(x_seq, w, n_out=10):
    """x_seq: [T, B, K] bf16, w: [K, Np] bf16 (Np mult of 128) -> rates [B, n_out] f32."""
    T, B, K = x_seq.shape
    Kw, Ncols = w.shape
    Bp = _round_up(B, 8)
    if Bp != B:
        x_seq = jnp.pad(x_seq, ((0, 0), (0, Bp - B), (0, 0)))
    out = pl.pallas_call(
        _fc_if_rate_kernel,
        out_shape=jax.ShapeDtypeStruct((Bp, Ncols), jnp.float32),
        grid=(1,),
        in_specs=[
            pl.BlockSpec((T, Bp, K), lambda i: (0, 0, 0)),
            pl.BlockSpec((K, Ncols), lambda i: (0, 0)),
        ],
        out_specs=pl.BlockSpec((Bp, Ncols), lambda i: (0, 0)),
    )(x_seq.astype(jnp.bfloat16), w)
    return out[:B, :n_out]


# -------------------------------- JAX glue ----------------------------------
# TODO(synk): the IF -> maxpool -> im2col glue between Pallas stages is still XLA;
# a fully fused spike/pool/gather kernel would remove two HBM round-trips per layer.

def im2col_nhwc(x, k):
    """x: [B, H, W, C] -> patches [B*Ho*Wo, k*k*C] (valid conv, stride 1, (kh,kw,c) order)."""
    B, H, W, C = x.shape
    Ho, Wo = H - k + 1, W - k + 1
    cols = [x[:, di:di + Ho, dj:dj + Wo, :] for di in range(k) for dj in range(k)]
    p = jnp.stack(cols, axis=3)                     # [B, Ho, Wo, k*k, C]
    return p.reshape(B * Ho * Wo, k * k * C)


def maxpool2x2_nhwc(x):
    """x: [B, H, W, C] -> [B, H//2, W//2, C]."""
    B, H, W, C = x.shape
    return x.reshape(B, H // 2, 2, W // 2, 2, C).max(axis=(2, 4))


def init_params(key, in_c=1, nf=(16, 32), ks=(5, 5)):
    """Deterministic synthetic parameters, pre-transformed to the kernel layouts:
    (kh,kw,cin)-ordered matmul weights, bf16, zero-padded to 128 output columns;
    eval-mode BatchNorm folded into f32 scale/shift (padded to 128)."""
    k1, k2, k3, k4, k5 = jax.random.split(key, 5)
    nf0, nf1 = nf
    w1 = jax.random.normal(k1, (nf0, in_c, ks[0], ks[0]), jnp.float32)
    w1 = w1 * (1.0 / (in_c * ks[0] * ks[0]) ** 0.5)
    w2 = jax.random.normal(k2, (nf1, nf0, ks[1], ks[1]), jnp.float32)
    w2 = w2 * (1.0 / (nf0 * ks[1] * ks[1]) ** 0.5)
    dim1 = (28 - ks[0] + 1) // 2
    dim2 = (dim1 - ks[1] + 1) // 2
    fc_in = nf1 * dim2 * dim2
    w_fc = jax.random.normal(k3, (10, fc_in), jnp.float32) * (1.0 / fc_in ** 0.5)

    def bn_fold(k, c):
        ka, kb, kc, kd = jax.random.split(k, 4)
        gamma = 1.0 + 0.1 * jax.random.normal(ka, (c,), jnp.float32)
        beta = 0.1 * jax.random.normal(kb, (c,), jnp.float32)
        mean = 0.1 * jax.random.normal(kc, (c,), jnp.float32)
        var = 1.0 + 0.5 * jax.random.uniform(kd, (c,), jnp.float32)
        scale = gamma / jnp.sqrt(var + 1e-5)
        shift = beta - mean * scale
        return scale, shift

    bn1_scale, bn1_shift = bn_fold(k4, nf0)
    bn2_scale, bn2_shift = bn_fold(k5, nf1)

    def pad_cols(m):
        return jnp.pad(m, ((0, 0), (0, NP - m.shape[1])))

    def pad_vec(v):
        return jnp.pad(v, (0, NP - v.shape[0]))

    # conv weights: [Cout, Cin, kh, kw] -> [kh*kw*Cin, Cout]  (matches im2col_nhwc order)
    w1_mm = w1.transpose(2, 3, 1, 0).reshape(in_c * ks[0] * ks[0], nf0)   # [25, 16]
    K1p = _round_up(w1_mm.shape[0], 8)                                    # pad K 25 -> 32
    w1_mm = jnp.pad(w1_mm, ((0, K1p - w1_mm.shape[0]), (0, NP - nf0)))
    w2_mm = pad_cols(w2.transpose(2, 3, 1, 0).reshape(nf0 * ks[1] * ks[1], nf1))  # [400, 128]
    # Linear weight: torch flatten order is (c,h,w); activations here are (h,w,c)
    w_fc_mm = w_fc.reshape(10, nf1, dim2, dim2).transpose(0, 2, 3, 1).reshape(10, fc_in).T
    w_fc_mm = pad_cols(w_fc_mm)                                           # [512, 128]

    return dict(
        w1=w1_mm.astype(jnp.bfloat16),
        w2=w2_mm.astype(jnp.bfloat16),
        w_fc=w_fc_mm.astype(jnp.bfloat16),
        bn1_scale=pad_vec(bn1_scale), bn1_shift=pad_vec(bn1_shift),
        bn2_scale=pad_vec(bn2_scale), bn2_shift=pad_vec(bn2_shift),
    )


def snn_forward(params, x, T=10, ks=(5, 5), nf=(16, 32)):
    """x: [N, in_c, 28, 28] float32 -> firing rates [N, 10]."""
    N = x.shape[0]
    k1, k2 = ks
    nf0, nf1 = nf

    # static_conv: Conv2d(in_c, nf0, k1, bias=False) + BatchNorm2d (eval, folded), NHWC
    x_nhwc = jnp.transpose(x, (0, 2, 3, 1))                      # [N, 28, 28, in_c]
    Ho1 = x.shape[2] - k1 + 1                                    # 24
    a1 = im2col_nhwc(x_nhwc, k1)                                 # [N*576, 25]
    y1 = matmul_affine(a1, params["w1"], params["bn1_scale"], params["bn1_shift"])
    y1 = y1[:, :nf0]                                             # [N*576, 16] f32 (NHWC flat)

    # conv[0]: MultiStepIFNode on the T-fold repeat (repeat done inside the kernel)
    total1 = N * Ho1 * Ho1 * nf0
    assert total1 % 128 == 0
    spk1 = if_spikes_static(y1.reshape(total1 // 128, 128), T)   # [T, R1, 128] bf16
    spk1 = spk1.reshape(T * N, Ho1, Ho1, nf0)                    # [T*N, 24, 24, 16]

    # conv[1]: SeqToANN(MaxPool2d(2,2) -> Conv2d(nf0,nf1,k2,bias=False) -> BN (eval))
    pool1 = maxpool2x2_nhwc(spk1)                                # [T*N, 12, 12, 16] bf16
    Hp1 = Ho1 // 2
    Ho2 = Hp1 - k2 + 1                                           # 8
    a2 = im2col_nhwc(pool1, k2)                                  # [T*N*64, 400] bf16
    y2 = matmul_affine(a2, params["w2"], params["bn2_scale"], params["bn2_shift"])
    y2 = y2[:, :nf1]                                             # [T*N*64, 32] f32

    # conv[2]: MultiStepIFNode
    total2 = N * Ho2 * Ho2 * nf1
    assert total2 % 128 == 0
    spk2 = if_spikes_seq(y2.reshape(T, total2 // 128, 128))      # [T, R2, 128] bf16
    spk2 = spk2.reshape(T * N, Ho2, Ho2, nf1)                    # [T*N, 8, 8, 32]

    # fc: SeqToANN(MaxPool2d(2,2) -> Flatten) -> Dropout -> SeqToANN(Linear) -> IF -> sum/T
    pool2 = maxpool2x2_nhwc(spk2)                                # [T*N, 4, 4, 32]
    flat = pool2.reshape(T, N, -1)                               # [T, N, 512] bf16, (h,w,c) order
    # TODO(synk): MultiStepDropout(0.5) is identity at inference; the training-mode
    # random mask (shared across T) is not implemented.
    return fc_if_rate(flat, params["w_fc"], n_out=10)            # [N, 10]


if __name__ == "__main__":
    key = jax.random.PRNGKey(0)
    kp, kx = jax.random.split(key)
    params = init_params(kp)
    x = jax.random.uniform(kx, (2, 1, 28, 28), jnp.float32)      # batch=2, MNIST-sized

    fwd = jax.jit(functools.partial(snn_forward, params, T=10, ks=(5, 5), nf=(16, 32)))
    out = jax.block_until_ready(fwd(x))

    assert out.shape == (2, 10), out.shape
    assert bool(jnp.all(jnp.isfinite(out)))
    print("KERNEL_OK")
</pallas_src>

<mosaic_0001>
module attributes {stable_mosaic.version = 11 : i64} {
  func.func @_matmul_affine_kernel(%arg0: i32, %arg1: memref<128x32xbf16, #tpu.memory_space<vmem>>, %arg2: memref<32x128xbf16, #tpu.memory_space<vmem>>, %arg3: memref<1x128xf32, #tpu.memory_space<vmem>>, %arg4: memref<1x128xf32, #tpu.memory_space<vmem>>, %arg5: memref<128x128xf32, #tpu.memory_space<vmem>>) attributes {dimension_semantics = [#tpu.dimension_semantics<parallel>], iteration_bounds = array<i64: 9>, scalar_prefetch = 0 : i64, scratch_operands = 0 : i64, tpu.core_type = #tpu.core_type<tc>, window_params = [{transform_indices = @transform_0, window_bounds = array<i64: 128, 32>}, {pipeline_mode = #tpu.pipeline_mode<synchronous>, transform_indices = @transform_1, window_bounds = array<i64: 32, 128>}, {pipeline_mode = #tpu.pipeline_mode<synchronous>, transform_indices = @transform_2, window_bounds = array<i64: 1, 128>}, {pipeline_mode = #tpu.pipeline_mode<synchronous>, transform_indices = @transform_3, window_bounds = array<i64: 1, 128>}, {transform_indices = @transform_4, window_bounds = array<i64: 128, 128>}]} {
    %c0 = arith.constant 0 : index
    %c0_0 = arith.constant 0 : index
    %0 = vector.load %arg1[%c0, %c0_0] : memref<128x32xbf16, #tpu.memory_space<vmem>>, vector<128x32xbf16>
    %c0_1 = arith.constant 0 : index
    %c0_2 = arith.constant 0 : index
    %1 = vector.load %arg2[%c0_1, %c0_2] : memref<32x128xbf16, #tpu.memory_space<vmem>>, vector<32x128xbf16>
    %cst = arith.constant dense<0.000000e+00> : vector<128x128xf32>
    %2 = tpu.matmul %0, %1, %cst {dimension_numbers = #tpu.dot_dimension_numbers<[1], [0], [0], [1], [0, 0, 1, 1], [], []>} : vector<128x32xbf16>, vector<32x128xbf16>, vector<128x128xf32> -> vector<128x128xf32>
    %c0_3 = arith.constant 0 : index
    %c0_4 = arith.constant 0 : index
    %3 = vector.load %arg3[%c0_3, %c0_4] : memref<1x128xf32, #tpu.memory_space<vmem>>, vector<1x128xf32>
    %4 = vector.broadcast %3 : vector<1x128xf32> to vector<128x128xf32>
    %5 = arith.mulf %2, %4 : vector<128x128xf32>
    %c0_5 = arith.constant 0 : index
    %c0_6 = arith.constant 0 : index
    %6 = vector.load %arg4[%c0_5, %c0_6] : memref<1x128xf32, #tpu.memory_space<vmem>>, vector<1x128xf32>
    %7 = vector.broadcast %6 : vector<1x128xf32> to vector<128x128xf32>
    %8 = arith.addf %5, %7 : vector<128x128xf32>
    %c0_7 = arith.constant 0 : index
    %c0_8 = arith.constant 0 : index
    %9 = vector.load %arg5[%c0_7, %c0_8] : memref<128x128xf32, #tpu.memory_space<vmem>>, vector<128x128xf32>
    tpu.vector_store %arg5[%c0_7, %c0_8], %8 {strides = array<i32>} : memref<128x128xf32, #tpu.memory_space<vmem>>, vector<128x128xf32>,
    return
  }
  func.func @transform_0(%arg0: i32) -> (i32, i32) {
    %c0_i32 = arith.constant 0 : i32
    %c0_i32_0 = arith.constant 0 : i32
    return %arg0, %c0_i32 : i32, i32
  }
  func.func @transform_1(%arg0: i32) -> (i32, i32) {
    %c0_i32 = arith.constant 0 : i32
    %c0_i32_0 = arith.constant 0 : i32
    %c0_i32_1 = arith.constant 0 : i32
    return %c0_i32, %c0_i32_0 : i32, i32
  }
  func.func @transform_2(%arg0: i32) -> (i32, i32) {
    %c0_i32 = arith.constant 0 : i32
    %c0_i32_0 = arith.constant 0 : i32
    %c0_i32_1 = arith.constant 0 : i32
    return %c0_i32, %c0_i32_0 : i32, i32
  }
  func.func @transform_3(%arg0: i32) -> (i32, i32) {
    %c0_i32 = arith.constant 0 : i32
    %c0_i32_0 = arith.constant 0 : i32
    %c0_i32_1 = arith.constant 0 : i32
    return %c0_i32, %c0_i32_0 : i32, i32
  }
  func.func @transform_4(%arg0: i32) -> (i32, i32) {
    %c0_i32 = arith.constant 0 : i32
    %c0_i32_0 = arith.constant 0 : i32
    return %arg0, %c0_i32 : i32, i32
  }
}

module attributes {stable_mosaic.version = 11 : i64} {
  func.func @_if_static_kernel(%arg0: i32, %arg1: memref<72x128xf32, #tpu.memory_space<vmem>>, %arg2: memref<10x72x128xbf16, #tpu.memory_space<vmem>>) attributes {dimension_semantics = [#tpu.dimension_semantics<parallel>], iteration_bounds = array<i64: 2>, scalar_prefetch = 0 : i64, scratch_operands = 0 : i64, tpu.core_type = #tpu.core_type<tc>, window_params = [{transform_indices = @transform_0, window_bounds = array<i64: 72, 128>}, {transform_indices = @transform_1, window_bounds = array<i64: 10, 72, 128>}]} {
    %c0 = arith.constant 0 : index
    %c0_0 = arith.constant 0 : index
    %0 = vector.load %arg1[%c0, %c0_0] : memref<72x128xf32, #tpu.memory_space<vmem>>, vector<72x128xf32>
    %cst = arith.constant 0.000000e+00 : f32
    %1 = vector.broadcast %cst : f32 to vector<72x128xf32>
    %2 = arith.addf %1, %0 : vector<72x128xf32>
    %cst_1 = arith.constant 1.000000e+00 : f32
    %3 = vector.broadcast %cst_1 : f32 to vector<72x128xf32>
    %4 = arith.cmpf oge, %2, %3 : vector<72x128xf32>
    %5 = arith.extui %4 : vector<72x128xi1> to vector<72x128xi32>
    %6 = arith.sitofp %5 : vector<72x128xi32> to vector<72x128xf32>
    %7 = arith.truncf %6 : vector<72x128xf32> to vector<72x128xbf16>
    %c0_2 = arith.constant 0 : index
    %c0_3 = arith.constant 0 : index
    %c0_4 = arith.constant 0 : index
    %8 = vector.load %arg2[%c0_2, %c0_3, %c0_4] : memref<10x72x128xbf16, #tpu.memory_space<vmem>>, vector<1x72x128xbf16>
    %9 = vector.shape_cast %8 : vector<1x72x128xbf16> to vector<72x128xbf16>
    %10 = vector.shape_cast %7 : vector<72x128xbf16> to vector<1x72x128xbf16>
    tpu.vector_store %arg2[%c0_2, %c0_3, %c0_4], %10 {strides = array<i32>} : memref<10x72x128xbf16, #tpu.memory_space<vmem>>, vector<1x72x128xbf16>,
    %cst_5 = arith.constant 0.000000e+00 : f32
    %11 = vector.broadcast %cst_5 : f32 to vector<72x128xf32>
    %12 = arith.select %4, %11, %2 : vector<72x128xi1>, vector<72x128xf32>
    %13 = arith.addf %12, %0 : vector<72x128xf32>
    %cst_6 = arith.constant 1.000000e+00 : f32
    %14 = vector.broadcast %cst_6 : f32 to vector<72x128xf32>
    %15 = arith.cmpf oge, %13, %14 : vector<72x128xf32>
    %16 = arith.extui %15 : vector<72x128xi1> to vector<72x128xi32>
    %17 = arith.sitofp %16 : vector<72x128xi32> to vector<72x128xf32>
    %18 = arith.truncf %17 : vector<72x128xf32> to vector<72x128xbf16>
    %c1 = arith.constant 1 : index
    %c0_7 = arith.constant 0 : index
    %c0_8 = arith.constant 0 : index
    %19 = vector.load %arg2[%c1, %c0_7, %c0_8] : memref<10x72x128xbf16, #tpu.memory_space<vmem>>, vector<1x72x128xbf16>
    %20 = vector.shape_cast %19 : vector<1x72x128xbf16> to vector<72x128xbf16>
    %21 = vector.shape_cast %18 : vector<72x128xbf16> to vector<1x72x128xbf16>
    tpu.vector_store %arg2[%c1, %c0_7, %c0_8], %21 {strides = array<i32>} : memref<10x72x128xbf16, #tpu.memory_space<vmem>>, vector<1x72x128xbf16>,
    %cst_9 = arith.constant 0.000000e+00 : f32
    %22 = vector.broadcast %cst_9 : f32 to vector<72x128xf32>
    %23 = arith.select %15, %22, %13 : vector<72x128xi1>, vector<72x128xf32>
    %24 = arith.addf %23, %0 : vector<72x128xf32>
    %cst_10 = arith.constant 1.000000e+00 : f32
    %25 = vector.broadcast %cst_10 : f32 to vector<72x128xf32>
    %26 = arith.cmpf oge, %24, %25 : vector<72x128xf32>
    %27 = arith.extui %26 : vector<72x128xi1> to vector<72x128xi32>
    %28 = arith.sitofp %27 : vector<72x128xi32> to vector<72x128xf32>
    %29 = arith.truncf %28 : vector<72x128xf32> to vector<72x128xbf16>
    %c2 = arith.constant 2 : index
    %c0_11 = arith.constant 0 : index
    %c0_12 = arith.constant 0 : index
    %30 = vector.load %arg2[%c2, %c0_11, %c0_12] : memref<10x72x128xbf16, #tpu.memory_space<vmem>>, vector<1x72x128xbf16>
    %31 = vector.shape_cast %30 : vector<1x72x128xbf16> to vector<72x128xbf16>
    %32 = vector.shape_cast %29 : vector<72x128xbf16> to vector<1x72x128xbf16>
    tpu.vector_store %arg2[%c2, %c0_11, %c0_12], %32 {strides = array<i32>} : memref<10x72x128xbf16, #tpu.memory_space<vmem>>, vector<1x72x128xbf16>,
    %cst_13 = arith.constant 0.000000e+00 : f32
    %33 = vector.broadcast %cst_13 : f32 to vector<72x128xf32>
    %34 = arith.select %26, %33, %24 : vector<72x128xi1>, vector<72x128xf32>
    %35 = arith.addf %34, %0 : vector<72x128xf32>
    %cst_14 = arith.constant 1.000000e+00 : f32
    %36 = vector.broadcast %cst_14 : f32 to vector<72x128xf32>
    %37 = arith.cmpf oge, %35, %36 : vector<72x128xf32>
    %38 = arith.extui %37 : vector<72x128xi1> to vector<72x128xi32>
    %39 = arith.sitofp %38 : vector<72x128xi32> to vector<72x128xf32>
    %40 = arith.truncf %39 : vector<72x128xf32> to vector<72x128xbf16>
    %c3 = arith.constant 3 : index
    %c0_15 = arith.constant 0 : index
    %c0_16 = arith.constant 0 : index
    %41 = vector.load %arg2[%c3, %c0_15, %c0_16] : memref<10x72x128xbf16, #tpu.memory_space<vmem>>, vector<1x72x128xbf16>
    %42 = vector.shape_cast %41 : vector<1x72x128xbf16> to vector<72x128xbf16>
    %43 = vector.shape_cast %40 : vector<72x128xbf16> to vector<1x72x128xbf16>
    tpu.vector_store %arg2[%c3, %c0_15, %c0_16], %43 {strides = array<i32>} : memref<10x72x128xbf16, #tpu.memory_space<vmem>>, vector<1x72x128xbf16>,
    %cst_17 = arith.constant 0.000000e+00 : f32
    %44 = vector.broadcast %cst_17 : f32 to vector<72x128xf32>
    %45 = arith.select %37, %44, %35 : vector<72x128xi1>, vector<72x128xf32>
    %46 = arith.addf %45, %0 : vector<72x128xf32>
    %cst_18 = arith.constant 1.000000e+00 : f32
    %47 = vector.broadcast %cst_18 : f32 to vector<72x128xf32>
    %48 = arith.cmpf oge, %46, %47 : vector<72x128xf32>
    %49 = arith.extui %48 : vector<72x128xi1> to vector<72x128xi32>
    %50 = arith.sitofp %49 : vector<72x128xi32> to vector<72x128xf32>
    %51 = arith.truncf %50 : vector<72x128xf32> to vector<72x128xbf16>
    %c4 = arith.constant 4 : index
    %c0_19 = arith.constant 0 : index
    %c0_20 = arith.constant 0 : index
    %52 = vector.load %arg2[%c4, %c0_19, %c0_20] : memref<10x72x128xbf16, #tpu.memory_space<vmem>>, vector<1x72x128xbf16>
    %53 = vector.shape_cast %52 : vector<1x72x128xbf16> to vector<72x128xbf16>
    %54 = vector.shape_cast %51 : vector<72x128xbf16> to vector<1x72x128xbf16>
    tpu.vector_store %arg2[%c4, %c0_19, %c0_20], %54 {strides = array<i32>} : memref<10x72x128xbf16, #tpu.memory_space<vmem>>, vector<1x72x128xbf16>,
    %cst_21 = arith.constant 0.000000e+00 : f32
    %55 = vector.broadcast %cst_21 : f32 to vector<72x128xf32>
    %56 = arith.select %48, %55, %46 : vector<72x128xi1>, vector<72x128xf32>
    %57 = arith.addf %56, %0 : vector<72x128xf32>
    %cst_22 = arith.constant 1.000000e+00 : f32
    %58 = vector.broadcast %cst_22 : f32 to vector<72x128xf32>
    %59 = arith.cmpf oge, %57, %58 : vector<72x128xf32>
    %60 = arith.extui %59 : vector<72x128xi1> to vector<72x128xi32>
    %61 = arith.sitofp %60 : vector<72x128xi32> to vector<72x128xf32>
    %62 = arith.truncf %61 : vector<72x128xf32> to vector<72x128xbf16>
    %c5 = arith.constant 5 : index
    %c0_23 = arith.constant 0 : index
    %c0_24 = arith.constant 0 : index
    %63 = vector.load %arg2[%c5, %c0_23, %c0_24] : memref<10x72x128xbf16, #tpu.memory_space<vmem>>, vector<1x72x128xbf16>
    %64 = vector.shape_cast %63 : vector<1x72x128xbf16> to vector<72x128xbf16>
    %65 = vector.shape_cast %62 : vector<72x128xbf16> to vector<1x72x128xbf16>
    tpu.vector_store %arg2[%c5, %c0_23, %c0_24], %65 {strides = array<i32>} : memref<10x72x128xbf16, #tpu.memory_space<vmem>>, vector<1x72x128xbf16>,
    %cst_25 = arith.constant 0.000000e+00 : f32
    %66 = vector.broadcast %cst_25 : f32 to vector<72x128xf32>
    %67 = arith.select %59, %66, %57 : vector<72x128xi1>, vector<72x128xf32>
    %68 = arith.addf %67, %0 : vector<72x128xf32>
    %cst_26 = arith.constant 1.000000e+00 : f32
    %69 = vector.broadcast %cst_26 : f32 to vector<72x128xf32>
    %70 = arith.cmpf oge, %68, %69 : vector<72x128xf32>
    %71 = arith.extui %70 : vector<72x128xi1> to vector<72x128xi32>
    %72 = arith.sitofp %71 : vector<72x128xi32> to vector<72x128xf32>
    %73 = arith.truncf %72 : vector<72x128xf32> to vector<72x128xbf16>
    %c6 = arith.constant 6 : index
    %c0_27 = arith.constant 0 : index
    %c0_28 = arith.constant 0 : index
    %74 = vector.load %arg2[%c6, %c0_27, %c0_28] : memref<10x72x128xbf16, #tpu.memory_space<vmem>>, vector<1x72x128xbf16>
    %75 = vector.shape_cast %74 : vector<1x72x128xbf16> to vector<72x128xbf16>
    %76 = vector.shape_cast %73 : vector<72x128xbf16> to vector<1x72x128xbf16>
    tpu.vector_store %arg2[%c6, %c0_27, %c0_28], %76 {strides = array<i32>} : memref<10x72x128xbf16, #tpu.memory_space<vmem>>, vector<1x72x128xbf16>,
    %cst_29 = arith.constant 0.000000e+00 : f32
    %77 = vector.broadcast %cst_29 : f32 to vector<72x128xf32>
    %78 = arith.select %70, %77, %68 : vector<72x128xi1>, vector<72x128xf32>
    %79 = arith.addf %78, %0 : vector<72x128xf32>
    %cst_30 = arith.constant 1.000000e+00 : f32
    %80 = vector.broadcast %cst_30 : f32 to vector<72x128xf32>
    %81 = arith.cmpf oge, %79, %80 : vector<72x128xf32>
    %82 = arith.extui %81 : vector<72x128xi1> to vector<72x128xi32>
    %83 = arith.sitofp %82 : vector<72x128xi32> to vector<72x128xf32>
    %84 = arith.truncf %83 : vector<72x128xf32> to vector<72x128xbf16>
    %c7 = arith.constant 7 : index
    %c0_31 = arith.constant 0 : index
    %c0_32 = arith.constant 0 : index
    %85 = vector.load %arg2[%c7, %c0_31, %c0_32] : memref<10x72x128xbf16, #tpu.memory_space<vmem>>, vector<1x72x128xbf16>
    %86 = vector.shape_cast %85 : vector<1x72x128xbf16> to vector<72x128xbf16>
    %87 = vector.shape_cast %84 : vector<72x128xbf16> to vector<1x72x128xbf16>
    tpu.vector_store %arg2[%c7, %c0_31, %c0_32], %87 {strides = array<i32>} : memref<10x72x128xbf16, #tpu.memory_space<vmem>>, vector<1x72x128xbf16>,
    %cst_33 = arith.constant 0.000000e+00 : f32
    %88 = vector.broadcast %cst_33 : f32 to vector<72x128xf32>
    %89 = arith.select %81, %88, %79 : vector<72x128xi1>, vector<72x128xf32>
    %90 = arith.addf %89, %0 : vector<72x128xf32>
    %cst_34 = arith.constant 1.000000e+00 : f32
    %91 = vector.broadcast %cst_34 : f32 to vector<72x128xf32>
    %92 = arith.cmpf oge, %90, %91 : vector<72x128xf32>
    %93 = arith.extui %92 : vector<72x128xi1> to vector<72x128xi32>
    %94 = arith.sitofp %93 : vector<72x128xi32> to vector<72x128xf32>
    %95 = arith.truncf %94 : vector<72x128xf32> to vector<72x128xbf16>
    %c8 = arith.constant 8 : index
    %c0_35 = arith.constant 0 : index
    %c0_36 = arith.constant 0 : index
    %96 = vector.load %arg2[%c8, %c0_35, %c0_36] : memref<10x72x128xbf16, #tpu.memory_space<vmem>>, vector<1x72x128xbf16>
    %97 = vector.shape_cast %96 : vector<1x72x128xbf16> to vector<72x128xbf16>
    %98 = vector.shape_cast %95 : vector<72x128xbf16> to vector<1x72x128xbf16>
    tpu.vector_store %arg2[%c8, %c0_35, %c0_36], %98 {strides = array<i32>} : memref<10x72x128xbf16, #tpu.memory_space<vmem>>, vector<1x72x128xbf16>,
    %cst_37 = arith.constant 0.000000e+00 : f32
    %99 = vector.broadcast %cst_37 : f32 to vector<72x128xf32>
    %100 = arith.select %92, %99, %90 : vector<72x128xi1>, vector<72x128xf32>
    %101 = arith.addf %100, %0 : vector<72x128xf32>
    %cst_38 = arith.constant 1.000000e+00 : f32
    %102 = vector.broadcast %cst_38 : f32 to vector<72x128xf32>
    %103 = arith.cmpf oge, %101, %102 : vector<72x128xf32>
    %104 = arith.extui %103 : vector<72x128xi1> to vector<72x128xi32>
    %105 = arith.sitofp %104 : vector<72x128xi32> to vector<72x128xf32>
    %106 = arith.truncf %105 : vector<72x128xf32> to vector<72x128xbf16>
    %c9 = arith.constant 9 : index
    %c0_39 = arith.constant 0 : index
    %c0_40 = arith.constant 0 : index
    %107 = vector.load %arg2[%c9, %c0_39, %c0_40] : memref<10x72x128xbf16, #tpu.memory_space<vmem>>, vector<1x72x128xbf16>
    %108 = vector.shape_cast %107 : vector<1x72x128xbf16> to vector<72x128xbf16>
    %109 = vector.shape_cast %106 : vector<72x128xbf16> to vector<1x72x128xbf16>
    tpu.vector_store %arg2[%c9, %c0_39, %c0_40], %109 {strides = array<i32>} : memref<10x72x128xbf16, #tpu.memory_space<vmem>>, vector<1x72x128xbf16>,
    return
  }
  func.func @transform_0(%arg0: i32) -> (i32, i32) {
    %c0_i32 = arith.constant 0 : i32
    %c0_i32_0 = arith.constant 0 : i32
    return %arg0, %c0_i32 : i32, i32
  }
  func.func @transform_1(%arg0: i32) -> (i32, i32, i32) {
    %c0_i32 = arith.constant 0 : i32
    %c0_i32_0 = arith.constant 0 : i32
    %c0_i32_1 = arith.constant 0 : i32
    return %c0_i32, %arg0, %c0_i32_0 : i32, i32, i32
  }
}

module attributes {stable_mosaic.version = 11 : i64} {
  func.func @_matmul_affine_kernel(%arg0: i32, %arg1: memref<128x400xbf16, #tpu.memory_space<vmem>>, %arg2: memref<400x128xbf16, #tpu.memory_space<vmem>>, %arg3: memref<1x128xf32, #tpu.memory_space<vmem>>, %arg4: memref<1x128xf32, #tpu.memory_space<vmem>>, %arg5: memref<128x128xf32, #tpu.memory_space<vmem>>) attributes {dimension_semantics = [#tpu.dimension_semantics<parallel>], iteration_bounds = array<i64: 10>, scalar_prefetch = 0 : i64, scratch_operands = 0 : i64, tpu.core_type = #tpu.core_type<tc>, window_params = [{transform_indices = @transform_0, window_bounds = array<i64: 128, 400>}, {pipeline_mode = #tpu.pipeline_mode<synchronous>, transform_indices = @transform_1, window_bounds = array<i64: 400, 128>}, {pipeline_mode = #tpu.pipeline_mode<synchronous>, transform_indices = @transform_2, window_bounds = array<i64: 1, 128>}, {pipeline_mode = #tpu.pipeline_mode<synchronous>, transform_indices = @transform_3, window_bounds = array<i64: 1, 128>}, {transform_indices = @transform_4, window_bounds = array<i64: 128, 128>}]} {
    %c0 = arith.constant 0 : index
    %c0_0 = arith.constant 0 : index
    %0 = vector.load %arg1[%c0, %c0_0] : memref<128x400xbf16, #tpu.memory_space<vmem>>, vector<128x400xbf16>
    %c0_1 = arith.constant 0 : index
    %c0_2 = arith.constant 0 : index
    %1 = vector.load %arg2[%c0_1, %c0_2] : memref<400x128xbf16, #tpu.memory_space<vmem>>, vector<400x128xbf16>
    %cst = arith.constant dense<0.000000e+00> : vector<128x128xf32>
    %2 = tpu.matmul %0, %1, %cst {dimension_numbers = #tpu.dot_dimension_numbers<[1], [0], [0], [1], [0, 0, 1, 1], [], []>} : vector<128x400xbf16>, vector<400x128xbf16>, vector<128x128xf32> -> vector<128x128xf32>
    %c0_3 = arith.constant 0 : index
    %c0_4 = arith.constant 0 : index
    %3 = vector.load %arg3[%c0_3, %c0_4] : memref<1x128xf32, #tpu.memory_space<vmem>>, vector<1x128xf32>
    %4 = vector.broadcast %3 : vector<1x128xf32> to vector<128x128xf32>
    %5 = arith.mulf %2, %4 : vector<128x128xf32>
    %c0_5 = arith.constant 0 : index
    %c0_6 = arith.constant 0 : index
    %6 = vector.load %arg4[%c0_5, %c0_6] : memref<1x128xf32, #tpu.memory_space<vmem>>, vector<1x128xf32>
    %7 = vector.broadcast %6 : vector<1x128xf32> to vector<128x128xf32>
    %8 = arith.addf %5, %7 : vector<128x128xf32>
    %c0_7 = arith.constant 0 : index
    %c0_8 = arith.constant 0 : index
    %9 = vector.load %arg5[%c0_7, %c0_8] : memref<128x128xf32, #tpu.memory_space<vmem>>, vector<128x128xf32>
    tpu.vector_store %arg5[%c0_7, %c0_8], %8 {strides = array<i32>} : memref<128x128xf32, #tpu.memory_space<vmem>>, vector<128x128xf32>,
    return
  }
  func.func @transform_0(%arg0: i32) -> (i32, i32) {
    %c0_i32 = arith.constant 0 : i32
    %c0_i32_0 = arith.constant 0 : i32
    return %arg0, %c0_i32 : i32, i32
  }
  func.func @transform_1(%arg0: i32) -> (i32, i32) {
    %c0_i32 = arith.constant 0 : i32
    %c0_i32_0 = arith.constant 0 : i32
    %c0_i32_1 = arith.constant 0 : i32
    return %c0_i32, %c0_i32_0 : i32, i32
  }
  func.func @transform_2(%arg0: i32) -> (i32, i32) {
    %c0_i32 = arith.constant 0 : i32
    %c0_i32_0 = arith.constant 0 : i32
    %c0_i32_1 = arith.constant 0 : i32
    return %c0_i32, %c0_i32_0 : i32, i32
  }
  func.func @transform_3(%arg0: i32) -> (i32, i32) {
    %c0_i32 = arith.constant 0 : i32
    %c0_i32_0 = arith.constant 0 : i32
    %c0_i32_1 = arith.constant 0 : i32
    return %c0_i32, %c0_i32_0 : i32, i32
  }
  func.func @transform_4(%arg0: i32) -> (i32, i32) {
    %c0_i32 = arith.constant 0 : i32
    %c0_i32_0 = arith.constant 0 : i32
    return %arg0, %c0_i32 : i32, i32
  }
}

module attributes {stable_mosaic.version = 11 : i64} {
  func.func @_if_seq_kernel(%arg0: i32, %arg1: memref<10x16x128xf32, #tpu.memory_space<vmem>>, %arg2: memref<10x16x128xbf16, #tpu.memory_space<vmem>>) attributes {dimension_semantics = [#tpu.dimension_semantics<parallel>], iteration_bounds = array<i64: 2>, scalar_prefetch = 0 : i64, scratch_operands = 0 : i64, tpu.core_type = #tpu.core_type<tc>, window_params = [{transform_indices = @transform_0, window_bounds = array<i64: 10, 16, 128>}, {transform_indices = @transform_1, window_bounds = array<i64: 10, 16, 128>}]} {
    %cst = arith.constant 0.000000e+00 : f32
    %0 = vector.broadcast %cst : f32 to vector<16x128xf32>
    %c0 = arith.constant 0 : index
    %c0_0 = arith.constant 0 : index
    %c0_1 = arith.constant 0 : index
    %1 = vector.load %arg1[%c0, %c0_0, %c0_1] : memref<10x16x128xf32, #tpu.memory_space<vmem>>, vector<1x16x128xf32>
    %2 = vector.shape_cast %1 : vector<1x16x128xf32> to vector<16x128xf32>
    %3 = arith.addf %0, %2 : vector<16x128xf32>
    %cst_2 = arith.constant 1.000000e+00 : f32
    %4 = vector.broadcast %cst_2 : f32 to vector<16x128xf32>
    %5 = arith.cmpf oge, %3, %4 : vector<16x128xf32>
    %6 = arith.extui %5 : vector<16x128xi1> to vector<16x128xi32>
    %7 = arith.sitofp %6 : vector<16x128xi32> to vector<16x128xf32>
    %8 = arith.truncf %7 : vector<16x128xf32> to vector<16x128xbf16>
    %c0_3 = arith.constant 0 : index
    %c0_4 = arith.constant 0 : index
    %c0_5 = arith.constant 0 : index
    %9 = vector.load %arg2[%c0_3, %c0_4, %c0_5] : memref<10x16x128xbf16, #tpu.memory_space<vmem>>, vector<1x16x128xbf16>
    %10 = vector.shape_cast %9 : vector<1x16x128xbf16> to vector<16x128xbf16>
    %11 = vector.shape_cast %8 : vector<16x128xbf16> to vector<1x16x128xbf16>
    tpu.vector_store %arg2[%c0_3, %c0_4, %c0_5], %11 {strides = array<i32>} : memref<10x16x128xbf16, #tpu.memory_space<vmem>>, vector<1x16x128xbf16>,
    %cst_6 = arith.constant 0.000000e+00 : f32
    %12 = vector.broadcast %cst_6 : f32 to vector<16x128xf32>
    %13 = arith.select %5, %12, %3 : vector<16x128xi1>, vector<16x128xf32>
    %c1 = arith.constant 1 : index
    %c0_7 = arith.constant 0 : index
    %c0_8 = arith.constant 0 : index
    %14 = vector.load %arg1[%c1, %c0_7, %c0_8] : memref<10x16x128xf32, #tpu.memory_space<vmem>>, vector<1x16x128xf32>
    %15 = vector.shape_cast %14 : vector<1x16x128xf32> to vector<16x128xf32>
    %16 = arith.addf %13, %15 : vector<16x128xf32>
    %cst_9 = arith.constant 1.000000e+00 : f32
    %17 = vector.broadcast %cst_9 : f32 to vector<16x128xf32>
    %18 = arith.cmpf oge, %16, %17 : vector<16x128xf32>
    %19 = arith.extui %18 : vector<16x128xi1> to vector<16x128xi32>
    %20 = arith.sitofp %19 : vector<16x128xi32> to vector<16x128xf32>
    %21 = arith.truncf %20 : vector<16x128xf32> to vector<16x128xbf16>
    %c1_10 = arith.constant 1 : index
    %c0_11 = arith.constant 0 : index
    %c0_12 = arith.constant 0 : index
    %22 = vector.load %arg2[%c1_10, %c0_11, %c0_12] : memref<10x16x128xbf16, #tpu.memory_space<vmem>>, vector<1x16x128xbf16>
    %23 = vector.shape_cast %22 : vector<1x16x128xbf16> to vector<16x128xbf16>
    %24 = vector.shape_cast %21 : vector<16x128xbf16> to vector<1x16x128xbf16>
    tpu.vector_store %arg2[%c1_10, %c0_11, %c0_12], %24 {strides = array<i32>} : memref<10x16x128xbf16, #tpu.memory_space<vmem>>, vector<1x16x128xbf16>,
    %cst_13 = arith.constant 0.000000e+00 : f32
    %25 = vector.broadcast %cst_13 : f32 to vector<16x128xf32>
    %26 = arith.select %18, %25, %16 : vector<16x128xi1>, vector<16x128xf32>
    %c2 = arith.constant 2 : index
    %c0_14 = arith.constant 0 : index
    %c0_15 = arith.constant 0 : index
    %27 = vector.load %arg1[%c2, %c0_14, %c0_15] : memref<10x16x128xf32, #tpu.memory_space<vmem>>, vector<1x16x128xf32>
    %28 = vector.shape_cast %27 : vector<1x16x128xf32> to vector<16x128xf32>
    %29 = arith.addf %26, %28 : vector<16x128xf32>
    %cst_16 = arith.constant 1.000000e+00 : f32
    %30 = vector.broadcast %cst_16 : f32 to vector<16x128xf32>
    %31 = arith.cmpf oge, %29, %30 : vector<16x128xf32>
    %32 = arith.extui %31 : vector<16x128xi1> to vector<16x128xi32>
    %33 = arith.sitofp %32 : vector<16x128xi32> to vector<16x128xf32>
    %34 = arith.truncf %33 : vector<16x128xf32> to vector<16x128xbf16>
    %c2_17 = arith.constant 2 : index
    %c0_18 = arith.constant 0 : index
    %c0_19 = arith.constant 0 : index
    %35 = vector.load %arg2[%c2_17, %c0_18, %c0_19] : memref<10x16x128xbf16, #tpu.memory_space<vmem>>, vector<1x16x128xbf16>
    %36 = vector.shape_cast %35 : vector<1x16x128xbf16> to vector<16x128xbf16>
    %37 = vector.shape_cast %34 : vector<16x128xbf16> to vector<1x16x128xbf16>
    tpu.vector_store %arg2[%c2_17, %c0_18, %c0_19], %37 {strides = array<i32>} : memref<10x16x128xbf16, #tpu.memory_space<vmem>>, vector<1x16x128xbf16>,
    %cst_20 = arith.constant 0.000000e+00 : f32
    %38 = vector.broadcast %cst_20 : f32 to vector<16x128xf32>
    %39 = arith.select %31, %38, %29 : vector<16x128xi1>, vector<16x128xf32>
    %c3 = arith.constant 3 : index
    %c0_21 = arith.constant 0 : index
    %c0_22 = arith.constant 0 : index
    %40 = vector.load %arg1[%c3, %c0_21, %c0_22] : memref<10x16x128xf32, #tpu.memory_space<vmem>>, vector<1x16x128xf32>
    %41 = vector.shape_cast %40 : vector<1x16x128xf32> to vector<16x128xf32>
    %42 = arith.addf %39, %41 : vector<16x128xf32>
    %cst_23 = arith.constant 1.000000e+00 : f32
    %43 = vector.broadcast %cst_23 : f32 to vector<16x128xf32>
    %44 = arith.cmpf oge, %42, %43 : vector<16x128xf32>
    %45 = arith.extui %44 : vector<16x128xi1> to vector<16x128xi32>
    %46 = arith.sitofp %45 : vector<16x128xi32> to vector<16x128xf32>
    %47 = arith.truncf %46 : vector<16x128xf32> to vector<16x128xbf16>
    %c3_24 = arith.constant 3 : index
    %c0_25 = arith.constant 0 : index
    %c0_26 = arith.constant 0 : index
    %48 = vector.load %arg2[%c3_24, %c0_25, %c0_26] : memref<10x16x128xbf16, #tpu.memory_space<vmem>>, vector<1x16x128xbf16>
    %49 = vector.shape_cast %48 : vector<1x16x128xbf16> to vector<16x128xbf16>
    %50 = vector.shape_cast %47 : vector<16x128xbf16> to vector<1x16x128xbf16>
    tpu.vector_store %arg2[%c3_24, %c0_25, %c0_26], %50 {strides = array<i32>} : memref<10x16x128xbf16, #tpu.memory_space<vmem>>, vector<1x16x128xbf16>,
    %cst_27 = arith.constant 0.000000e+00 : f32
    %51 = vector.broadcast %cst_27 : f32 to vector<16x128xf32>
    %52 = arith.select %44, %51, %42 : vector<16x128xi1>, vector<16x128xf32>
    %c4 = arith.constant 4 : index
    %c0_28 = arith.constant 0 : index
    %c0_29 = arith.constant 0 : index
    %53 = vector.load %arg1[%c4, %c0_28, %c0_29] : memref<10x16x128xf32, #tpu.memory_space<vmem>>, vector<1x16x128xf32>
    %54 = vector.shape_cast %53 : vector<1x16x128xf32> to vector<16x128xf32>
    %55 = arith.addf %52, %54 : vector<16x128xf32>
    %cst_30 = arith.constant 1.000000e+00 : f32
    %56 = vector.broadcast %cst_30 : f32 to vector<16x128xf32>
    %57 = arith.cmpf oge, %55, %56 : vector<16x128xf32>
    %58 = arith.extui %57 : vector<16x128xi1> to vector<16x128xi32>
    %59 = arith.sitofp %58 : vector<16x128xi32> to vector<16x128xf32>
    %60 = arith.truncf %59 : vector<16x128xf32> to vector<16x128xbf16>
    %c4_31 = arith.constant 4 : index
    %c0_32 = arith.constant 0 : index
    %c0_33 = arith.constant 0 : index
    %61 = vector.load %arg2[%c4_31, %c0_32, %c0_33] : memref<10x16x128xbf16, #tpu.memory_space<vmem>>, vector<1x16x128xbf16>
    %62 = vector.shape_cast %61 : vector<1x16x128xbf16> to vector<16x128xbf16>
    %63 = vector.shape_cast %60 : vector<16x128xbf16> to vector<1x16x128xbf16>
    tpu.vector_store %arg2[%c4_31, %c0_32, %c0_33], %63 {strides = array<i32>} : memref<10x16x128xbf16, #tpu.memory_space<vmem>>, vector<1x16x128xbf16>,
    %cst_34 = arith.constant 0.000000e+00 : f32
    %64 = vector.broadcast %cst_34 : f32 to vector<16x128xf32>
    %65 = arith.select %57, %64, %55 : vector<16x128xi1>, vector<16x128xf32>
    %c5 = arith.constant 5 : index
    %c0_35 = arith.constant 0 : index
    %c0_36 = arith.constant 0 : index
    %66 = vector.load %arg1[%c5, %c0_35, %c0_36] : memref<10x16x128xf32, #tpu.memory_space<vmem>>, vector<1x16x128xf32>
    %67 = vector.shape_cast %66 : vector<1x16x128xf32> to vector<16x128xf32>
    %68 = arith.addf %65, %67 : vector<16x128xf32>
    %cst_37 = arith.constant 1.000000e+00 : f32
    %69 = vector.broadcast %cst_37 : f32 to vector<16x128xf32>
    %70 = arith.cmpf oge, %68, %69 : vector<16x128xf32>
    %71 = arith.extui %70 : vector<16x128xi1> to vector<16x128xi32>
    %72 = arith.sitofp %71 : vector<16x128xi32> to vector<16x128xf32>
    %73 = arith.truncf %72 : vector<16x128xf32> to vector<16x128xbf16>
    %c5_38 = arith.constant 5 : index
    %c0_39 = arith.constant 0 : index
    %c0_40 = arith.constant 0 : index
    %74 = vector.load %arg2[%c5_38, %c0_39, %c0_40] : memref<10x16x128xbf16, #tpu.memory_space<vmem>>, vector<1x16x128xbf16>
    %75 = vector.shape_cast %74 : vector<1x16x128xbf16> to vector<16x128xbf16>
    %76 = vector.shape_cast %73 : vector<16x128xbf16> to vector<1x16x128xbf16>
    tpu.vector_store %arg2[%c5_38, %c0_39, %c0_40], %76 {strides = array<i32>} : memref<10x16x128xbf16, #tpu.memory_space<vmem>>, vector<1x16x128xbf16>,
    %cst_41 = arith.constant 0.000000e+00 : f32
    %77 = vector.broadcast %cst_41 : f32 to vector<16x128xf32>
    %78 = arith.select %70, %77, %68 : vector<16x128xi1>, vector<16x128xf32>
    %c6 = arith.constant 6 : index
    %c0_42 = arith.constant 0 : index
    %c0_43 = arith.constant 0 : index
    %79 = vector.load %arg1[%c6, %c0_42, %c0_43] : memref<10x16x128xf32, #tpu.memory_space<vmem>>, vector<1x16x128xf32>
    %80 = vector.shape_cast %79 : vector<1x16x128xf32> to vector<16x128xf32>
    %81 = arith.addf %78, %80 : vector<16x128xf32>
    %cst_44 = arith.constant 1.000000e+00 : f32
    %82 = vector.broadcast %cst_44 : f32 to vector<16x128xf32>
    %83 = arith.cmpf oge, %81, %82 : vector<16x128xf32>
    %84 = arith.extui %83 : vector<16x128xi1> to vector<16x128xi32>
    %85 = arith.sitofp %84 : vector<16x128xi32> to vector<16x128xf32>
    %86 = arith.truncf %85 : vector<16x128xf32> to vector<16x128xbf16>
    %c6_45 = arith.constant 6 : index
    %c0_46 = arith.constant 0 : index
    %c0_47 = arith.constant 0 : index
    %87 = vector.load %arg2[%c6_45, %c0_46, %c0_47] : memref<10x16x128xbf16, #tpu.memory_space<vmem>>, vector<1x16x128xbf16>
    %88 = vector.shape_cast %87 : vector<1x16x128xbf16> to vector<16x128xbf16>
    %89 = vector.shape_cast %86 : vector<16x128xbf16> to vector<1x16x128xbf16>
    tpu.vector_store %arg2[%c6_45, %c0_46, %c0_47], %89 {strides = array<i32>} : memref<10x16x128xbf16, #tpu.memory_space<vmem>>, vector<1x16x128xbf16>,
    %cst_48 = arith.constant 0.000000e+00 : f32
    %90 = vector.broadcast %cst_48 : f32 to vector<16x128xf32>
    %91 = arith.select %83, %90, %81 : vector<16x128xi1>, vector<16x128xf32>
    %c7 = arith.constant 7 : index
    %c0_49 = arith.constant 0 : index
    %c0_50 = arith.constant 0 : index
    %92 = vector.load %arg1[%c7, %c0_49, %c0_50] : memref<10x16x128xf32, #tpu.memory_space<vmem>>, vector<1x16x128xf32>
    %93 = vector.shape_cast %92 : vector<1x16x128xf32> to vector<16x128xf32>
    %94 = arith.addf %91, %93 : vector<16x128xf32>
    %cst_51 = arith.constant 1.000000e+00 : f32
    %95 = vector.broadcast %cst_51 : f32 to vector<16x128xf32>
    %96 = arith.cmpf oge, %94, %95 : vector<16x128xf32>
    %97 = arith.extui %96 : vector<16x128xi1> to vector<16x128xi32>
    %98 = arith.sitofp %97 : vector<16x128xi32> to vector<16x128xf32>
    %99 = arith.truncf %98 : vector<16x128xf32> to vector<16x128xbf16>
    %c7_52 = arith.constant 7 : index
    %c0_53 = arith.constant 0 : index
    %c0_54 = arith.constant 0 : index
    %100 = vector.load %arg2[%c7_52, %c0_53, %c0_54] : memref<10x16x128xbf16, #tpu.memory_space<vmem>>, vector<1x16x128xbf16>
    %101 = vector.shape_cast %100 : vector<1x16x128xbf16> to vector<16x128xbf16>
    %102 = vector.shape_cast %99 : vector<16x128xbf16> to vector<1x16x128xbf16>
    tpu.vector_store %arg2[%c7_52, %c0_53, %c0_54], %102 {strides = array<i32>} : memref<10x16x128xbf16, #tpu.memory_space<vmem>>, vector<1x16x128xbf16>,
    %cst_55 = arith.constant 0.000000e+00 : f32
    %103 = vector.broadcast %cst_55 : f32 to vector<16x128xf32>
    %104 = arith.select %96, %103, %94 : vector<16x128xi1>, vector<16x128xf32>
    %c8 = arith.constant 8 : index
    %c0_56 = arith.constant 0 : index
    %c0_57 = arith.constant 0 : index
    %105 = vector.load %arg1[%c8, %c0_56, %c0_57] : memref<10x16x128xf32, #tpu.memory_space<vmem>>, vector<1x16x128xf32>
    %106 = vector.shape_cast %105 : vector<1x16x128xf32> to vector<16x128xf32>
    %107 = arith.addf %104, %106 : vector<16x128xf32>
    %cst_58 = arith.constant 1.000000e+00 : f32
    %108 = vector.broadcast %cst_58 : f32 to vector<16x128xf32>
    %109 = arith.cmpf oge, %107, %108 : vector<16x128xf32>
    %110 = arith.extui %109 : vector<16x128xi1> to vector<16x128xi32>
    %111 = arith.sitofp %110 : vector<16x128xi32> to vector<16x128xf32>
    %112 = arith.truncf %111 : vector<16x128xf32> to vector<16x128xbf16>
    %c8_59 = arith.constant 8 : index
    %c0_60 = arith.constant 0 : index
    %c0_61 = arith.constant 0 : index
    %113 = vector.load %arg2[%c8_59, %c0_60, %c0_61] : memref<10x16x128xbf16, #tpu.memory_space<vmem>>, vector<1x16x128xbf16>
    %114 = vector.shape_cast %113 : vector<1x16x128xbf16> to vector<16x128xbf16>
    %115 = vector.shape_cast %112 : vector<16x128xbf16> to vector<1x16x128xbf16>
    tpu.vector_store %arg2[%c8_59, %c0_60, %c0_61], %115 {strides = array<i32>} : memref<10x16x128xbf16, #tpu.memory_space<vmem>>, vector<1x16x128xbf16>,
    %cst_62 = arith.constant 0.000000e+00 : f32
    %116 = vector.broadcast %cst_62 : f32 to vector<16x128xf32>
    %117 = arith.select %109, %116, %107 : vector<16x128xi1>, vector<16x128xf32>
    %c9 = arith.constant 9 : index
    %c0_63 = arith.constant 0 : index
    %c0_64 = arith.constant 0 : index
    %118 = vector.load %arg1[%c9, %c0_63, %c0_64] : memref<10x16x128xf32, #tpu.memory_space<vmem>>, vector<1x16x128xf32>
    %119 = vector.shape_cast %118 : vector<1x16x128xf32> to vector<16x128xf32>
    %120 = arith.addf %117, %119 : vector<16x128xf32>
    %cst_65 = arith.constant 1.000000e+00 : f32
    %121 = vector.broadcast %cst_65 : f32 to vector<16x128xf32>
    %122 = arith.cmpf oge, %120, %121 : vector<16x128xf32>
    %123 = arith.extui %122 : vector<16x128xi1> to vector<16x128xi32>
    %124 = arith.sitofp %123 : vector<16x128xi32> to vector<16x128xf32>
    %125 = arith.truncf %124 : vector<16x128xf32> to vector<16x128xbf16>
    %c9_66 = arith.constant 9 : index
    %c0_67 = arith.constant 0 : index
    %c0_68 = arith.constant 0 : index
    %126 = vector.load %arg2[%c9_66, %c0_67, %c0_68] : memref<10x16x128xbf16, #tpu.memory_space<vmem>>, vector<1x16x128xbf16>
    %127 = vector.shape_cast %126 : vector<1x16x128xbf16> to vector<16x128xbf16>
    %128 = vector.shape_cast %125 : vector<16x128xbf16> to vector<1x16x128xbf16>
    tpu.vector_store %arg2[%c9_66, %c0_67, %c0_68], %128 {strides = array<i32>} : memref<10x16x128xbf16, #tpu.memory_space<vmem>>, vector<1x16x128xbf16>,
    return
  }
  func.func @transform_0(%arg0: i32) -> (i32, i32, i32) {
    %c0_i32 = arith.constant 0 : i32
    %c0_i32_0 = arith.constant 0 : i32
    %c0_i32_1 = arith.constant 0 : i32
    return %c0_i32, %arg0, %c0_i32_0 : i32, i32, i32
  }
  func.func @transform_1(%arg0: i32) -> (i32, i32, i32) {
    %c0_i32 = arith.constant 0 : i32
    %c0_i32_0 = arith.constant 0 : i32
    %c0_i32_1 = arith.constant 0 : i32
    return %c0_i32, %arg0, %c0_i32_0 : i32, i32, i32
  }
}

module attributes {stable_mosaic.version = 11 : i64} {
  func.func @_fc_if_rate_kernel(%arg0: i32, %arg1: memref<10x8x512xbf16, #tpu.memory_space<vmem>>, %arg2: memref<512x128xbf16, #tpu.memory_space<vmem>>, %arg3: memref<8x128xf32, #tpu.memory_space<vmem>>) attributes {dimension_semantics = [#tpu.dimension_semantics<arbitrary>], iteration_bounds = array<i64: 1>, scalar_prefetch = 0 : i64, scratch_operands = 0 : i64, tpu.core_type = #tpu.core_type<tc>, window_params = [{pipeline_mode = #tpu.pipeline_mode<synchronous>, transform_indices = @transform_0, window_bounds = array<i64: 10, 8, 512>}, {pipeline_mode = #tpu.pipeline_mode<synchronous>, transform_indices = @transform_1, window_bounds = array<i64: 512, 128>}, {pipeline_mode = #tpu.pipeline_mode<synchronous>, transform_indices = @transform_2, window_bounds = array<i64: 8, 128>}]} {
    %c0 = arith.constant 0 : index
    %c0_0 = arith.constant 0 : index
    %0 = vector.load %arg2[%c0, %c0_0] : memref<512x128xbf16, #tpu.memory_space<vmem>>, vector<512x128xbf16>
    %cst = arith.constant 0.000000e+00 : f32
    %1 = vector.broadcast %cst : f32 to vector<8x128xf32>
    %cst_1 = arith.constant 0.000000e+00 : f32
    %2 = vector.broadcast %cst_1 : f32 to vector<8x128xf32>
    %c0_2 = arith.constant 0 : index
    %c0_3 = arith.constant 0 : index
    %c0_4 = arith.constant 0 : index
    %3 = vector.load %arg1[%c0_2, %c0_3, %c0_4] : memref<10x8x512xbf16, #tpu.memory_space<vmem>>, vector<1x8x512xbf16>
    %4 = vector.shape_cast %3 : vector<1x8x512xbf16> to vector<8x512xbf16>
    %cst_5 = arith.constant dense<0.000000e+00> : vector<8x128xf32>
    %5 = tpu.matmul %4, %0, %cst_5 {dimension_numbers = #tpu.dot_dimension_numbers<[1], [0], [0], [1], [0, 0, 1, 1], [], []>} : vector<8x512xbf16>, vector<512x128xbf16>, vector<8x128xf32> -> vector<8x128xf32>
    %6 = arith.addf %1, %5 : vector<8x128xf32>
    %cst_6 = arith.constant 1.000000e+00 : f32
    %7 = vector.broadcast %cst_6 : f32 to vector<8x128xf32>
    %8 = arith.cmpf oge, %6, %7 : vector<8x128xf32>
    %9 = arith.extui %8 : vector<8x128xi1> to vector<8x128xi32>
    %10 = arith.sitofp %9 : vector<8x128xi32> to vector<8x128xf32>
    %11 = arith.addf %2, %10 : vector<8x128xf32>
    %cst_7 = arith.constant 0.000000e+00 : f32
    %12 = vector.broadcast %cst_7 : f32 to vector<8x128xf32>
    %13 = arith.select %8, %12, %6 : vector<8x128xi1>, vector<8x128xf32>
    %c1 = arith.constant 1 : index
    %c0_8 = arith.constant 0 : index
    %c0_9 = arith.constant 0 : index
    %14 = vector.load %arg1[%c1, %c0_8, %c0_9] : memref<10x8x512xbf16, #tpu.memory_space<vmem>>, vector<1x8x512xbf16>
    %15 = vector.shape_cast %14 : vector<1x8x512xbf16> to vector<8x512xbf16>
    %cst_10 = arith.constant dense<0.000000e+00> : vector<8x128xf32>
    %16 = tpu.matmul %15, %0, %cst_10 {dimension_numbers = #tpu.dot_dimension_numbers<[1], [0], [0], [1], [0, 0, 1, 1], [], []>} : vector<8x512xbf16>, vector<512x128xbf16>, vector<8x128xf32> -> vector<8x128xf32>
    %17 = arith.addf %13, %16 : vector<8x128xf32>
    %cst_11 = arith.constant 1.000000e+00 : f32
    %18 = vector.broadcast %cst_11 : f32 to vector<8x128xf32>
    %19 = arith.cmpf oge, %17, %18 : vector<8x128xf32>
    %20 = arith.extui %19 : vector<8x128xi1> to vector<8x128xi32>
    %21 = arith.sitofp %20 : vector<8x128xi32> to vector<8x128xf32>
    %22 = arith.addf %11, %21 : vector<8x128xf32>
    %cst_12 = arith.constant 0.000000e+00 : f32
    %23 = vector.broadcast %cst_12 : f32 to vector<8x128xf32>
    %24 = arith.select %19, %23, %17 : vector<8x128xi1>, vector<8x128xf32>
    %c2 = arith.constant 2 : index
    %c0_13 = arith.constant 0 : index
    %c0_14 = arith.constant 0 : index
    %25 = vector.load %arg1[%c2, %c0_13, %c0_14] : memref<10x8x512xbf16, #tpu.memory_space<vmem>>, vector<1x8x512xbf16>
    %26 = vector.shape_cast %25 : vector<1x8x512xbf16> to vector<8x512xbf16>
    %cst_15 = arith.constant dense<0.000000e+00> : vector<8x128xf32>
    %27 = tpu.matmul %26, %0, %cst_15 {dimension_numbers = #tpu.dot_dimension_numbers<[1], [0], [0], [1], [0, 0, 1, 1], [], []>} : vector<8x512xbf16>, vector<512x128xbf16>, vector<8x128xf32> -> vector<8x128xf32>
    %28 = arith.addf %24, %27 : vector<8x128xf32>
    %cst_16 = arith.constant 1.000000e+00 : f32
    %29 = vector.broadcast %cst_16 : f32 to vector<8x128xf32>
    %30 = arith.cmpf oge, %28, %29 : vector<8x128xf32>
    %31 = arith.extui %30 : vector<8x128xi1> to vector<8x128xi32>
    %32 = arith.sitofp %31 : vector<8x128xi32> to vector<8x128xf32>
    %33 = arith.addf %22, %32 : vector<8x128xf32>
    %cst_17 = arith.constant 0.000000e+00 : f32
    %34 = vector.broadcast %cst_17 : f32 to vector<8x128xf32>
    %35 = arith.select %30, %34, %28 : vector<8x128xi1>, vector<8x128xf32>
    %c3 = arith.constant 3 : index
    %c0_18 = arith.constant 0 : index
    %c0_19 = arith.constant 0 : index
    %36 = vector.load %arg1[%c3, %c0_18, %c0_19] : memref<10x8x512xbf16, #tpu.memory_space<vmem>>, vector<1x8x512xbf16>
    %37 = vector.shape_cast %36 : vector<1x8x512xbf16> to vector<8x512xbf16>
    %cst_20 = arith.constant dense<0.000000e+00> : vector<8x128xf32>
    %38 = tpu.matmul %37, %0, %cst_20 {dimension_numbers = #tpu.dot_dimension_numbers<[1], [0], [0], [1], [0, 0, 1, 1], [], []>} : vector<8x512xbf16>, vector<512x128xbf16>, vector<8x128xf32> -> vector<8x128xf32>
    %39 = arith.addf %35, %38 : vector<8x128xf32>
    %cst_21 = arith.constant 1.000000e+00 : f32
    %40 = vector.broadcast %cst_21 : f32 to vector<8x128xf32>
    %41 = arith.cmpf oge, %39, %40 : vector<8x128xf32>
    %42 = arith.extui %41 : vector<8x128xi1> to vector<8x128xi32>
    %43 = arith.sitofp %42 : vector<8x128xi32> to vector<8x128xf32>
    %44 = arith.addf %33, %43 : vector<8x128xf32>
    %cst_22 = arith.constant 0.000000e+00 : f32
    %45 = vector.broadcast %cst_22 : f32 to vector<8x128xf32>
    %46 = arith.select %41, %45, %39 : vector<8x128xi1>, vector<8x128xf32>
    %c4 = arith.constant 4 : index
    %c0_23 = arith.constant 0 : index
    %c0_24 = arith.constant 0 : index
    %47 = vector.load %arg1[%c4, %c0_23, %c0_24] : memref<10x8x512xbf16, #tpu.memory_space<vmem>>, vector<1x8x512xbf16>
    %48 = vector.shape_cast %47 : vector<1x8x512xbf16> to vector<8x512xbf16>
    %cst_25 = arith.constant dense<0.000000e+00> : vector<8x128xf32>
    %49 = tpu.matmul %48, %0, %cst_25 {dimension_numbers = #tpu.dot_dimension_numbers<[1], [0], [0], [1], [0, 0, 1, 1], [], []>} : vector<8x512xbf16>, vector<512x128xbf16>, vector<8x128xf32> -> vector<8x128xf32>
    %50 = arith.addf %46, %49 : vector<8x128xf32>
    %cst_26 = arith.constant 1.000000e+00 : f32
    %51 = vector.broadcast %cst_26 : f32 to vector<8x128xf32>
    %52 = arith.cmpf oge, %50, %51 : vector<8x128xf32>
    %53 = arith.extui %52 : vector<8x128xi1> to vector<8x128xi32>
    %54 = arith.sitofp %53 : vector<8x128xi32> to vector<8x128xf32>
    %55 = arith.addf %44, %54 : vector<8x128xf32>
    %cst_27 = arith.constant 0.000000e+00 : f32
    %56 = vector.broadcast %cst_27 : f32 to vector<8x128xf32>
    %57 = arith.select %52, %56, %50 : vector<8x128xi1>, vector<8x128xf32>
    %c5 = arith.constant 5 : index
    %c0_28 = arith.constant 0 : index
    %c0_29 = arith.constant 0 : index
    %58 = vector.load %arg1[%c5, %c0_28, %c0_29] : memref<10x8x512xbf16, #tpu.memory_space<vmem>>, vector<1x8x512xbf16>
    %59 = vector.shape_cast %58 : vector<1x8x512xbf16> to vector<8x512xbf16>
    %cst_30 = arith.constant dense<0.000000e+00> : vector<8x128xf32>
    %60 = tpu.matmul %59, %0, %cst_30 {dimension_numbers = #tpu.dot_dimension_numbers<[1], [0], [0], [1], [0, 0, 1, 1], [], []>} : vector<8x512xbf16>, vector<512x128xbf16>, vector<8x128xf32> -> vector<8x128xf32>
    %61 = arith.addf %57, %60 : vector<8x128xf32>
    %cst_31 = arith.constant 1.000000e+00 : f32
    %62 = vector.broadcast %cst_31 : f32 to vector<8x128xf32>
    %63 = arith.cmpf oge, %61, %62 : vector<8x128xf32>
    %64 = arith.extui %63 : vector<8x128xi1> to vector<8x128xi32>
    %65 = arith.sitofp %64 : vector<8x128xi32> to vector<8x128xf32>
    %66 = arith.addf %55, %65 : vector<8x128xf32>
    %cst_32 = arith.constant 0.000000e+00 : f32
    %67 = vector.broadcast %cst_32 : f32 to vector<8x128xf32>
    %68 = arith.select %63, %67, %61 : vector<8x128xi1>, vector<8x128xf32>
    %c6 = arith.constant 6 : index
    %c0_33 = arith.constant 0 : index
    %c0_34 = arith.constant 0 : index
    %69 = vector.load %arg1[%c6, %c0_33, %c0_34] : memref<10x8x512xbf16, #tpu.memory_space<vmem>>, vector<1x8x512xbf16>
    %70 = vector.shape_cast %69 : vector<1x8x512xbf16> to vector<8x512xbf16>
    %cst_35 = arith.constant dense<0.000000e+00> : vector<8x128xf32>
    %71 = tpu.matmul %70, %0, %cst_35 {dimension_numbers = #tpu.dot_dimension_numbers<[1], [0], [0], [1], [0, 0, 1, 1], [], []>} : vector<8x512xbf16>, vector<512x128xbf16>, vector<8x128xf32> -> vector<8x128xf32>
    %72 = arith.addf %68, %71 : vector<8x128xf32>
    %cst_36 = arith.constant 1.000000e+00 : f32
    %73 = vector.broadcast %cst_36 : f32 to vector<8x128xf32>
    %74 = arith.cmpf oge, %72, %73 : vector<8x128xf32>
    %75 = arith.extui %74 : vector<8x128xi1> to vector<8x128xi32>
    %76 = arith.sitofp %75 : vector<8x128xi32> to vector<8x128xf32>
    %77 = arith.addf %66, %76 : vector<8x128xf32>
    %cst_37 = arith.constant 0.000000e+00 : f32
    %78 = vector.broadcast %cst_37 : f32 to vector<8x128xf32>
    %79 = arith.select %74, %78, %72 : vector<8x128xi1>, vector<8x128xf32>
    %c7 = arith.constant 7 : index
    %c0_38 = arith.constant 0 : index
    %c0_39 = arith.constant 0 : index
    %80 = vector.load %arg1[%c7, %c0_38, %c0_39] : memref<10x8x512xbf16, #tpu.memory_space<vmem>>, vector<1x8x512xbf16>
    %81 = vector.shape_cast %80 : vector<1x8x512xbf16> to vector<8x512xbf16>
    %cst_40 = arith.constant dense<0.000000e+00> : vector<8x128xf32>
    %82 = tpu.matmul %81, %0, %cst_40 {dimension_numbers = #tpu.dot_dimension_numbers<[1], [0], [0], [1], [0, 0, 1, 1], [], []>} : vector<8x512xbf16>, vector<512x128xbf16>, vector<8x128xf32> -> vector<8x128xf32>
    %83 = arith.addf %79, %82 : vector<8x128xf32>
    %cst_41 = arith.constant 1.000000e+00 : f32
    %84 = vector.broadcast %cst_41 : f32 to vector<8x128xf32>
    %85 = arith.cmpf oge, %83, %84 : vector<8x128xf32>
    %86 = arith.extui %85 : vector<8x128xi1> to vector<8x128xi32>
    %87 = arith.sitofp %86 : vector<8x128xi32> to vector<8x128xf32>
    %88 = arith.addf %77, %87 : vector<8x128xf32>
    %cst_42 = arith.constant 0.000000e+00 : f32
    %89 = vector.broadcast %cst_42 : f32 to vector<8x128xf32>
    %90 = arith.select %85, %89, %83 : vector<8x128xi1>, vector<8x128xf32>
    %c8 = arith.constant 8 : index
    %c0_43 = arith.constant 0 : index
    %c0_44 = arith.constant 0 : index
    %91 = vector.load %arg1[%c8, %c0_43, %c0_44] : memref<10x8x512xbf16, #tpu.memory_space<vmem>>, vector<1x8x512xbf16>
    %92 = vector.shape_cast %91 : vector<1x8x512xbf16> to vector<8x512xbf16>
    %cst_45 = arith.constant dense<0.000000e+00> : vector<8x128xf32>
    %93 = tpu.matmul %92, %0, %cst_45 {dimension_numbers = #tpu.dot_dimension_numbers<[1], [0], [0], [1], [0, 0, 1, 1], [], []>} : vector<8x512xbf16>, vector<512x128xbf16>, vector<8x128xf32> -> vector<8x128xf32>
    %94 = arith.addf %90, %93 : vector<8x128xf32>
    %cst_46 = arith.constant 1.000000e+00 : f32
    %95 = vector.broadcast %cst_46 : f32 to vector<8x128xf32>
    %96 = arith.cmpf oge, %94, %95 : vector<8x128xf32>
    %97 = arith.extui %96 : vector<8x128xi1> to vector<8x128xi32>
    %98 = arith.sitofp %97 : vector<8x128xi32> to vector<8x128xf32>
    %99 = arith.addf %88, %98 : vector<8x128xf32>
    %cst_47 = arith.constant 0.000000e+00 : f32
    %100 = vector.broadcast %cst_47 : f32 to vector<8x128xf32>
    %101 = arith.select %96, %100, %94 : vector<8x128xi1>, vector<8x128xf32>
    %c9 = arith.constant 9 : index
    %c0_48 = arith.constant 0 : index
    %c0_49 = arith.constant 0 : index
    %102 = vector.load %arg1[%c9, %c0_48, %c0_49] : memref<10x8x512xbf16, #tpu.memory_space<vmem>>, vector<1x8x512xbf16>
    %103 = vector.shape_cast %102 : vector<1x8x512xbf16> to vector<8x512xbf16>
    %cst_50 = arith.constant dense<0.000000e+00> : vector<8x128xf32>
    %104 = tpu.matmul %103, %0, %cst_50 {dimension_numbers = #tpu.dot_dimension_numbers<[1], [0], [0], [1], [0, 0, 1, 1], [], []>} : vector<8x512xbf16>, vector<512x128xbf16>, vector<8x128xf32> -> vector<8x128xf32>
    %105 = arith.addf %101, %104 : vector<8x128xf32>
    %cst_51 = arith.constant 1.000000e+00 : f32
    %106 = vector.broadcast %cst_51 : f32 to vector<8x128xf32>
    %107 = arith.cmpf oge, %105, %106 : vector<8x128xf32>
    %108 = arith.extui %107 : vector<8x128xi1> to vector<8x128xi32>
    %109 = arith.sitofp %108 : vector<8x128xi32> to vector<8x128xf32>
    %110 = arith.addf %99, %109 : vector<8x128xf32>
    %cst_52 = arith.constant 1.000000e-01 : f32
    %111 = vector.broadcast %cst_52 : f32 to vector<8x128xf32>
    %112 = arith.mulf %110, %111 : vector<8x128xf32>
    %c0_53 = arith.constant 0 : index
    %c0_54 = arith.constant 0 : index
    %113 = vector.load %arg3[%c0_53, %c0_54] : memref<8x128xf32, #tpu.memory_space<vmem>>, vector<8x128xf32>
    tpu.vector_store %arg3[%c0_53, %c0_54], %112 {strides = array<i32>} : memref<8x128xf32, #tpu.memory_space<vmem>>, vector<8x128xf32>,
    return
  }
  func.func @transform_0(%arg0: i32) -> (i32, i32, i32) {
    %c0_i32 = arith.constant 0 : i32
    %c0_i32_0 = arith.constant 0 : i32
    %c0_i32_1 = arith.constant 0 : i32
    %c0_i32_2 = arith.constant 0 : i32
    return %c0_i32, %c0_i32_0, %c0_i32_1 : i32, i32, i32
  }
  func.func @transform_1(%arg0: i32) -> (i32, i32) {
    %c0_i32 = arith.constant 0 : i32
    %c0_i32_0 = arith.constant 0 : i32
    %c0_i32_1 = arith.constant 0 : i32
    return %c0_i32, %c0_i32_0 : i32, i32
  }
  func.func @transform_2(%arg0: i32) -> (i32, i32) {
    %c0_i32 = arith.constant 0 : i32
    %c0_i32_0 = arith.constant 0 : i32
    %c0_i32_1 = arith.constant 0 : i32
    return %c0_i32, %c0_i32_0 : i32, i32
  }
}

</mosaic_0001>

<bundles_post_ra>
// kernel: snn_forward.5
= control target key start
LH: loop header
LB: loop body
LE: loop exit
PB: predicated region body
PF: predicated region fallthrough
CT: control target
= control target key end

     0   :  { %9 = vsyncpa [#allocation3], 0  ;;  %s989_s0 = inlined_call_operand.vmem [shape: bf16[1152,32], index: 0, kind: input, shape index: {}]   ;;  %s990_s1 = inlined_call_operand.hbm [shape: bf16[32,128], index: 1, kind: input, shape index: {}]   ;;  %s991_s2 = inlined_call_operand.hbm [shape: f32[1,128], index: 2, kind: input, shape index: {}]   ;;  %s992_s3 = inlined_call_operand.hbm [shape: f32[1,128], index: 3, kind: input, shape index: {}]   ;;  %s993_s4 = inlined_call_operand.vmem [shape: f32[1152,128], index: 4, kind: output, shape index: {}]  }
   0x1   :  { %10 = vsyncpa [#allocation5], 0  ;;  %s837_s15 = smov 0  }
   0x2 LB: > { %s807_s16 = smov [#allocation4]   ;;  %s585_s18 = sadd.s32 4294967295, %s805_s15   ;;  %s805_s15 = sphi %s837_s15, %s16_s15  }
   0x3   : > { %s162_s17 = sshll.u32 %s807_s16, 4  ;;  %p587_p0 = scmp.ge.s32.totalorder %s805_s15, 1  ;;  %s163_s17 = int_to_ptr.vmem [resolvable:$true] %s162_s17 }
   0x4   : > { %p136_p1 = scmp.lt.s32.totalorder %s805_s15, 10  ;;  %p847_p2 = scmp.eq.s32.totalorder %s585_s18, 0 }
   0x5   : > { %s808_s21 = smov [#allocation2]   ;;  %s809_s24 = smov [#allocation6]  }
   0x6   : > { %s997_s19 = scalar_select %p847_p2, 1, 0 }
   0x7   : > { %p851_p3 = pnand %p587_p0, %p136_p1  ;;  %s148_s22 = sshll.u32 %s808_s21, 4  ;;  %s863_s22 = int_to_ptr.vmem [resolvable:$true] %s148_s22 }
   0x8   : > { %s173_s25 = sshll.u32 %s809_s24, 4  ;;  %s707_s28 = scalar_lea.hbm %s991_s2, 16  ;;  %s865_s25 = int_to_ptr.vmem [resolvable:$true] %s173_s25 }
   0x9   : > { %s998_s20 = scalar_select %p851_p3, 1, 0 }
   0xa   : > { %p668_p4 = pneg %p851_p3  ;;  %p708_p6 = scmp.ne.s32.totalorder %s991_s2, %s707_s28 }
   0xb   : > { %p714_p10 = scmp.lt.u32.totalorder %s707_s28, %s991_s2 }
   0xc   : > { %p859_p5 = pnand %p847_p2, %p668_p4 }
   0xe   : > { %p875_p7 = pneg %p859_p5 }
  0x10   : > { %p710_p8 = pnand %p875_p7, %p708_p6 }
  0x12   : > { %p711_p9 = pneg %p710_p8 }
  0x14   : > { %p716_p11 = pnand %p714_p10, %p711_p9 }
  0x16   : > { %719 = shalt.err (!%p716_p11)
}
  0x17   : > { %s720_s8 = scalar_lea.vmem %s163_s17, 16  ;;  %s727_s9 = scalar_lea.vmem %s163_s17, 32 }
  0x18   : > { %p721_p12 = scmp.ne.s32.totalorder %s163_s17, %s720_s8  ;;  %p728_p1 = scmp.lt.s32.totalorder %s163_s17, %s163_s17 }
  0x19   : > { %p729_p4 = scmp.lt.s32.totalorder %s727_s9, %s720_s8 }
  0x1a   : > { %p723_p13 = pnand %p721_p12, %p875_p7 }
  0x1b   : > { %p730_p2 = por %p729_p4, %p728_p1 }
  0x1c   : > { %p724_p0 = pneg %p723_p13 }
  0x1e   : > { %p731_p3 = pnand %p730_p2, %p724_p0 }
  0x20   : > { %734 = shalt.err (!%p731_p3)
}
  0x21   : > { %674 = dma.hbm_to_vmem [thread:$0]  (!%p859_p5), %s991_s2, 16, %s163_s17, [#allocation5]  }
  0x22   : > { %s735_s14 = scalar_lea.hbm %s990_s1, 256 }
  0x23   : > { %p736_p6 = scmp.ne.s32.totalorder %s990_s1, %s735_s14  ;;  %p742_p2 = scmp.lt.u32.totalorder %s735_s14, %s990_s1 }
  0x25   : > { %p738_p8 = pnand %p736_p6, %p875_p7 }
  0x27   : > { %p739_p9 = pneg %p738_p8 }
  0x29   : > { %p744_p3 = pnand %p742_p2, %p739_p9 }
  0x2b   : > { %747 = shalt.err (!%p744_p3)
}
  0x2c   : > { %s748_s17 = scalar_lea.vmem %s863_s22, 256  ;;  %p756_p13 = scmp.lt.s32.totalorder %s863_s22, %s863_s22 }
  0x2d   : > { %p749_p10 = scmp.ne.s32.totalorder %s863_s22, %s748_s17  ;;  %p757_p0 = scmp.lt.s32.totalorder %s748_s17, %s748_s17 }
  0x2f   : > { %p751_p11 = pnand %p749_p10, %p875_p7  ;;  %p758_p1 = por %p757_p0, %p756_p13 }
  0x31   : > { %p752_p12 = pneg %p751_p11 }
  0x33   : > { %p759_p4 = pnand %p758_p1, %p752_p12 }
  0x35   : > { %762 = shalt.err (!%p759_p4)
}
  0x36   : > { %s810_s27 = smov 64   ;;  %s811_s28 = smov 4  }
  0x37   : > { %671 = dma.hbm_to_vmem [thread:$0]  (!%p859_p5), %s990_s1, 256, %s863_s22, [#allocation3], %s810_s27, %s810_s27, %s811_s28  }
  0x38   : > { %s763_s8 = scalar_lea.hbm %s992_s3, 16 }
  0x39   : > { %p764_p6 = scmp.ne.s32.totalorder %s992_s3, %s763_s8  ;;  %p770_p2 = scmp.lt.u32.totalorder %s763_s8, %s992_s3 }
  0x3b   : > { %p766_p8 = pnand %p764_p6, %p875_p7 }
  0x3d   : > { %p767_p9 = pneg %p766_p8 }
  0x3f   : > { %p772_p3 = pnand %p770_p2, %p767_p9 }
  0x41   : > { %775 = shalt.err (!%p772_p3)
}
  0x42   : > { %s776_s22 = scalar_lea.vmem %s865_s25, 16  ;;  %s783_s13 = scalar_lea.vmem %s865_s25, 32 }
  0x43   : > { %p777_p10 = scmp.ne.s32.totalorder %s865_s25, %s776_s22  ;;  %p784_p13 = scmp.lt.s32.totalorder %s865_s25, %s865_s25 }
  0x44   : > { %p785_p0 = scmp.lt.s32.totalorder %s783_s13, %s776_s22 }
  0x45   : > { %p779_p11 = pnand %p777_p10, %p875_p7 }
  0x46   : > { %p786_p1 = por %p785_p0, %p784_p13 }
  0x47   : > { %p780_p12 = pneg %p779_p11 }
  0x49   : > { %p787_p4 = pnand %p786_p1, %p780_p12 }
  0x4b   : > { %790 = shalt.err (!%p787_p4)
}
  0x4c   : > { %677 = dma.hbm_to_vmem [thread:$0]  (!%p859_p5), %s992_s3, 16, %s865_s25, [#allocation5]  }
  0x4d   : > { %p1001_p6 = scmp.ne.s32.totalorder %s998_s20, 0 }
  0x4e   : > { %p1002_p7 = scmp.ne.s32.totalorder (!%p1001_p6), %s997_s19, 0 }
  0x4f   : > { %195 = sbr.rel (%p1001_p6) target bundleno = 326 (0x146), region = 36 }
  0x56   : > { %796 = dma.done.wait (%p1002_p7), [#allocation3], 256  }
  0x57   : > { %798 = vsyncadd (%p1002_p7), [#allocation3], 4294967040 }
  0x58   : > { %800 = dma.done.wait (%p1002_p7), [#allocation5], 32  }
  0x59   : > { %802 = vsyncadd (%p1002_p7), [#allocation5], 4294967264  ;;  %s596_s23 = sshll.u32 %s585_s18, 4  ;;  %v697_v0 = vld [vmem:[#allocation2] sm:$0xff]   ;;  %v698_v1 = vld [vmem:[#allocation2 + $0x8] sm:$0xff]   ;;  %vm314_vm0 = vcmask 261120  }
  0x5a   : > { %p230_p8 = scmp.lt.s32.totalorder %s596_s23, 143  ;;  %632 = vmatprep.subr.bf16.mxu0 %v697_v0  ;;  %652 = vmatprep.subr.bf16.mxu1 %v697_v0  ;;  %v618_v10 = vld [vmem:[#allocation4] ss:$0 sm:$0xff]  ;;  %v619_v12 = vld [vmem:[#allocation6] ss:$0 sm:$0xff] }
  0x5b   : > { %633 = vmatpush3.bf16.msra.mxu0 %v697_v0  ;;  %654 = vmatpush3.bf16.msra.mxu1 %v697_v0 }
  0x5c   : > { %s1004_s23 = smov (!%p230_p8, %s596_s23), 143  ;;  %634 = vmatprep.subr.bf16.mxu0 %v698_v1  ;;  %653 = vmatprep.subr.bf16.mxu1 %v698_v1 }
  0x5d   : > { %s597_s20 = sshll.u32 %s1004_s23, 2  ;;  %s599_s18 = sshll.u32 %s1004_s23, 3 }
  0x5e   : > { %s233_s21 = scalar_lea.vmem %s989_s0, %s597_s20  ;;  %s968_s26 = scalar_lea.vmem %s993_s4, %s599_s18 }
  0x5f   : > { %v699_v2 = vld [vmem:[%s233_s21] sm:$0xff]   ;;  %v701_v4 = vld [vmem:[%s233_s21 + $0x8] sm:$0xff]   ;;  %v703_v6 = vld [vmem:[%s233_s21 + $0x10] sm:$0xff]   ;;  %635 = vmatpush3.bf16.msra.mxu0 %v698_v1  ;;  %655 = vmatpush3.bf16.msra.mxu1 %v698_v1 }
  0x60   : > { %v700_v3 = vld [vmem:[%s233_s21 + $0x20] sm:$0xff]   ;;  %636 = vmatprep.mubr.msk.bf16.mxu0 %vm314_vm0, %v699_v2  ;;  %v702_v5 = vld [vmem:[%s233_s21 + $0x28] sm:$0xff]   ;;  %v704_v7 = vld [vmem:[%s233_s21 + $0x30] sm:$0xff]  }
  0x61   : > { %644 = vmatprep.mubr.msk.bf16.mxu1 %vm314_vm0, %v700_v3  ;;  %v705_v8 = vld [vmem:[%s233_s21 + $0x18] sm:$0xff]  }
  0x62   : > { %637 = vmatmul.mubr.msk.bf16.vlgmr.msra.gmra.mrb[0].mxu0 %vm314_vm0, %v701_v4  ;;  %645 = vmatmul.mubr.msk.bf16.vlgmr.msra.gmra.mrb[0].mxu1 %vm314_vm0, %v702_v5  ;;  %v706_v9 = vld [vmem:[%s233_s21 + $0x38] sm:$0xff]  }
  0x63   : > { %640 = vmatprep.mubr.msk.bf16.mxu0 %vm314_vm0, %v703_v6  ;;  %648 = vmatprep.mubr.msk.bf16.mxu1 %vm314_vm0, %v704_v7 }
  0x6a   : > { %641 = vmatmul.mubr.msk.bf16.gmra.mrb[4].mxu0 %vm314_vm0, %v705_v8  ;;  %649 = vmatmul.mubr.msk.bf16.gmra.mrb[4].mxu1 %vm314_vm0, %v706_v9 }
 0x135   : > { %v638_v11 = vpop.f32.mrb[0].mxu0  ;;  %v646_v13 = vpop.f32.mrb[0].mxu1 }
 0x136   : > { %v445_v14 = vmul.f32 %v638_v11, %v618_v10  ;;  %v453_v15 = vmul.f32 %v646_v13, %v618_v10  ;;  %v373_v16 = vpop.f32.mrb[1].mxu0  ;;  %v405_v17 = vpop.f32.mrb[1].mxu1 }
 0x137   : > { %v443_v18 = vmul.f32 %v618_v10, %v373_v16  ;;  %v451_v19 = vmul.f32 %v618_v10, %v405_v17  ;;  %v639_v20 = vpop.f32.mrb[2].mxu0  ;;  %v647_v21 = vpop.f32.mrb[2].mxu1 }
 0x138   : > { %v468_v22 = vadd.f32 %v619_v12, %v445_v14  ;;  %v476_v23 = vadd.f32 %v619_v12, %v453_v15  ;;  %v446_v24 = vmul.f32 %v639_v20, %v618_v10  ;;  %v454_v25 = vmul.f32 %v647_v21, %v618_v10  ;;  %v376_v26 = vpop.f32.mrb[3].mxu0  ;;  %v408_v27 = vpop.f32.mrb[3].mxu1 }
 0x139   : > { %v466_v28 = vadd.f32 %v619_v12, %v443_v18  ;;  %v474_v29 = vadd.f32 %v619_v12, %v451_v19  ;;  %v444_v30 = vmul.f32 %v618_v10, %v376_v26  ;;  %v452_v31 = vmul.f32 %v618_v10, %v408_v27 }
 0x13a   : > { %484 = vst [vmem:[%s968_s26 + $0x10] sm:$0xff] %v468_v22  ;;  %492 = vst [vmem:[%s968_s26 + $0x50] sm:$0xff] %v476_v23  ;;  %v469_v32 = vadd.f32 %v619_v12, %v446_v24  ;;  %v477_v33 = vadd.f32 %v619_v12, %v454_v25 }
 0x13b   : > { %482 = vst [vmem:[%s968_s26] sm:$0xff] %v466_v28  ;;  %490 = vst [vmem:[%s968_s26 + $0x40] sm:$0xff] %v474_v29  ;;  %v467_v34 = vadd.f32 %v619_v12, %v444_v30  ;;  %v475_v35 = vadd.f32 %v619_v12, %v452_v31 }
 0x13c   : > { %485 = vst [vmem:[%s968_s26 + $0x18] sm:$0xff] %v469_v32  ;;  %493 = vst [vmem:[%s968_s26 + $0x58] sm:$0xff] %v477_v33 }
 0x13d   : > { %483 = vst [vmem:[%s968_s26 + $0x8] sm:$0xff] %v467_v34  ;;  %491 = vst [vmem:[%s968_s26 + $0x48] sm:$0xff] %v475_v35  ;;  %v642_v36 = vpop.f32.mrb[4].mxu0  ;;  %v650_v37 = vpop.f32.mrb[4].mxu1 }
 0x13e   : > { %v449_v38 = vmul.f32 %v642_v36, %v618_v10  ;;  %v457_v39 = vmul.f32 %v650_v37, %v618_v10  ;;  %v389_v40 = vpop.f32.mrb[5].mxu0  ;;  %v421_v41 = vpop.f32.mrb[5].mxu1 }
 0x13f   : > { %v447_v42 = vmul.f32 %v618_v10, %v389_v40  ;;  %v455_v43 = vmul.f32 %v618_v10, %v421_v41  ;;  %v643_v44 = vpop.f32.mrb[6].mxu0  ;;  %v651_v45 = vpop.f32.mrb[6].mxu1 }
 0x140   : > { %v472_v46 = vadd.f32 %v619_v12, %v449_v38  ;;  %v480_v47 = vadd.f32 %v619_v12, %v457_v39  ;;  %v450_v48 = vmul.f32 %v643_v44, %v618_v10  ;;  %v458_v49 = vmul.f32 %v651_v45, %v618_v10  ;;  %v392_v50 = vpop.f32.mrb[7].mxu0  ;;  %v424_v51 = vpop.f32.mrb[7].mxu1 }
 0x141   : > { %v470_v52 = vadd.f32 %v619_v12, %v447_v42  ;;  %v478_v53 = vadd.f32 %v619_v12, %v455_v43  ;;  %v448_v54 = vmul.f32 %v618_v10, %v392_v50  ;;  %v456_v55 = vmul.f32 %v618_v10, %v424_v51 }
 0x142   : > { %488 = vst [vmem:[%s968_s26 + $0x30] sm:$0xff] %v472_v46  ;;  %496 = vst [vmem:[%s968_s26 + $0x70] sm:$0xff] %v480_v47  ;;  %v473_v56 = vadd.f32 %v619_v12, %v450_v48  ;;  %v481_v57 = vadd.f32 %v619_v12, %v458_v49 }
 0x143   : > { %486 = vst [vmem:[%s968_s26 + $0x20] sm:$0xff] %v470_v52  ;;  %494 = vst [vmem:[%s968_s26 + $0x60] sm:$0xff] %v478_v53  ;;  %v471_v58 = vadd.f32 %v619_v12, %v448_v54  ;;  %v479_v59 = vadd.f32 %v619_v12, %v456_v55 }
 0x144   : > { %489 = vst [vmem:[%s968_s26 + $0x38] sm:$0xff] %v473_v56  ;;  %497 = vst [vmem:[%s968_s26 + $0x78] sm:$0xff] %v481_v57 }
 0x145   : > { %487 = vst [vmem:[%s968_s26 + $0x28] sm:$0xff] %v471_v58  ;;  %495 = vst [vmem:[%s968_s26 + $0x68] sm:$0xff] %v479_v59 }
 0x146 PF: > { %s16_s15 = sadd.s32 1, %s805_s15  }
 0x147   : > { %p13_p5 = scmp.ge.s32.totalorder %s16_s15, 11  }
 0x149   :  { %15 = sbr.rel (!%p13_p5) target bundleno = 2 (0x2), region = 79 }
 0x150   :  { %520 = vsyncpa [#allocation3], 1 }
 0x151   :  { %522 = vsyncpa [#allocation3 + $0x1], 1 }
 0x152   :  { %523 = vsyncpa [#allocation5], 1 }

// kernel: snn_forward.6
= control target key start
LH: loop header
LB: loop body
LE: loop exit
PB: predicated region body
PF: predicated region fallthrough
CT: control target
= control target key end

     0   :  { %s2069_s6 = smov 0   ;;  %s2071_s7 = smov 0   ;;  %s2499_s0 = inlined_call_operand.vmem [shape: f32[144,128], index: 0, kind: input, shape index: {}]   ;;  %s2500_s1 = inlined_call_operand.vmem [shape: bf16[10,144,128], index: 1, kind: output, shape index: {}]  }
   0x1   :  { %s2073_s8 = smov 0  }
   0x2 LB: > { %s2080_s9 = sadd.s32 4294967295, %s2056_s8   ;;  %s2082_s10 = sadd.s32 1, %s2056_s8   ;;  %s2056_s8 = sphi %s2073_s8, %s2504_s8   ;;  %s2052_s7 = sphi %s2071_s7, %s2503_s7   ;;  %s2048_s6 = sphi %s2069_s6, %s2502_s6  }
   0x3   : > { %s41_s11 = ssub.s32 %s2056_s8, %s2082_s10  ;;  %s44_s12 = sadd.s32 1, %s2052_s7 }
   0x4   : > { %p42_p0 = scmp.eq.s32.totalorder %s41_s11, 0  ;;  %p54_p1 = scmp.ne.s32.totalorder %s2052_s7, %s2048_s6 }
   0x5   : > { %p55_p2 = scmp.eq.s32.totalorder %s2080_s9, 1  ;;  %p1492_p3 = scmp.ge.s32.totalorder %s2056_s8, 1 }
   0x6   : > { %s2089_s13 = scalar_select %p42_p0, %s2052_s7, %s44_s12  }
   0x7   : > { %p2091_p4 = por %p55_p2, %p54_p1  ;;  %p88_p5 = scmp.lt.s32.totalorder %s2056_s8, 3 }
   0x9   : > { %p89_p6 = pnand %p1492_p3, %p88_p5 }
   0xa   : > { %s107_s15 = smul.u32 (!%p89_p6), 9, %s2080_s9  ;;  %s104_s16 = sand.u32 (!%p89_p6), 1, %s2048_s6   ;;  %v2058_v6 = vmov (!%p89_p6), 0.0  }
   0xb   : > { %92 = sbr.rel (%p89_p6) target bundleno = 138 (0x8a), region = 24 }
   0xc   : > { %p108_p7 = scmp.lt.s32.totalorder (!%p89_p6), %s107_s15, 17  ;;  %s2008_s17 = smul.u32 (!%p89_p6), 360, %s104_s16 }
   0xe   : > { %s2139_s22 = scalar_lea.vmem (!%p89_p6), [#allocation2], %s2008_s17 }
  0x12   : > { %s2506_s15 = smov (!%p108_p7, %s107_s15), 17  ;;  %s1848_s23 = smul.u32 (%p2091_p4), 36, %s2080_s9 }
  0x13   : > { %s1493_s18 = sshll.u32 %s2506_s15, 3 }
  0x14   : > { %s2099_s21 = scalar_lea.vmem %s2499_s0, %s1493_s18  ;;  %s2393_s26 = scalar_lea.vmem (%p2091_p4), %s2500_s1, %s1848_s23 }
  0x15   : > { %v2102_v0 = vld [vmem:[%s2099_s21] sm:$0xff]  ;;  %v2105_v1 = vld [vmem:[%s2099_s21 + $0x8] sm:$0xff]  ;;  %v2108_v2 = vld [vmem:[%s2099_s21 + $0x10] sm:$0xff] }
  0x16   : > { %vm132_vm0 = vcmp.ge.f32.partialorder %v2102_v0, 1.0  ;;  %vm133_vm1 = vcmp.ge.f32.partialorder %v2105_v1, 1.0  ;;  %v2113_v3 = vld [vmem:[%s2099_s21 + $0x18] sm:$0xff]  ;;  %vm134_vm2 = vcmp.ge.f32.partialorder %v2108_v2, 1.0  ;;  %v2117_v4 = vld [vmem:[%s2099_s21 + $0x20] sm:$0xff]  ;;  %v2120_v5 = vld [vmem:[%s2099_s21 + $0x28] sm:$0xff] }
  0x17   : > { %v1494_v7 = vsel %vm132_vm0, 1.0, %v2058_v6  ;;  %v1495_v8 = vsel %vm133_vm1, 1.0, %v2058_v6  ;;  %v205_v9 = vsel %vm132_vm0, 0.0, %v2102_v0  ;;  %v206_v10 = vsel %vm133_vm1, 0.0, %v2105_v1  ;;  %v2130_v14 = vld [vmem:[%s2099_s21 + $0x30] sm:$0xff]  ;;  %v2133_v15 = vld [vmem:[%s2099_s21 + $0x38] sm:$0xff] }
  0x18   : > { %v1850_v11 = vpack.c.bf16 %v1495_v8, %v1494_v7  ;;  %vm135_vm3 = vcmp.ge.f32.partialorder %v2113_v3, 1.0  ;;  %v1496_v12 = vsel %vm134_vm2, 1.0, %v2058_v6  ;;  %v207_v13 = vsel %vm134_vm2, 0.0, %v2108_v2  ;;  %v2146_v22 = vld [vmem:[%s2099_s21 + $0x40] sm:$0xff] }
  0x19   : > { %v1497_v16 = vsel %vm135_vm3, 1.0, %v2058_v6  ;;  %v208_v17 = vsel %vm135_vm3, 0.0, %v2113_v3  ;;  %vm136_vm4 = vcmp.ge.f32.partialorder %v2117_v4, 1.0  ;;  %vm137_vm5 = vcmp.ge.f32.partialorder %v2120_v5, 1.0 }
  0x1a   : > { %1851 = vst [vmem:[%s2139_s22] sm:$0xff] %v1850_v11   ;;  %v1853_v18 = vpack.c.bf16 %v1497_v16, %v1496_v12  ;;  %v1498_v19 = vsel %vm136_vm4, 1.0, %v2058_v6  ;;  %v1499_v20 = vsel %vm137_vm5, 1.0, %v2058_v6  ;;  %v209_v21 = vsel %vm136_vm4, 0.0, %v2117_v4 }
  0x1b   : > { %v1856_v23 = vpack.c.bf16 %v1499_v20, %v1498_v19  ;;  %v210_v24 = vsel %vm137_vm5, 0.0, %v2120_v5  ;;  %vm138_vm6 = vcmp.ge.f32.partialorder %v2130_v14, 1.0  ;;  %vm139_vm7 = vcmp.ge.f32.partialorder %v2133_v15, 1.0 }
  0x1c   : > { %1969 = vst [vmem:[%s2139_s22 + $0x8] sm:$0xff] %v1853_v18   ;;  %v1500_v25 = vsel %vm138_vm6, 1.0, %v2058_v6  ;;  %v1501_v26 = vsel %vm139_vm7, 1.0, %v2058_v6  ;;  %v211_v27 = vsel %vm138_vm6, 0.0, %v2130_v14  ;;  %v212_v28 = vsel %vm139_vm7, 0.0, %v2133_v15 }
  0x1d   : > { %1970 = vst [vmem:[%s2139_s22 + $0x10] sm:$0xff] %v1856_v23   ;;  %v1859_v29 = vpack.c.bf16 %v1501_v26, %v1500_v25  ;;  %vm140_vm8 = vcmp.ge.f32.partialorder %v2146_v22, 1.0  ;;  %v214_v30 = vadd.f32 %v205_v9, %v2102_v0  ;;  %v215_v31 = vadd.f32 %v206_v10, %v2105_v1 }
  0x1e   : > { %v1502_v32 = vsel %vm140_vm8, 1.0, %v2058_v6  ;;  %v213_v33 = vsel %vm140_vm8, 0.0, %v2146_v22  ;;  %v216_v34 = vadd.f32 %v207_v13, %v2108_v2  ;;  %v217_v35 = vadd.f32 %v208_v17, %v2113_v3 }
  0x1f   : > { %1971 = vst [vmem:[%s2139_s22 + $0x18] sm:$0xff] %v1859_v29   ;;  %v1766_v36 = vpack.c.bf16 %v1502_v32, %v1502_v32  ;;  %v222_v37 = vadd.f32 %v213_v33, %v2146_v22  ;;  %vm223_vm9 = vcmp.ge.f32.partialorder %v214_v30, 1.0  ;;  %vm224_vm10 = vcmp.ge.f32.partialorder %v215_v31, 1.0 }
  0x20   : > { %v1512_v38 = vsel %vm223_vm9, 1.0, %v2058_v6  ;;  %v297_v39 = vsel %vm223_vm9, 0.0, %v214_v30  ;;  %vm225_vm11 = vcmp.ge.f32.partialorder %v216_v34, 1.0  ;;  %v1513_v40 = vsel %vm224_vm10, 1.0, %v2058_v6 }
  0x21   : > { %204 = vst [vmem:[%s2139_s22 + $0x20] sm:$0xf] %v1766_v36  ;;  %v1767_v41 = vpack.c.bf16 %v1512_v38, %v1512_v38  ;;  %v306_v42 = vadd.f32 %v297_v39, %v2102_v0  ;;  %v1514_v43 = vsel %vm225_vm11, 1.0, %v2058_v6  ;;  %v298_v44 = vsel %vm224_vm10, 0.0, %v215_v31 }
  0x22   : > { %v1862_v45 = vpack.c.bf16 %v1514_v43, %v1513_v40  ;;  %v299_v46 = vsel %vm225_vm11, 0.0, %v216_v34  ;;  %v218_v47 = vadd.f32 %v209_v21, %v2117_v4  ;;  %vm226_vm12 = vcmp.ge.f32.partialorder %v217_v35, 1.0 }
  0x23   : > { %1530 = vst [vmem:[%s2139_s22 + $0x24] sm:$0xf] %v1767_v41  ;;  %v1515_v48 = vsel %vm226_vm12, 1.0, %v2058_v6  ;;  %v300_v49 = vsel %vm226_vm12, 0.0, %v217_v35  ;;  %v219_v50 = vadd.f32 %v210_v24, %v2120_v5  ;;  %v220_v51 = vadd.f32 %v211_v27, %v2130_v14 }
  0x24   : > { %1972 = vst [vmem:[%s2139_s22 + $0x28] sm:$0xff] %v1862_v45   ;;  %vm227_vm13 = vcmp.ge.f32.partialorder %v218_v47, 1.0  ;;  %v221_v52 = vadd.f32 %v212_v28, %v2133_v15  ;;  %vm231_vm14 = vcmp.ge.f32.partialorder %v222_v37, 1.0  ;;  %v307_v53 = vadd.f32 %v298_v44, %v2105_v1 }
  0x25   : > { %v1516_v54 = vsel %vm227_vm13, 1.0, %v2058_v6  ;;  %v301_v55 = vsel %vm227_vm13, 0.0, %v218_v47  ;;  %vm228_vm15 = vcmp.ge.f32.partialorder %v219_v50, 1.0  ;;  %vm229_vm0 = vcmp.ge.f32.partialorder %v220_v51, 1.0 }
  0x26   : > { %v1865_v56 = vpack.c.bf16 %v1516_v54, %v1515_v48  ;;  %v1517_v57 = vsel %vm228_vm15, 1.0, %v2058_v6  ;;  %v1518_v58 = vsel %vm229_vm0, 1.0, %v2058_v6  ;;  %v302_v59 = vsel %vm228_vm15, 0.0, %v219_v50 }
  0x27   : > { %v1868_v60 = vpack.c.bf16 %v1518_v58, %v1517_v57  ;;  %v303_v61 = vsel %vm229_vm0, 0.0, %v220_v51  ;;  %vm230_vm1 = vcmp.ge.f32.partialorder %v221_v52, 1.0  ;;  %v1520_v62 = vsel %vm231_vm14, 1.0, %v2058_v6 }
  0x28   : > { %1973 = vst [vmem:[%s2139_s22 + $0x30] sm:$0xff] %v1865_v56   ;;  %v1519_v63 = vsel %vm230_vm1, 1.0, %v2058_v6  ;;  %v304_v7 = vsel %vm230_vm1, 0.0, %v221_v52  ;;  %v305_v8 = vsel %vm231_vm14, 0.0, %v222_v37  ;;  %vm315_vm2 = vcmp.ge.f32.partialorder %v306_v42, 1.0 }
  0x29   : > { %1974 = vst [vmem:[%s2139_s22 + $0x38] sm:$0xff] %v1868_v60   ;;  %v1871_v9 = vpack.c.bf16 %v1520_v62, %v1519_v63  ;;  %vm316_vm3 = vcmp.ge.f32.partialorder %v307_v53, 1.0  ;;  %v1539_v10 = vsel %vm315_vm2, 1.0, %v2058_v6  ;;  %v389_v11 = vsel %vm315_vm2, 0.0, %v306_v42 }
  0x2a   : > { %v1540_v12 = vsel %vm316_vm3, 1.0, %v2058_v6  ;;  %v390_v13 = vsel %vm316_vm3, 0.0, %v307_v53  ;;  %v308_v16 = vadd.f32 %v299_v46, %v2108_v2  ;;  %v309_v17 = vadd.f32 %v300_v49, %v2113_v3 }
  0x2b   : > { %1975 = vst [vmem:[%s2139_s22 + $0x40] sm:$0xff] %v1871_v9   ;;  %v1874_v18 = vpack.c.bf16 %v1540_v12, %v1539_v10  ;;  %v310_v19 = vadd.f32 %v301_v55, %v2117_v4  ;;  %v311_v20 = vadd.f32 %v302_v59, %v2120_v5  ;;  %v312_v21 = vadd.f32 %v303_v61, %v2130_v14 }
  0x2c   : > { %vm317_vm4 = vcmp.ge.f32.partialorder %v308_v16, 1.0  ;;  %vm318_vm5 = vcmp.ge.f32.partialorder %v309_v17, 1.0  ;;  %v313_v23 = vadd.f32 %v304_v7, %v2133_v15  ;;  %v314_v24 = vadd.f32 %v305_v8, %v2146_v22 }
  0x2d   : > { %1976 = vst [vmem:[%s2139_s22 + $0x48] sm:$0xff] %v1874_v18   ;;  %v1541_v25 = vsel %vm317_vm4, 1.0, %v2058_v6  ;;  %v1542_v26 = vsel %vm318_vm5, 1.0, %v2058_v6  ;;  %v391_v27 = vsel %vm317_vm4, 0.0, %v308_v16  ;;  %v392_v28 = vsel %vm318_vm5, 0.0, %v309_v17 }
  0x2e   : > { %v1877_v29 = vpack.c.bf16 %v1542_v26, %v1541_v25  ;;  %vm319_vm6 = vcmp.ge.f32.partialorder %v310_v19, 1.0  ;;  %vm320_vm7 = vcmp.ge.f32.partialorder %v311_v20, 1.0  ;;  %vm321_vm8 = vcmp.ge.f32.partialorder %v312_v21, 1.0 }
  0x2f   : > { %v1543_v30 = vsel %vm319_vm6, 1.0, %v2058_v6  ;;  %v1544_v31 = vsel %vm320_vm7, 1.0, %v2058_v6  ;;  %v393_v32 = vsel %vm319_vm6, 0.0, %v310_v19  ;;  %v394_v33 = vsel %vm320_vm7, 0.0, %v311_v20 }
  0x30   : > { %1977 = vst [vmem:[%s2139_s22 + $0x50] sm:$0xff] %v1877_v29   ;;  %v1880_v34 = vpack.c.bf16 %v1544_v31, %v1543_v30  ;;  %vm322_vm9 = vcmp.ge.f32.partialorder %v313_v23, 1.0  ;;  %v1545_v35 = vsel %vm321_vm8, 1.0, %v2058_v6  ;;  %v395_v36 = vsel %vm321_vm8, 0.0, %v312_v21 }
  0x31   : > { %v1546_v37 = vsel %vm322_vm9, 1.0, %v2058_v6  ;;  %v396_v38 = vsel %vm322_vm9, 0.0, %v313_v23  ;;  %vm323_vm10 = vcmp.ge.f32.partialorder %v314_v24, 1.0  ;;  %v398_v39 = vadd.f32 %v389_v11, %v2102_v0 }
  0x32   : > { %1978 = vst [vmem:[%s2139_s22 + $0x58] sm:$0xff] %v1880_v34   ;;  %v1883_v40 = vpack.c.bf16 %v1546_v37, %v1545_v35  ;;  %v1547_v41 = vsel %vm323_vm10, 1.0, %v2058_v6  ;;  %v397_v42 = vsel %vm323_vm10, 0.0, %v314_v24  ;;  %v399_v43 = vadd.f32 %v390_v13, %v2105_v1 }
  0x33   : > { %v1784_v44 = vpack.c.bf16 %v1547_v41, %v1547_v41  ;;  %v406_v45 = vadd.f32 %v397_v42, %v2146_v22  ;;  %vm407_vm11 = vcmp.ge.f32.partialorder %v398_v39, 1.0  ;;  %v400_v46 = vadd.f32 %v391_v27, %v2108_v2 }
  0x34   : > { %1979 = vst [vmem:[%s2139_s22 + $0x60] sm:$0xff] %v1883_v40   ;;  %v1566_v47 = vsel %vm407_vm11, 1.0, %v2058_v6  ;;  %v481_v48 = vsel %vm407_vm11, 0.0, %v398_v39  ;;  %vm408_vm12 = vcmp.ge.f32.partialorder %v399_v43, 1.0  ;;  %v401_v49 = vadd.f32 %v392_v28, %v2113_v3 }
  0x35   : > { %1565 = vst [vmem:[%s2139_s22 + $0x68] sm:$0xf] %v1784_v44  ;;  %v1785_v50 = vpack.c.bf16 %v1566_v47, %v1566_v47  ;;  %v490_v51 = vadd.f32 %v481_v48, %v2102_v0  ;;  %vm409_vm13 = vcmp.ge.f32.partialorder %v400_v46, 1.0  ;;  %v1567_v52 = vsel %vm408_vm12, 1.0, %v2058_v6 }
  0x36   : > { %v1568_v53 = vsel %vm409_vm13, 1.0, %v2058_v6  ;;  %v482_v54 = vsel %vm408_vm12, 0.0, %v399_v43  ;;  %v483_v55 = vsel %vm409_vm13, 0.0, %v400_v46  ;;  %v402_v56 = vadd.f32 %v393_v32, %v2117_v4 }
  0x37   : > { %1584 = vst [vmem:[%s2139_s22 + $0x6c] sm:$0xf] %v1785_v50  ;;  %v1886_v57 = vpack.c.bf16 %v1568_v53, %v1567_v52  ;;  %vm410_vm14 = vcmp.ge.f32.partialorder %v401_v49, 1.0  ;;  %v403_v58 = vadd.f32 %v394_v33, %v2120_v5  ;;  %v404_v59 = vadd.f32 %v395_v36, %v2130_v14 }
  0x38   : > { %vm411_vm15 = vcmp.ge.f32.partialorder %v402_v56, 1.0  ;;  %v1569_v60 = vsel %vm410_vm14, 1.0, %v2058_v6  ;;  %v484_v61 = vsel %vm410_vm14, 0.0, %v401_v49  ;;  %v405_v62 = vadd.f32 %v396_v38, %v2133_v15 }
  0x39   : > { %1980 = vst [vmem:[%s2139_s22 + $0x70] sm:$0xff] %v1886_v57   ;;  %v1570_v63 = vsel %vm411_vm15, 1.0, %v2058_v6  ;;  %v485_v7 = vsel %vm411_vm15, 0.0, %v402_v56  ;;  %vm412_vm0 = vcmp.ge.f32.partialorder %v403_v58, 1.0  ;;  %vm413_vm1 = vcmp.ge.f32.partialorder %v404_v59, 1.0 }
  0x3a   : > { %v1889_v8 = vpack.c.bf16 %v1570_v63, %v1569_v60  ;;  %v1571_v9 = vsel %vm412_vm0, 1.0, %v2058_v6  ;;  %v1572_v10 = vsel %vm413_vm1, 1.0, %v2058_v6  ;;  %v486_v11 = vsel %vm412_vm0, 0.0, %v403_v58 }
  0x3b   : > { %v1892_v12 = vpack.c.bf16 %v1572_v10, %v1571_v9  ;;  %v487_v13 = vsel %vm413_vm1, 0.0, %v404_v59  ;;  %vm414_vm2 = vcmp.ge.f32.partialorder %v405_v62, 1.0  ;;  %vm415_vm3 = vcmp.ge.f32.partialorder %v406_v45, 1.0 }
  0x3c   : > { %1981 = vst [vmem:[%s2139_s22 + $0x78] sm:$0xff] %v1889_v8   ;;  %v1573_v16 = vsel %vm414_vm2, 1.0, %v2058_v6  ;;  %v1574_v17 = vsel %vm415_vm3, 1.0, %v2058_v6  ;;  %v488_v18 = vsel %vm414_vm2, 0.0, %v405_v62  ;;  %v489_v19 = vsel %vm415_vm3, 0.0, %v406_v45 }
  0x3d   : > { %1982 = vst [vmem:[%s2139_s22 + $0x80] sm:$0xff] %v1892_v12   ;;  %v1895_v20 = vpack.c.bf16 %v1574_v17, %v1573_v16  ;;  %v491_v21 = vadd.f32 %v482_v54, %v2105_v1  ;;  %vm499_vm4 = vcmp.ge.f32.partialorder %v490_v51, 1.0  ;;  %v492_v23 = vadd.f32 %v483_v55, %v2108_v2 }
  0x3e   : > { %v1593_v24 = vsel %vm499_vm4, 1.0, %v2058_v6  ;;  %v573_v25 = vsel %vm499_vm4, 0.0, %v490_v51  ;;  %v493_v26 = vadd.f32 %v484_v61, %v2113_v3  ;;  %v494_v27 = vadd.f32 %v485_v7, %v2117_v4 }
  0x3f   : > { %1983 = vst [vmem:[%s2139_s22 + $0x88] sm:$0xff] %v1895_v20   ;;  %vm500_vm5 = vcmp.ge.f32.partialorder %v491_v21, 1.0  ;;  %vm501_vm6 = vcmp.ge.f32.partialorder %v492_v23, 1.0  ;;  %v495_v28 = vadd.f32 %v486_v11, %v2120_v5  ;;  %v496_v29 = vadd.f32 %v487_v13, %v2130_v14 }
  0x40   : > { %v1594_v30 = vsel %vm500_vm5, 1.0, %v2058_v6  ;;  %v574_v31 = vsel %vm500_vm5, 0.0, %v491_v21  ;;  %vm502_vm7 = vcmp.ge.f32.partialorder %v493_v26, 1.0  ;;  %v1595_v32 = vsel %vm501_vm6, 1.0, %v2058_v6 }
  0x41   : > { %v1898_v33 = vpack.c.bf16 %v1594_v30, %v1593_v24  ;;  %v1596_v34 = vsel %vm502_vm7, 1.0, %v2058_v6  ;;  %v575_v35 = vsel %vm501_vm6, 0.0, %v492_v23  ;;  %v576_v36 = vsel %vm502_vm7, 0.0, %v493_v26 }
  0x42   : > { %v1901_v37 = vpack.c.bf16 %v1596_v34, %v1595_v32  ;;  %vm503_vm8 = vcmp.ge.f32.partialorder %v494_v27, 1.0  ;;  %vm504_vm9 = vcmp.ge.f32.partialorder %v495_v28, 1.0  ;;  %v497_v38 = vadd.f32 %v488_v18, %v2133_v15 }
  0x43   : > { %1984 = vst [vmem:[%s2139_s22 + $0x90] sm:$0xff] %v1898_v33   ;;  %v1597_v39 = vsel %vm503_vm8, 1.0, %v2058_v6  ;;  %v1598_v40 = vsel %vm504_vm9, 1.0, %v2058_v6  ;;  %v577_v41 = vsel %vm503_vm8, 0.0, %v494_v27  ;;  %v578_v42 = vsel %vm504_vm9, 0.0, %v495_v28 }
  0x44   : > { %1985 = vst [vmem:[%s2139_s22 + $0x98] sm:$0xff] %v1901_v37   ;;  %v1904_v43 = vpack.c.bf16 %v1598_v40, %v1597_v39  ;;  %vm505_vm10 = vcmp.ge.f32.partialorder %v496_v29, 1.0  ;;  %vm506_vm11 = vcmp.ge.f32.partialorder %v497_v38, 1.0  ;;  %v498_v44 = vadd.f32 %v489_v19, %v2146_v22 }
  0x45   : > { %v1599_v45 = vsel %vm505_vm10, 1.0, %v2058_v6  ;;  %v1600_v46 = vsel %vm506_vm11, 1.0, %v2058_v6  ;;  %v579_v47 = vsel %vm505_vm10, 0.0, %v496_v29  ;;  %v580_v48 = vsel %vm506_vm11, 0.0, %v497_v38 }
  0x46   : > { %1986 = vst [vmem:[%s2139_s22 + $0xa0] sm:$0xff] %v1904_v43   ;;  %v1907_v49 = vpack.c.bf16 %v1600_v46, %v1599_v45  ;;  %vm507_vm12 = vcmp.ge.f32.partialorder %v498_v44, 1.0  ;;  %v582_v50 = vadd.f32 %v573_v25, %v2102_v0  ;;  %v583_v51 = vadd.f32 %v574_v31, %v2105_v1 }
  0x47   : > { %v1601_v52 = vsel %vm507_vm12, 1.0, %v2058_v6  ;;  %v581_v53 = vsel %vm507_vm12, 0.0, %v498_v44  ;;  %v584_v54 = vadd.f32 %v575_v35, %v2108_v2  ;;  %v585_v55 = vadd.f32 %v576_v36, %v2113_v3 }
  0x48   : > { %1987 = vst [vmem:[%s2139_s22 + $0xa8] sm:$0xff] %v1907_v49   ;;  %v1802_v56 = vpack.c.bf16 %v1601_v52, %v1601_v52  ;;  %v590_v57 = vadd.f32 %v581_v53, %v2146_v22  ;;  %vm591_vm13 = vcmp.ge.f32.partialorder %v582_v50, 1.0  ;;  %vm592_vm14 = vcmp.ge.f32.partialorder %v583_v51, 1.0 }
  0x49   : > { %v1620_v58 = vsel %vm591_vm13, 1.0, %v2058_v6  ;;  %v665_v59 = vsel %vm591_vm13, 0.0, %v582_v50  ;;  %vm593_vm15 = vcmp.ge.f32.partialorder %v584_v54, 1.0  ;;  %v1621_v60 = vsel %vm592_vm14, 1.0, %v2058_v6 }
  0x4a   : > { %1619 = vst [vmem:[%s2139_s22 + $0xb0] sm:$0xf] %v1802_v56  ;;  %v1803_v61 = vpack.c.bf16 %v1620_v58, %v1620_v58  ;;  %v674_v62 = vadd.f32 %v665_v59, %v2102_v0  ;;  %v1622_v63 = vsel %vm593_vm15, 1.0, %v2058_v6  ;;  %v666_v7 = vsel %vm592_vm14, 0.0, %v583_v51 }
  0x4b   : > { %v1910_v8 = vpack.c.bf16 %v1622_v63, %v1621_v60  ;;  %v667_v9 = vsel %vm593_vm15, 0.0, %v584_v54  ;;  %v586_v10 = vadd.f32 %v577_v41, %v2117_v4  ;;  %vm594_vm0 = vcmp.ge.f32.partialorder %v585_v55, 1.0 }
  0x4c   : > { %1638 = vst [vmem:[%s2139_s22 + $0xb4] sm:$0xf] %v1803_v61  ;;  %v1623_v11 = vsel %vm594_vm0, 1.0, %v2058_v6  ;;  %v668_v12 = vsel %vm594_vm0, 0.0, %v585_v55  ;;  %v587_v13 = vadd.f32 %v578_v42, %v2120_v5  ;;  %v588_v16 = vadd.f32 %v579_v47, %v2130_v14 }
  0x4d   : > { %1988 = vst [vmem:[%s2139_s22 + $0xb8] sm:$0xff] %v1910_v8   ;;  %vm595_vm1 = vcmp.ge.f32.partialorder %v586_v10, 1.0  ;;  %v589_v17 = vadd.f32 %v580_v48, %v2133_v15  ;;  %vm599_vm2 = vcmp.ge.f32.partialorder %v590_v57, 1.0  ;;  %v675_v18 = vadd.f32 %v666_v7, %v2105_v1 }
  0x4e   : > { %v1624_v19 = vsel %vm595_vm1, 1.0, %v2058_v6  ;;  %v669_v20 = vsel %vm595_vm1, 0.0, %v586_v10  ;;  %vm596_vm3 = vcmp.ge.f32.partialorder %v587_v13, 1.0  ;;  %vm597_vm4 = vcmp.ge.f32.partialorder %v588_v16, 1.0 }
  0x4f   : > { %v1913_v21 = vpack.c.bf16 %v1624_v19, %v1623_v11  ;;  %v1625_v23 = vsel %vm596_vm3, 1.0, %v2058_v6  ;;  %v1626_v24 = vsel %vm597_vm4, 1.0, %v2058_v6  ;;  %v670_v25 = vsel %vm596_vm3, 0.0, %v587_v13 }
  0x50   : > { %v1916_v26 = vpack.c.bf16 %v1626_v24, %v1625_v23  ;;  %v671_v27 = vsel %vm597_vm4, 0.0, %v588_v16  ;;  %vm598_vm5 = vcmp.ge.f32.partialorder %v589_v17, 1.0  ;;  %v1628_v28 = vsel %vm599_vm2, 1.0, %v2058_v6 }
  0x51   : > { %1989 = vst [vmem:[%s2139_s22 + $0xc0] sm:$0xff] %v1913_v21   ;;  %v1627_v29 = vsel %vm598_vm5, 1.0, %v2058_v6  ;;  %v672_v30 = vsel %vm598_vm5, 0.0, %v589_v17  ;;  %v673_v31 = vsel %vm599_vm2, 0.0, %v590_v57  ;;  %vm683_vm6 = vcmp.ge.f32.partialorder %v674_v62, 1.0 }
  0x52   : > { %1990 = vst [vmem:[%s2139_s22 + $0xc8] sm:$0xff] %v1916_v26   ;;  %v1919_v32 = vpack.c.bf16 %v1628_v28, %v1627_v29  ;;  %vm684_vm7 = vcmp.ge.f32.partialorder %v675_v18, 1.0  ;;  %v1647_v33 = vsel %vm683_vm6, 1.0, %v2058_v6  ;;  %v757_v34 = vsel %vm683_vm6, 0.0, %v674_v62 }
  0x53   : > { %v1648_v35 = vsel %vm684_vm7, 1.0, %v2058_v6  ;;  %v758_v36 = vsel %vm684_vm7, 0.0, %v675_v18  ;;  %v676_v37 = vadd.f32 %v667_v9, %v2108_v2  ;;  %v677_v38 = vadd.f32 %v668_v12, %v2113_v3 }
  0x54   : > { %1991 = vst [vmem:[%s2139_s22 + $0xd0] sm:$0xff] %v1919_v32   ;;  %v1922_v39 = vpack.c.bf16 %v1648_v35, %v1647_v33  ;;  %v678_v40 = vadd.f32 %v669_v20, %v2117_v4  ;;  %v679_v41 = vadd.f32 %v670_v25, %v2120_v5  ;;  %v680_v42 = vadd.f32 %v671_v27, %v2130_v14 }
  0x55   : > { %vm685_vm8 = vcmp.ge.f32.partialorder %v676_v37, 1.0  ;;  %vm686_vm9 = vcmp.ge.f32.partialorder %v677_v38, 1.0  ;;  %v681_v43 = vadd.f32 %v672_v30, %v2133_v15  ;;  %v682_v44 = vadd.f32 %v673_v31, %v2146_v22 }
  0x56   : > { %1992 = vst [vmem:[%s2139_s22 + $0xd8] sm:$0xff] %v1922_v39   ;;  %v1649_v45 = vsel %vm685_vm8, 1.0, %v2058_v6  ;;  %v1650_v46 = vsel %vm686_vm9, 1.0, %v2058_v6  ;;  %v759_v47 = vsel %vm685_vm8, 0.0, %v676_v37  ;;  %v760_v48 = vsel %vm686_vm9, 0.0, %v677_v38 }
  0x57   : > { %v1925_v49 = vpack.c.bf16 %v1650_v46, %v1649_v45  ;;  %vm687_vm10 = vcmp.ge.f32.partialorder %v678_v40, 1.0  ;;  %vm688_vm11 = vcmp.ge.f32.partialorder %v679_v41, 1.0  ;;  %vm689_vm12 = vcmp.ge.f32.partialorder %v680_v42, 1.0 }
  0x58   : > { %v1651_v50 = vsel %vm687_vm10, 1.0, %v2058_v6  ;;  %v1652_v51 = vsel %vm688_vm11, 1.0, %v2058_v6  ;;  %v761_v52 = vsel %vm687_vm10, 0.0, %v678_v40  ;;  %v762_v53 = vsel %vm688_vm11, 0.0, %v679_v41 }
  0x59   : > { %1993 = vst [vmem:[%s2139_s22 + $0xe0] sm:$0xff] %v1925_v49   ;;  %v1928_v54 = vpack.c.bf16 %v1652_v51, %v1651_v50  ;;  %vm690_vm13 = vcmp.ge.f32.partialorder %v681_v43, 1.0  ;;  %v1653_v55 = vsel %vm689_vm12, 1.0, %v2058_v6  ;;  %v763_v56 = vsel %vm689_vm12, 0.0, %v680_v42 }
  0x5a   : > { %v1654_v57 = vsel %vm690_vm13, 1.0, %v2058_v6  ;;  %v764_v58 = vsel %vm690_vm13, 0.0, %v681_v43  ;;  %vm691_vm14 = vcmp.ge.f32.partialorder %v682_v44, 1.0  ;;  %v766_v59 = vadd.f32 %v757_v34, %v2102_v0 }
  0x5b   : > { %1994 = vst [vmem:[%s2139_s22 + $0xe8] sm:$0xff] %v1928_v54   ;;  %v1931_v60 = vpack.c.bf16 %v1654_v57, %v1653_v55  ;;  %v1655_v61 = vsel %vm691_vm14, 1.0, %v2058_v6  ;;  %v765_v62 = vsel %vm691_vm14, 0.0, %v682_v44  ;;  %v767_v63 = vadd.f32 %v758_v36, %v2105_v1 }
  0x5c   : > { %v1820_v7 = vpack.c.bf16 %v1655_v61, %v1655_v61  ;;  %v774_v8 = vadd.f32 %v765_v62, %v2146_v22  ;;  %vm775_vm15 = vcmp.ge.f32.partialorder %v766_v59, 1.0  ;;  %v768_v9 = vadd.f32 %v759_v47, %v2108_v2 }
  0x5d   : > { %1995 = vst [vmem:[%s2139_s22 + $0xf0] sm:$0xff] %v1931_v60   ;;  %v1674_v10 = vsel %vm775_vm15, 1.0, %v2058_v6  ;;  %v849_v11 = vsel %vm775_vm15, 0.0, %v766_v59  ;;  %vm776_vm0 = vcmp.ge.f32.partialorder %v767_v63, 1.0  ;;  %v769_v12 = vadd.f32 %v760_v48, %v2113_v3 }
  0x5e   : > { %1673 = vst [vmem:[%s2139_s22 + $0xf8] sm:$0xf] %v1820_v7  ;;  %v1821_v13 = vpack.c.bf16 %v1674_v10, %v1674_v10  ;;  %v2311_v16 = vadd.f32 %v849_v11, %v2102_v0  ;;  %vm777_vm1 = vcmp.ge.f32.partialorder %v768_v9, 1.0  ;;  %v1675_v17 = vsel %vm776_vm0, 1.0, %v2058_v6 }
  0x5f   : > { %v1676_v18 = vsel %vm777_vm1, 1.0, %v2058_v6  ;;  %v850_v19 = vsel %vm776_vm0, 0.0, %v767_v63  ;;  %v851_v20 = vsel %vm777_vm1, 0.0, %v768_v9  ;;  %v770_v21 = vadd.f32 %v761_v52, %v2117_v4 }
  0x60   : > { %1692 = vst [vmem:[%s2139_s22 + $0xfc] sm:$0xf] %v1821_v13  ;;  %v1934_v23 = vpack.c.bf16 %v1676_v18, %v1675_v17  ;;  %vm778_vm2 = vcmp.ge.f32.partialorder %v769_v12, 1.0  ;;  %v771_v24 = vadd.f32 %v762_v53, %v2120_v5  ;;  %v772_v25 = vadd.f32 %v763_v56, %v2130_v14 }
  0x61   : > { %vm779_vm3 = vcmp.ge.f32.partialorder %v770_v21, 1.0  ;;  %v1677_v26 = vsel %vm778_vm2, 1.0, %v2058_v6  ;;  %v852_v27 = vsel %vm778_vm2, 0.0, %v769_v12  ;;  %v773_v28 = vadd.f32 %v764_v58, %v2133_v15 }
  0x62   : > { %1996 = vst [vmem:[%s2139_s22 + $0x100] sm:$0xff] %v1934_v23   ;;  %v1678_v29 = vsel %vm779_vm3, 1.0, %v2058_v6  ;;  %v853_v30 = vsel %vm779_vm3, 0.0, %v770_v21  ;;  %vm780_vm4 = vcmp.ge.f32.partialorder %v771_v24, 1.0  ;;  %vm781_vm5 = vcmp.ge.f32.partialorder %v772_v25, 1.0 }
  0x63   : > { %v1937_v31 = vpack.c.bf16 %v1678_v29, %v1677_v26  ;;  %v1679_v32 = vsel %vm780_vm4, 1.0, %v2058_v6  ;;  %v1680_v33 = vsel %vm781_vm5, 1.0, %v2058_v6  ;;  %v854_v34 = vsel %vm780_vm4, 0.0, %v771_v24 }
  0x64   : > { %v1940_v35 = vpack.c.bf16 %v1680_v33, %v1679_v32  ;;  %v855_v36 = vsel %vm781_vm5, 0.0, %v772_v25  ;;  %vm782_vm6 = vcmp.ge.f32.partialorder %v773_v28, 1.0  ;;  %vm783_vm7 = vcmp.ge.f32.partialorder %v774_v8, 1.0 }
  0x65   : > { %1997 = vst [vmem:[%s2139_s22 + $0x108] sm:$0xff] %v1937_v31   ;;  %v1681_v37 = vsel %vm782_vm6, 1.0, %v2058_v6  ;;  %v1682_v38 = vsel %vm783_vm7, 1.0, %v2058_v6  ;;  %v856_v39 = vsel %vm782_vm6, 0.0, %v773_v28  ;;  %v857_v40 = vsel %vm783_vm7, 0.0, %v774_v8 }
  0x66   : > { %1998 = vst [vmem:[%s2139_s22 + $0x110] sm:$0xff] %v1940_v35   ;;  %v1943_v41 = vpack.c.bf16 %v1682_v38, %v1681_v37  ;;  %v859_v42 = vadd.f32 %v850_v19, %v2105_v1  ;;  %vm867_vm8 = vcmp.ge.f32.partialorder %v2311_v16, 1.0  ;;  %v860_v43 = vadd.f32 %v851_v20, %v2108_v2  ;;  %v1070_v35 = vld [vmem:[%s2139_s22 + $0x18] sm:$0xff] (%p2091_p4)   ;;  %v1076_v37 = vld [vmem:[%s2139_s22 + $0x24] sm:$0xff] (%p2091_p4)   ;;  %v1080_v38 = vld [vmem:[%s2139_s22 + $0x2c] sm:$0xff] (%p2091_p4)  }
  0x67   : > { %v1701_v44 = vsel %vm867_vm8, 1.0, %v2058_v6  ;;  %v861_v45 = vadd.f32 %v852_v27, %v2113_v3  ;;  %v862_v46 = vadd.f32 %v853_v30, %v2117_v4  ;;  %v863_v47 = vadd.f32 %v854_v34, %v2120_v5  ;;  %1071 = vst [vmem:[%s2393_s26 + $0x18] sm:$0xff] (%p2091_p4), %v1070_v35   ;;  %1077 = vst [vmem:[%s2393_s26 + $0x48] sm:$0xff] (%p2091_p4), %v1076_v37  }
  0x68   : > { %1999 = vst [vmem:[%s2139_s22 + $0x118] sm:$0xff] %v1943_v41   ;;  %vm868_vm9 = vcmp.ge.f32.partialorder %v859_v42, 1.0  ;;  %vm869_vm10 = vcmp.ge.f32.partialorder %v860_v43, 1.0  ;;  %v864_v48 = vadd.f32 %v855_v36, %v2130_v14  ;;  %v865_v49 = vadd.f32 %v856_v39, %v2133_v15  ;;  %v1074_v36 = vld [vmem:[%s2139_s22 + $0x20] sm:$0xf] (%p2091_p4)  ;;  %v1084_v39 = vld [vmem:[%s2139_s22 + $0x34] sm:$0xff] (%p2091_p4)  }
  0x69   : > { %v1702_v50 = vsel %vm868_vm9, 1.0, %v2058_v6  ;;  %v942_v51 = vsel %vm868_vm9, 0.0, %v859_v42  ;;  %vm870_vm11 = vcmp.ge.f32.partialorder %v861_v45, 1.0  ;;  %v1703_v52 = vsel %vm869_vm10, 1.0, %v2058_v6  ;;  %1075 = vst [vmem:[%s2393_s26 + $0x20] sm:$0xf] (%p2091_p4), %v1074_v36 }
  0x6a   : > { %v1946_v53 = vpack.c.bf16 %v1702_v50, %v1701_v44  ;;  %v1704_v54 = vsel %vm870_vm11, 1.0, %v2058_v6  ;;  %v943_v55 = vsel %vm869_vm10, 0.0, %v860_v43  ;;  %v944_v56 = vsel %vm870_vm11, 0.0, %v861_v45  ;;  %1081 = vst [vmem:[%s2393_s26 + $0x50] sm:$0xff] (%p2091_p4), %v1080_v38   ;;  %1085 = vst [vmem:[%s2393_s26 + $0x58] sm:$0xff] (%p2091_p4), %v1084_v39   ;;  %v1094_v42 = vld [vmem:[%s2139_s22 + $0x48] sm:$0xff] (%p2091_p4)  }
  0x6b   : > { %v1949_v57 = vpack.c.bf16 %v1704_v54, %v1703_v52  ;;  %vm871_vm12 = vcmp.ge.f32.partialorder %v862_v46, 1.0  ;;  %vm872_vm13 = vcmp.ge.f32.partialorder %v863_v47, 1.0  ;;  %vm873_vm14 = vcmp.ge.f32.partialorder %v864_v48, 1.0  ;;  %v1092_v41 = vld [vmem:[%s2139_s22 + $0x44] sm:$0xf] (%p2091_p4)  ;;  %v1098_v43 = vld [vmem:[%s2139_s22 + $0x50] sm:$0xff] (%p2091_p4)  }
  0x6c   : > { %2000 = vst [vmem:[%s2139_s22 + $0x120] sm:$0xff] %v1946_v53   ;;  %v1705_v58 = vsel %vm871_vm12, 1.0, %v2058_v6  ;;  %v1706_v59 = vsel %vm872_vm13, 1.0, %v2058_v6  ;;  %v945_v60 = vsel %vm871_vm12, 0.0, %v862_v46  ;;  %v946_v61 = vsel %vm872_vm13, 0.0, %v863_v47  ;;  %1095 = vst [vmem:[%s2393_s26 + $0x90] sm:$0xff] (%p2091_p4), %v1094_v42  }
  0x6d   : > { %2001 = vst [vmem:[%s2139_s22 + $0x128] sm:$0xff] %v1949_v57   ;;  %v1952_v62 = vpack.c.bf16 %v1706_v59, %v1705_v58  ;;  %vm874_vm15 = vcmp.ge.f32.partialorder %v865_v49, 1.0  ;;  %v1707_v63 = vsel %vm873_vm14, 1.0, %v2058_v6  ;;  %v947_v7 = vsel %vm873_vm14, 0.0, %v864_v48  ;;  %1093 = vst [vmem:[%s2393_s26 + $0x68] sm:$0xf] (%p2091_p4), %v1092_v41 }
  0x6e   : > { %v1708_v8 = vsel %vm874_vm15, 1.0, %v2058_v6  ;;  %v948_v9 = vsel %vm874_vm15, 0.0, %v865_v49  ;;  %v866_v10 = vadd.f32 %v857_v40, %v2146_v22  ;;  %v941_v11 = vsel %vm867_vm8, 0.0, %v2311_v16  ;;  %v1088_v40 = vld [vmem:[%s2139_s22 + $0x3c] sm:$0xff] (%p2091_p4)   ;;  %1099 = vst [vmem:[%s2393_s26 + $0x98] sm:$0xff] (%p2091_p4), %v1098_v43   ;;  %v1112_v47 = vld [vmem:[%s2139_s22 + $0x6c] sm:$0xff] (%p2091_p4)  }
  0x6f   : > { %2002 = vst [vmem:[%s2139_s22 + $0x130] sm:$0xff] %v1952_v62   ;;  %v1955_v12 = vpack.c.bf16 %v1708_v8, %v1707_v63  ;;  %v950_v13 = vadd.f32 %v941_v11, %v2102_v0  ;;  %v951_v17 = vadd.f32 %v942_v51, %v2105_v1  ;;  %v952_v18 = vadd.f32 %v943_v55, %v2108_v2  ;;  %v1102_v44 = vld [vmem:[%s2139_s22 + $0x58] sm:$0xff] (%p2091_p4)   ;;  %v1106_v45 = vld [vmem:[%s2139_s22 + $0x60] sm:$0xff] (%p2091_p4)   ;;  %v1110_v46 = vld [vmem:[%s2139_s22 + $0x68] sm:$0xf] (%p2091_p4) }
  0x70   : > { %vm875_vm0 = vcmp.ge.f32.partialorder %v866_v10, 1.0  ;;  %v953_v19 = vadd.f32 %v944_v56, %v2113_v3  ;;  %v954_v20 = vadd.f32 %v945_v60, %v2117_v4  ;;  %v955_v21 = vadd.f32 %v946_v61, %v2120_v5  ;;  %1089 = vst [vmem:[%s2393_s26 + $0x60] sm:$0xff] (%p2091_p4), %v1088_v40   ;;  %1103 = vst [vmem:[%s2393_s26 + $0xa0] sm:$0xff] (%p2091_p4), %v1102_v44   ;;  %v1116_v48 = vld [vmem:[%s2139_s22 + $0x74] sm:$0xff] (%p2091_p4)   ;;  %v1120_v49 = vld [vmem:[%s2139_s22 + $0x7c] sm:$0xff] (%p2091_p4)  }
  0x71   : > { %2003 = vst [vmem:[%s2139_s22 + $0x138] sm:$0xff] %v1955_v12   ;;  %v1709_v23 = vsel %vm875_vm0, 1.0, %v2058_v6  ;;  %v949_v16 = vsel %vm875_vm0, 0.0, %v866_v10  ;;  %vm959_vm1 = vcmp.ge.f32.partialorder %v950_v13, 1.0  ;;  %vm960_vm2 = vcmp.ge.f32.partialorder %v951_v17, 1.0  ;;  %1107 = vst [vmem:[%s2393_s26 + $0xa8] sm:$0xff] (%p2091_p4), %v1106_v45  }
  0x72   : > { %v1838_v0 = vpack.c.bf16 %v1709_v23, %v1709_v23  ;;  %v1728_v1 = vsel %vm959_vm1, 1.0, %v2058_v6  ;;  %vm961_vm3 = vcmp.ge.f32.partialorder %v952_v18, 1.0  ;;  %v1729_v2 = vsel %vm960_vm2, 1.0, %v2058_v6  ;;  %1111 = vst [vmem:[%s2393_s26 + $0xb0] sm:$0xf] (%p2091_p4), %v1110_v46  ;;  %1113 = vst [vmem:[%s2393_s26 + $0xd8] sm:$0xff] (%p2091_p4), %v1112_v47  }
  0x73   : > { %v1839_v3 = vpack.c.bf16 %v1728_v1, %v1728_v1  ;;  %v1730_v24 = vsel %vm961_vm3, 1.0, %v2058_v6  ;;  %vm962_vm4 = vcmp.ge.f32.partialorder %v953_v19, 1.0  ;;  %vm963_vm5 = vcmp.ge.f32.partialorder %v954_v20, 1.0  ;;  %1117 = vst [vmem:[%s2393_s26 + $0xe0] sm:$0xff] (%p2091_p4), %v1116_v48   ;;  %1121 = vst [vmem:[%s2393_s26 + $0xe8] sm:$0xff] (%p2091_p4), %v1120_v49   ;;  %v1124_v50 = vld [vmem:[%s2139_s22 + $0x84] sm:$0xff] (%p2091_p4)  }
  0x74   : > { %1727 = vst [vmem:[%s2139_s22 + $0x140] sm:$0xf] %v1838_v0  ;;  %v1958_v4 = vpack.c.bf16 %v1730_v24, %v1729_v2  ;;  %v1731_v5 = vsel %vm962_vm4, 1.0, %v2058_v6  ;;  %v1732_v25 = vsel %vm963_vm5, 1.0, %v2058_v6  ;;  %v956_v26 = vadd.f32 %v947_v7, %v2130_v14  ;;  %v1128_v51 = vld [vmem:[%s2139_s22 + $0x8c] sm:$0xf] (%p2091_p4) }
  0x75   : > { %1746 = vst [vmem:[%s2139_s22 + $0x144] sm:$0xf] %v1839_v3  ;;  %v1961_v27 = vpack.c.bf16 %v1732_v25, %v1731_v5  ;;  %vm964_vm6 = vcmp.ge.f32.partialorder %v955_v21, 1.0  ;;  %v957_v28 = vadd.f32 %v948_v9, %v2133_v15  ;;  %v958_v29 = vadd.f32 %v949_v16, %v2146_v22  ;;  %1039 = sbr.rel (!%p2091_p4) target bundleno = 138 (0x8a), region = 28  ;;  %v1058_v15 = vld [vmem:[%s2139_s22] sm:$0xff] (%p2091_p4)   ;;  %v1062_v22 = vld [vmem:[%s2139_s22 + $0x8] sm:$0xff] (%p2091_p4)  }
  0x76   : > { %2004 = vst [vmem:[%s2139_s22 + $0x148] sm:$0xff] %v1958_v4   ;;  %vm965_vm7 = vcmp.ge.f32.partialorder %v956_v26, 1.0  ;;  %v1733_v30 = vsel %vm964_vm6, 1.0, %v2058_v6  ;;  %1059 = vst [vmem:[%s2393_s26] sm:$0xff] (%p2091_p4), %v1058_v15   ;;  %v1130_v52 = vld [vmem:[%s2139_s22 + $0x90] sm:$0xff] (%p2091_p4)   ;;  %v1134_v53 = vld [vmem:[%s2139_s22 + $0x98] sm:$0xff] (%p2091_p4)  }
  0x77   : > { %2005 = vst [vmem:[%s2139_s22 + $0x150] sm:$0xff] %v1961_v27   ;;  %v1734_v31 = vsel %vm965_vm7, 1.0, %v2058_v6  ;;  %vm966_vm8 = vcmp.ge.f32.partialorder %v957_v28, 1.0  ;;  %vm967_vm9 = vcmp.ge.f32.partialorder %v958_v29, 1.0  ;;  %1063 = vst [vmem:[%s2393_s26 + $0x8] sm:$0xff] (%p2091_p4), %v1062_v22   ;;  %v1138_v54 = vld [vmem:[%s2139_s22 + $0xa0] sm:$0xff] (%p2091_p4)  }
  0x78   : > { %v1964_v32 = vpack.c.bf16 %v1734_v31, %v1733_v30  ;;  %v1735_v14 = vsel %vm966_vm8, 1.0, %v2058_v6  ;;  %v1736_v33 = vsel %vm967_vm9, 1.0, %v2058_v6  ;;  %v1066_v6 = vld [vmem:[%s2139_s22 + $0x10] sm:$0xff] (%p2091_p4)   ;;  %1125 = vst [vmem:[%s2393_s26 + $0xf0] sm:$0xff] (%p2091_p4), %v1124_v50   ;;  %1129 = vst [vmem:[%s2393_s26 + $0xf8] sm:$0xf] (%p2091_p4), %v1128_v51 }
  0x79   : > { %v1967_v34 = vpack.c.bf16 %v1736_v33, %v1735_v14  ;;  %1067 = vst [vmem:[%s2393_s26 + $0x10] sm:$0xff] (%p2091_p4), %v1066_v6   ;;  %1131 = vst [vmem:[%s2393_s26 + $0x120] sm:$0xff] (%p2091_p4), %v1130_v52   ;;  %v1142_v55 = vld [vmem:[%s2139_s22 + $0xa8] sm:$0xff] (%p2091_p4)   ;;  %v1146_v56 = vld [vmem:[%s2139_s22 + $0xb0] sm:$0xf] (%p2091_p4) }
  0x7a   : > { %2006 = vst [vmem:[%s2139_s22 + $0x158] sm:$0xff] %v1964_v32   ;;  %1135 = vst [vmem:[%s2393_s26 + $0x128] sm:$0xff] (%p2091_p4), %v1134_v53   ;;  %v1148_v57 = vld [vmem:[%s2139_s22 + $0xb4] sm:$0xff] (%p2091_p4)   ;;  %v1152_v58 = vld [vmem:[%s2139_s22 + $0xbc] sm:$0xff] (%p2091_p4)  }
  0x7b   : > { %2007 = vst [vmem:[%s2139_s22 + $0x160] sm:$0xff] %v1967_v34   ;;  %1139 = vst [vmem:[%s2393_s26 + $0x130] sm:$0xff] (%p2091_p4), %v1138_v54   ;;  %v1156_v59 = vld [vmem:[%s2139_s22 + $0xc4] sm:$0xff] (%p2091_p4)   ;;  %v1160_v60 = vld [vmem:[%s2139_s22 + $0xcc] sm:$0xff] (%p2091_p4)  }
  0x7c   : > { %1143 = vst [vmem:[%s2393_s26 + $0x138] sm:$0xff] %v1142_v55   ;;  %1147 = vst [vmem:[%s2393_s26 + $0x140] sm:$0xf] %v1146_v56  ;;  %v1164_v61 = vld [vmem:[%s2139_s22 + $0xd4] sm:$0xf]  ;;  %v1166_v62 = vld [vmem:[%s2139_s22 + $0xd8] sm:$0xff]  }
  0x7d   : > { %1149 = vst [vmem:[%s2393_s26 + $0x168] sm:$0xff] %v1148_v57   ;;  %1153 = vst [vmem:[%s2393_s26 + $0x170] sm:$0xff] %v1152_v58   ;;  %v1170_v63 = vld [vmem:[%s2139_s22 + $0xe0] sm:$0xff]   ;;  %v1174_v7 = vld [vmem:[%s2139_s22 + $0xe8] sm:$0xff]  }
  0x7e   : > { %1157 = vst [vmem:[%s2393_s26 + $0x178] sm:$0xff] %v1156_v59   ;;  %1161 = vst [vmem:[%s2393_s26 + $0x180] sm:$0xff] %v1160_v60   ;;  %v1178_v8 = vld [vmem:[%s2139_s22 + $0xf0] sm:$0xff]   ;;  %v1182_v9 = vld [vmem:[%s2139_s22 + $0xf8] sm:$0xf] }
  0x7f   : > { %1165 = vst [vmem:[%s2393_s26 + $0x188] sm:$0xf] %v1164_v61  ;;  %1167 = vst [vmem:[%s2393_s26 + $0x1b0] sm:$0xff] %v1166_v62   ;;  %v1184_v10 = vld [vmem:[%s2139_s22 + $0xfc] sm:$0xff]   ;;  %v1188_v11 = vld [vmem:[%s2139_s22 + $0x104] sm:$0xff]  }
  0x80   : > { %1171 = vst [vmem:[%s2393_s26 + $0x1b8] sm:$0xff] %v1170_v63   ;;  %1175 = vst [vmem:[%s2393_s26 + $0x1c0] sm:$0xff] %v1174_v7   ;;  %v1192_v12 = vld [vmem:[%s2139_s22 + $0x10c] sm:$0xff]   ;;  %v1196_v13 = vld [vmem:[%s2139_s22 + $0x114] sm:$0xff]  }
  0x81   : > { %1179 = vst [vmem:[%s2393_s26 + $0x1c8] sm:$0xff] %v1178_v8   ;;  %1183 = vst [vmem:[%s2393_s26 + $0x1d0] sm:$0xf] %v1182_v9  ;;  %v1200_v17 = vld [vmem:[%s2139_s22 + $0x11c] sm:$0xf]  ;;  %v1202_v18 = vld [vmem:[%s2139_s22 + $0x120] sm:$0xff]  }
  0x82   : > { %1185 = vst [vmem:[%s2393_s26 + $0x1f8] sm:$0xff] %v1184_v10   ;;  %1189 = vst [vmem:[%s2393_s26 + $0x200] sm:$0xff] %v1188_v11   ;;  %v1206_v19 = vld [vmem:[%s2139_s22 + $0x128] sm:$0xff]   ;;  %v1210_v20 = vld [vmem:[%s2139_s22 + $0x130] sm:$0xff]  }
  0x83   : > { %1193 = vst [vmem:[%s2393_s26 + $0x208] sm:$0xff] %v1192_v12   ;;  %1197 = vst [vmem:[%s2393_s26 + $0x210] sm:$0xff] %v1196_v13   ;;  %v1214_v21 = vld [vmem:[%s2139_s22 + $0x138] sm:$0xff]   ;;  %v1218_v23 = vld [vmem:[%s2139_s22 + $0x140] sm:$0xf] }
  0x84   : > { %1201 = vst [vmem:[%s2393_s26 + $0x218] sm:$0xf] %v1200_v17  ;;  %1203 = vst [vmem:[%s2393_s26 + $0x240] sm:$0xff] %v1202_v18   ;;  %v1220_v16 = vld [vmem:[%s2139_s22 + $0x144] sm:$0xff]   ;;  %v1224_v0 = vld [vmem:[%s2139_s22 + $0x14c] sm:$0xff]  }
  0x85   : > { %1207 = vst [vmem:[%s2393_s26 + $0x248] sm:$0xff] %v1206_v19   ;;  %1211 = vst [vmem:[%s2393_s26 + $0x250] sm:$0xff] %v1210_v20   ;;  %v1228_v1 = vld [vmem:[%s2139_s22 + $0x154] sm:$0xff]   ;;  %v1232_v2 = vld [vmem:[%s2139_s22 + $0x15c] sm:$0xff]  }
  0x86   : > { %1215 = vst [vmem:[%s2393_s26 + $0x258] sm:$0xff] %v1214_v21   ;;  %1219 = vst [vmem:[%s2393_s26 + $0x260] sm:$0xf] %v1218_v23  ;;  %v1236_v3 = vld [vmem:[%s2139_s22 + $0x164] sm:$0xf] }
  0x87   : > { %1221 = vst [vmem:[%s2393_s26 + $0x288] sm:$0xff] %v1220_v16   ;;  %1225 = vst [vmem:[%s2393_s26 + $0x290] sm:$0xff] %v1224_v0  }
  0x88   : > { %1229 = vst [vmem:[%s2393_s26 + $0x298] sm:$0xff] %v1228_v1   ;;  %1233 = vst [vmem:[%s2393_s26 + $0x2a0] sm:$0xff] %v1232_v2  }
  0x89   : > { %1237 = vst [vmem:[%s2393_s26 + $0x2a8] sm:$0xf] %v1236_v3 }
  0x8a PF: > { %p8_p8 = scmp.ge.s32.totalorder %s2082_s10, 4   ;;  %s2502_s6 = smov %s2052_s7 }
  0x8b   : > { %s2503_s7 = smov %s2089_s13  ;;  %s2504_s8 = smov %s2082_s10 }
  0x8c   :  { %10 = sbr.rel (!%p8_p8) target bundleno = 2 (0x2), region = 104 }

// kernel: snn_forward.7
= control target key start
LH: loop header
LB: loop body
LE: loop exit
PB: predicated region body
PF: predicated region fallthrough
CT: control target
= control target key end

     0   :  { %s1186_s15 = smov 0   ;;  %s1393_s0 = inlined_call_operand.vmem [shape: bf16[1280,400], index: 0, kind: input, shape index: {}]   ;;  %s1394_s1 = inlined_call_operand.vmem [shape: bf16[400,128], index: 1, kind: input, shape index: {}]   ;;  %s1395_s2 = inlined_call_operand.vmem [shape: f32[1,128], index: 2, kind: input, shape index: {}]   ;;  %s1396_s3 = inlined_call_operand.vmem [shape: f32[1,128], index: 3, kind: input, shape index: {}]   ;;  %s1397_s4 = inlined_call_operand.vmem [shape: f32[1280,128], index: 4, kind: output, shape index: {}]  }
   0x1 LB: > { %s926_s16 = sadd.s32 4294967295, %s1158_s15   ;;  %p930_p0 = scmp.ge.s32.totalorder %s1158_s15, 1  ;;  %s1158_s15 = sphi %s1186_s15, %s14_s15  }
   0x2   : > { %p164_p1 = scmp.lt.s32.totalorder %s1158_s15, 11 }
   0x4   : > { %p165_p2 = pnand %p930_p0, %p164_p1 }
   0x5   : > { %v1079_v0 = vld [vmem:[%s1394_s1 + $0x40] sm:$0xff] (!%p165_p2)   ;;  %v1160_v1 = vmov (!%p165_p2), 0   ;;  %v1082_v4 = vld [vmem:[%s1394_s1 + $0x48] sm:$0xff] (!%p165_p2)   ;;  %v1085_v7 = vld [vmem:[%s1394_s1 + $0x50] sm:$0xff] (!%p165_p2)   ;;  %s931_s9 = sshll.u32 (!%p165_p2), %s926_s16, 4  ;;  %vm589_vm0 = vcmask (!%p165_p2), 130048  }
   0x6   : > { %168 = sbr.rel (%p165_p2) target bundleno = 319 (0x13f), region = 36  ;;  %711 = vmatprep.subr.bf16.mxu1 (!%p165_p2), %v1160_v1  ;;  %v1080_v2 = vld [vmem:[%s1394_s1 + $0x80] sm:$0xff] (!%p165_p2)   ;;  %1006 = vmatprep.subr.bf16.mxu0 (!%p165_p2), %v1079_v0  ;;  %v1083_v5 = vld [vmem:[%s1394_s1 + $0x88] sm:$0xff] (!%p165_p2)   ;;  %v1086_v8 = vld [vmem:[%s1394_s1 + $0x90] sm:$0xff] (!%p165_p2)   ;;  %p192_p3 = scmp.lt.s32.totalorder (!%p165_p2), %s931_s9, 159 }
   0x7   : > { %v1081_v3 = vld [vmem:[%s1394_s1] sm:$0xff] (!%p165_p2)   ;;  %712 = vmatpush1.bf16.msra.mxu1 (!%p165_p2), %v1080_v2  ;;  %v1084_v6 = vld [vmem:[%s1394_s1 + $0x8] sm:$0xff] (!%p165_p2)   ;;  %v1087_v9 = vld [vmem:[%s1394_s1 + $0x10] sm:$0xff] (!%p165_p2)  }
   0x8   : > { %1007 = vmatpush3.bf16.msra.mxu0 (!%p165_p2), %v1081_v3  ;;  %713 = vmatprep.subr.bf16.mxu1 (!%p165_p2), %v1160_v1  ;;  %v1088_v10 = vld [vmem:[%s1394_s1 + $0x58] sm:$0xff] (!%p165_p2)   ;;  %v1091_v13 = vld [vmem:[%s1394_s1 + $0x60] sm:$0xff] (!%p165_p2)   ;;  %v1094_v16 = vld [vmem:[%s1394_s1 + $0x68] sm:$0xff] (!%p165_p2)  }
   0x9   : > { %1008 = vmatprep.subr.bf16.mxu0 (!%p165_p2), %v1082_v4  ;;  %v1089_v11 = vld [vmem:[%s1394_s1 + $0x98] sm:$0xff] (!%p165_p2)   ;;  %v1092_v14 = vld [vmem:[%s1394_s1 + $0xa0] sm:$0xff] (!%p165_p2)   ;;  %v1095_v17 = vld [vmem:[%s1394_s1 + $0xa8] sm:$0xff] (!%p165_p2)  }
   0xa   : > { %v1090_v12 = vld [vmem:[%s1394_s1 + $0x18] sm:$0xff] (!%p165_p2)   ;;  %v1093_v15 = vld [vmem:[%s1394_s1 + $0x20] sm:$0xff] (!%p165_p2)   ;;  %v1096_v18 = vld [vmem:[%s1394_s1 + $0x28] sm:$0xff] (!%p165_p2)  }
   0xb   : > { %714 = vmatpush1.bf16.msra.mxu1 (!%p165_p2), %v1083_v5  ;;  %v1097_v19 = vld [vmem:[%s1394_s1 + $0x70] sm:$0xff] (!%p165_p2)   ;;  %v1100_v22 = vld [vmem:[%s1394_s1 + $0x78] sm:$0xff] (!%p165_p2)   ;;  %v1106_v28 = vld [vmem:[%s1394_s1 + $0xc0] sm:$0xff] (!%p165_p2)  }
   0xc   : > { %1009 = vmatpush3.bf16.msra.mxu0 (!%p165_p2), %v1084_v6  ;;  %715 = vmatprep.subr.bf16.mxu1 (!%p165_p2), %v1160_v1  ;;  %v1098_v20 = vld [vmem:[%s1394_s1 + $0xb0] sm:$0xff] (!%p165_p2)   ;;  %v1101_v24 = vld [vmem:[%s1394_s1 + $0xb8] sm:$0xff] (!%p165_p2)   ;;  %v1329_v0 = vld [vmem:[%s1395_s2] ss:$0 sm:$0xff] (!%p165_p2) }
   0xd   : > { %1010 = vmatprep.subr.bf16.mxu0 %v1085_v7  ;;  %s1399_s9 = smov (!%p192_p3, %s931_s9), 159  ;;  %v1099_v21 = vld [vmem:[%s1394_s1 + $0x30] sm:$0xff]   ;;  %v1102_v26 = vld [vmem:[%s1394_s1 + $0x38] sm:$0xff]   ;;  %v1335_v4 = vld [vmem:[%s1396_s3] ss:$0 sm:$0xff] }
   0xe   : > { %s1005_s27 = sshll.u32 %s1399_s9, 4  ;;  %s935_s25 = sshll.u32 %s1399_s9, 3 }
   0xf   : > { %716 = vmatpush1.bf16.msra.mxu1 %v1086_v8  ;;  %s1266_s11 = scalar_lea.vmem %s1393_s0, %s1005_s27  ;;  %s1341_s30 = scalar_lea.vmem %s1397_s4, %s935_s25 }
  0x10   : > { %1011 = vmatpush3.bf16.msra.mxu0 %v1087_v9  ;;  %717 = vmatprep.subr.bf16.mxu1 %v1160_v1  ;;  %v1105_v23 = vld [vmem:[%s1266_s11 + $0x4] ss:$16 sps:$4 sm:$0xff]   ;;  %v1109_v25 = vld [vmem:[%s1266_s11 + $0xc] ss:$16 sps:$4 sm:$0xff]   ;;  %v1103_v27 = vld [vmem:[%s1266_s11] ss:$16 sps:$4 sm:$0xff]  }
  0x11   : > { %1012 = vmatprep.subr.bf16.mxu0 %v1088_v10  ;;  %646 = vmatprep.mubr.bf16.mxu0 %v1105_v23  ;;  %v1110_v29 = vld [vmem:[%s1266_s11 + $0x24] ss:$16 sps:$4 sm:$0xff]   ;;  %v1107_v30 = vld [vmem:[%s1266_s11 + $0x8] ss:$16 sps:$4 sm:$0xff]   ;;  %v1113_v31 = vld [vmem:[%s1266_s11 + $0x2c] ss:$16 sps:$4 sm:$0xff]  }
  0x12   : > { %993 = vmatprep.mubr.msk.bf16.mxu1 %vm589_vm0, %v1109_v25  ;;  %v1112_v32 = vld [vmem:[%s1266_s11 + $0x20] ss:$16 sps:$4 sm:$0xff]   ;;  %v1116_v33 = vld [vmem:[%s1266_s11 + $0x44] ss:$16 sps:$4 sm:$0xff]   ;;  %v1115_v34 = vld [vmem:[%s1266_s11 + $0x28] ss:$16 sps:$4 sm:$0xff]  }
  0x13   : > { %718 = vmatpush1.bf16.msra.mxu1 %v1089_v11  ;;  %v1119_v35 = vld [vmem:[%s1266_s11 + $0x4c] ss:$16 sps:$4 sm:$0xff]   ;;  %v1118_v36 = vld [vmem:[%s1266_s11 + $0x40] ss:$16 sps:$4 sm:$0xff]   ;;  %v1122_v37 = vld [vmem:[%s1266_s11 + $0x64] ss:$16 sps:$4 sm:$0xff]  }
  0x14   : > { %1013 = vmatpush3.bf16.msra.mxu0 %v1090_v12  ;;  %719 = vmatprep.subr.bf16.mxu1 %v1160_v1  ;;  %v1121_v38 = vld [vmem:[%s1266_s11 + $0x48] ss:$16 sps:$4 sm:$0xff]   ;;  %v1125_v39 = vld [vmem:[%s1266_s11 + $0x6c] ss:$16 sps:$4 sm:$0xff]   ;;  %v1124_v40 = vld [vmem:[%s1266_s11 + $0x60] ss:$16 sps:$4 sm:$0xff]  }
  0x15   : > { %1014 = vmatprep.subr.bf16.mxu0 %v1091_v13  ;;  %v1128_v41 = vld [vmem:[%s1266_s11 + $0x84] ss:$16 sps:$4 sm:$0xff]   ;;  %v1127_v42 = vld [vmem:[%s1266_s11 + $0x68] ss:$16 sps:$4 sm:$0xff]   ;;  %v1131_v43 = vld [vmem:[%s1266_s11 + $0x8c] ss:$16 sps:$4 sm:$0xff]  }
  0x16   : > { %v1130_v44 = vld [vmem:[%s1266_s11 + $0x80] ss:$16 sps:$4 sm:$0xff]   ;;  %v1134_v45 = vld [vmem:[%s1266_s11 + $0xa4] ss:$16 sps:$4 sm:$0xff]   ;;  %v1133_v46 = vld [vmem:[%s1266_s11 + $0x88] ss:$16 sps:$4 sm:$0xff]  }
  0x17   : > { %720 = vmatpush1.bf16.msra.mxu1 %v1092_v14  ;;  %v1137_v47 = vld [vmem:[%s1266_s11 + $0xac] ss:$16 sps:$4 sm:$0xff]   ;;  %v1136_v48 = vld [vmem:[%s1266_s11 + $0xa0] ss:$16 sps:$4 sm:$0xff]   ;;  %v1140_v49 = vld [vmem:[%s1266_s11 + $0xc4] ss:$16 sps:$4 sm:$0xff]  }
  0x18   : > { %1015 = vmatpush3.bf16.msra.mxu0 %v1093_v15  ;;  %721 = vmatprep.subr.bf16.mxu1 %v1160_v1  ;;  %v1139_v50 = vld [vmem:[%s1266_s11 + $0xa8] ss:$16 sps:$4 sm:$0xff]   ;;  %v1143_v51 = vld [vmem:[%s1266_s11 + $0xcc] ss:$16 sps:$4 sm:$0xff]   ;;  %v1142_v52 = vld [vmem:[%s1266_s11 + $0xc0] ss:$16 sps:$4 sm:$0xff]  }
  0x19   : > { %1016 = vmatprep.subr.bf16.mxu0 %v1094_v16  ;;  %v1146_v53 = vld [vmem:[%s1266_s11 + $0xe4] ss:$16 sps:$4 sm:$0xff]   ;;  %v1145_v54 = vld [vmem:[%s1266_s11 + $0xc8] ss:$16 sps:$4 sm:$0xff]   ;;  %v1149_v55 = vld [vmem:[%s1266_s11 + $0xec] ss:$16 sps:$4 sm:$0xff]  }
  0x1a   : > { %v1148_v56 = vld [vmem:[%s1266_s11 + $0xe0] ss:$16 sps:$4 sm:$0xff]   ;;  %v1151_v57 = vld [vmem:[%s1266_s11 + $0xe8] ss:$16 sps:$4 sm:$0xff]  }
  0x1b   : > { %722 = vmatpush1.bf16.msra.mxu1 %v1095_v17 }
  0x1c   : > { %1017 = vmatpush3.bf16.msra.mxu0 %v1096_v18  ;;  %723 = vmatprep.subr.bf16.mxu1 %v1160_v1 }
  0x1d   : > { %1018 = vmatprep.subr.bf16.mxu0 %v1097_v19 }
  0x1f   : > { %724 = vmatpush1.bf16.msra.mxu1 %v1098_v20 }
  0x20   : > { %1019 = vmatpush3.bf16.msra.mxu0 %v1099_v21  ;;  %725 = vmatprep.subr.bf16.mxu1 %v1160_v1 }
  0x21   : > { %1020 = vmatprep.subr.bf16.mxu0 %v1100_v22 }
  0x23   : > { %726 = vmatpush1.bf16.msra.mxu1 %v1101_v24 }
  0x24   : > { %1021 = vmatpush3.bf16.msra.mxu0 %v1102_v26  ;;  %727 = vmatprep.subr.bf16.mxu1 %v1160_v1 }
  0x27   : > { %647 = vmatmul.mubr.bf16.vlgmr.msra.gmra.mrb[0].mxu0 %v1103_v27  ;;  %728 = vmatpush1.bf16.msra.mxu1 %v1106_v28 }
  0x28   : > { %654 = vmatprep.mubr.bf16.mxu0 %v1110_v29 }
  0x2a   : > { %744 = vmatmul.mubr.bf16.vlgmr.msra.gmra.mrb[0].mxu1 %v1107_v30 }
  0x2b   : > { %994 = vmatprep.mubr.msk.bf16.mxu1 %vm589_vm0, %v1113_v31 }
  0x2f   : > { %655 = vmatmul.mubr.bf16.gmra.mrb[4].mxu0 %v1112_v32 }
  0x30   : > { %662 = vmatprep.mubr.bf16.mxu0 %v1116_v33 }
  0x32   : > { %752 = vmatmul.mubr.bf16.gmra.mrb[4].mxu1 %v1115_v34 }
  0x33   : > { %995 = vmatprep.mubr.msk.bf16.mxu1 %vm589_vm0, %v1119_v35 }
  0x37   : > { %663 = vmatmul.mubr.bf16.gmra.mrb[8].mxu0 %v1118_v36 }
  0x38   : > { %670 = vmatprep.mubr.bf16.mxu0 %v1122_v37 }
  0x3a   : > { %760 = vmatmul.mubr.bf16.gmra.mrb[8].mxu1 %v1121_v38 }
  0x3b   : > { %996 = vmatprep.mubr.msk.bf16.mxu1 %vm589_vm0, %v1125_v39 }
  0x3f   : > { %671 = vmatmul.mubr.bf16.gmra.mrb[12].mxu0 %v1124_v40 }
  0x40   : > { %678 = vmatprep.mubr.bf16.mxu0 %v1128_v41 }
  0x42   : > { %768 = vmatmul.mubr.bf16.gmra.mrb[12].mxu1 %v1127_v42 }
  0x43   : > { %997 = vmatprep.mubr.msk.bf16.mxu1 %vm589_vm0, %v1131_v43 }
  0x47   : > { %679 = vmatmul.mubr.bf16.gmra.mrb[16].mxu0 %v1130_v44 }
  0x48   : > { %686 = vmatprep.mubr.bf16.mxu0 %v1134_v45 }
  0x4a   : > { %776 = vmatmul.mubr.bf16.gmra.mrb[16].mxu1 %v1133_v46 }
  0x4b   : > { %998 = vmatprep.mubr.msk.bf16.mxu1 %vm589_vm0, %v1137_v47 }
  0x4f   : > { %687 = vmatmul.mubr.bf16.gmra.mrb[20].mxu0 %v1136_v48 }
  0x50   : > { %694 = vmatprep.mubr.bf16.mxu0 %v1140_v49 }
  0x52   : > { %784 = vmatmul.mubr.bf16.gmra.mrb[20].mxu1 %v1139_v50 }
  0x53   : > { %999 = vmatprep.mubr.msk.bf16.mxu1 %vm589_vm0, %v1143_v51 }
  0x57   : > { %695 = vmatmul.mubr.bf16.gmra.mrb[24].mxu0 %v1142_v52 }
  0x58   : > { %702 = vmatprep.mubr.bf16.mxu0 %v1146_v53 }
  0x5a   : > { %792 = vmatmul.mubr.bf16.gmra.mrb[24].mxu1 %v1145_v54 }
  0x5b   : > { %1000 = vmatprep.mubr.msk.bf16.mxu1 %vm589_vm0, %v1149_v55 }
  0x5f   : > { %703 = vmatmul.mubr.bf16.gmra.mrb[28].mxu0 %v1148_v56 }
  0x62   : > { %800 = vmatmul.mubr.bf16.gmra.mrb[28].mxu1 %v1151_v57 }
  0xfa   : > { %v1022_v58 = vpop.f32.mrb[0].mxu0 }
  0xfb   : > { %v1023_v59 = vpop.f32.mrb[1].mxu0 }
  0xfc   : > { %v1024_v60 = vadd.f32 %v1023_v59, %v1022_v58  ;;  %v1025_v61 = vpop.f32.mrb[2].mxu0 }
  0xfd   : > { %v1026_v62 = vpop.f32.mrb[3].mxu0  ;;  %v745_v63 = vpop.f32.mrb[0].mxu1 }
  0xfe   : > { %v1027_v1 = vadd.f32 %v1026_v62, %v1025_v61  ;;  %v746_v2 = vadd.f32 %v1024_v60, %v745_v63  ;;  %v747_v3 = vpop.f32.mrb[1].mxu1 }
  0xff   : > { %v748_v5 = vpop.f32.mrb[2].mxu1 }
 0x100   : > { %v815_v6 = vmul.f32 %v1329_v0, %v746_v2  ;;  %v749_v7 = vadd.f32 %v1027_v1, %v748_v5  ;;  %v750_v8 = vpop.f32.mrb[3].mxu1 }
 0x102   : > { %v838_v9 = vadd.f32 %v1335_v4, %v815_v6  ;;  %v816_v10 = vmul.f32 %v1329_v0, %v749_v7  ;;  %v1028_v11 = vpop.f32.mrb[4].mxu0 }
 0x103   : > { %v1029_v12 = vpop.f32.mrb[5].mxu0 }
 0x104   : > { %854 = vst [vmem:[%s1341_s30] sm:$0xff] %v838_v9  ;;  %v839_v13 = vadd.f32 %v1335_v4, %v816_v10  ;;  %v1030_v14 = vadd.f32 %v1029_v12, %v1028_v11  ;;  %v1031_v15 = vpop.f32.mrb[6].mxu0 }
 0x105   : > { %v1032_v16 = vpop.f32.mrb[7].mxu0  ;;  %v753_v17 = vpop.f32.mrb[4].mxu1 }
 0x106   : > { %855 = vst [vmem:[%s1341_s30 + $0x8] sm:$0xff] %v839_v13  ;;  %v1033_v18 = vadd.f32 %v1032_v16, %v1031_v15  ;;  %v754_v19 = vadd.f32 %v1030_v14, %v753_v17  ;;  %v755_v20 = vpop.f32.mrb[5].mxu1 }
 0x107   : > { %v756_v21 = vpop.f32.mrb[6].mxu1 }
 0x108   : > { %v817_v22 = vmul.f32 %v1329_v0, %v754_v19  ;;  %v757_v23 = vadd.f32 %v1033_v18, %v756_v21  ;;  %v758_v24 = vpop.f32.mrb[7].mxu1 }
 0x10a   : > { %v840_v25 = vadd.f32 %v1335_v4, %v817_v22  ;;  %v818_v26 = vmul.f32 %v1329_v0, %v757_v23  ;;  %v1034_v27 = vpop.f32.mrb[8].mxu0 }
 0x10b   : > { %v1035_v28 = vpop.f32.mrb[9].mxu0 }
 0x10c   : > { %856 = vst [vmem:[%s1341_s30 + $0x10] sm:$0xff] %v840_v25  ;;  %v841_v29 = vadd.f32 %v1335_v4, %v818_v26  ;;  %v1036_v30 = vadd.f32 %v1035_v28, %v1034_v27  ;;  %v1037_v31 = vpop.f32.mrb[10].mxu0 }
 0x10d   : > { %v1038_v32 = vpop.f32.mrb[11].mxu0  ;;  %v761_v33 = vpop.f32.mrb[8].mxu1 }
 0x10e   : > { %857 = vst [vmem:[%s1341_s30 + $0x18] sm:$0xff] %v841_v29  ;;  %v1039_v34 = vadd.f32 %v1038_v32, %v1037_v31  ;;  %v762_v35 = vadd.f32 %v1036_v30, %v761_v33  ;;  %v763_v36 = vpop.f32.mrb[9].mxu1 }
 0x10f   : > { %v764_v37 = vpop.f32.mrb[10].mxu1 }
 0x110   : > { %v819_v38 = vmul.f32 %v1329_v0, %v762_v35  ;;  %v765_v39 = vadd.f32 %v1039_v34, %v764_v37  ;;  %v766_v40 = vpop.f32.mrb[11].mxu1 }
 0x112   : > { %v842_v41 = vadd.f32 %v1335_v4, %v819_v38  ;;  %v820_v42 = vmul.f32 %v1329_v0, %v765_v39  ;;  %v1040_v43 = vpop.f32.mrb[12].mxu0 }
 0x113   : > { %v1041_v44 = vpop.f32.mrb[13].mxu0 }
 0x114   : > { %858 = vst [vmem:[%s1341_s30 + $0x20] sm:$0xff] %v842_v41  ;;  %v843_v45 = vadd.f32 %v1335_v4, %v820_v42  ;;  %v1042_v46 = vadd.f32 %v1041_v44, %v1040_v43  ;;  %v1043_v47 = vpop.f32.mrb[14].mxu0 }
 0x115   : > { %v1044_v48 = vpop.f32.mrb[15].mxu0  ;;  %v769_v49 = vpop.f32.mrb[12].mxu1 }
 0x116   : > { %859 = vst [vmem:[%s1341_s30 + $0x28] sm:$0xff] %v843_v45  ;;  %v1045_v50 = vadd.f32 %v1044_v48, %v1043_v47  ;;  %v770_v51 = vadd.f32 %v1042_v46, %v769_v49  ;;  %v771_v52 = vpop.f32.mrb[13].mxu1 }
 0x117   : > { %v772_v53 = vpop.f32.mrb[14].mxu1 }
 0x118   : > { %v821_v54 = vmul.f32 %v1329_v0, %v770_v51  ;;  %v773_v55 = vadd.f32 %v1045_v50, %v772_v53  ;;  %v774_v56 = vpop.f32.mrb[15].mxu1 }
 0x11a   : > { %v844_v57 = vadd.f32 %v1335_v4, %v821_v54  ;;  %v822_v58 = vmul.f32 %v1329_v0, %v773_v55  ;;  %v1046_v59 = vpop.f32.mrb[16].mxu0 }
 0x11b   : > { %v1047_v60 = vpop.f32.mrb[17].mxu0 }
 0x11c   : > { %860 = vst [vmem:[%s1341_s30 + $0x30] sm:$0xff] %v844_v57  ;;  %v845_v61 = vadd.f32 %v1335_v4, %v822_v58  ;;  %v1048_v62 = vadd.f32 %v1047_v60, %v1046_v59  ;;  %v1049_v63 = vpop.f32.mrb[18].mxu0 }
 0x11d   : > { %v1050_v1 = vpop.f32.mrb[19].mxu0  ;;  %v777_v2 = vpop.f32.mrb[16].mxu1 }
 0x11e   : > { %861 = vst [vmem:[%s1341_s30 + $0x38] sm:$0xff] %v845_v61  ;;  %v1051_v3 = vadd.f32 %v1050_v1, %v1049_v63  ;;  %v778_v5 = vadd.f32 %v1048_v62, %v777_v2  ;;  %v779_v6 = vpop.f32.mrb[17].mxu1 }
 0x11f   : > { %v780_v7 = vpop.f32.mrb[18].mxu1 }
 0x120   : > { %v823_v8 = vmul.f32 %v1329_v0, %v778_v5  ;;  %v781_v9 = vadd.f32 %v1051_v3, %v780_v7  ;;  %v782_v10 = vpop.f32.mrb[19].mxu1 }
 0x122   : > { %v846_v11 = vadd.f32 %v1335_v4, %v823_v8  ;;  %v824_v12 = vmul.f32 %v1329_v0, %v781_v9  ;;  %v1052_v13 = vpop.f32.mrb[20].mxu0 }
 0x123   : > { %v1053_v14 = vpop.f32.mrb[21].mxu0 }
 0x124   : > { %862 = vst [vmem:[%s1341_s30 + $0x40] sm:$0xff] %v846_v11  ;;  %v847_v15 = vadd.f32 %v1335_v4, %v824_v12  ;;  %v1054_v16 = vadd.f32 %v1053_v14, %v1052_v13  ;;  %v1055_v17 = vpop.f32.mrb[22].mxu0 }
 0x125   : > { %v1056_v18 = vpop.f32.mrb[23].mxu0  ;;  %v785_v19 = vpop.f32.mrb[20].mxu1 }
 0x126   : > { %863 = vst [vmem:[%s1341_s30 + $0x48] sm:$0xff] %v847_v15  ;;  %v1057_v20 = vadd.f32 %v1056_v18, %v1055_v17  ;;  %v786_v21 = vadd.f32 %v1054_v16, %v785_v19  ;;  %v787_v22 = vpop.f32.mrb[21].mxu1 }
 0x127   : > { %v788_v23 = vpop.f32.mrb[22].mxu1 }
 0x128   : > { %v825_v24 = vmul.f32 %v1329_v0, %v786_v21  ;;  %v789_v25 = vadd.f32 %v1057_v20, %v788_v23  ;;  %v790_v26 = vpop.f32.mrb[23].mxu1 }
 0x12a   : > { %v848_v27 = vadd.f32 %v1335_v4, %v825_v24  ;;  %v826_v28 = vmul.f32 %v1329_v0, %v789_v25  ;;  %v1058_v29 = vpop.f32.mrb[24].mxu0 }
 0x12b   : > { %v1059_v30 = vpop.f32.mrb[25].mxu0 }
 0x12c   : > { %864 = vst [vmem:[%s1341_s30 + $0x50] sm:$0xff] %v848_v27  ;;  %v849_v31 = vadd.f32 %v1335_v4, %v826_v28  ;;  %v1060_v32 = vadd.f32 %v1059_v30, %v1058_v29  ;;  %v1061_v33 = vpop.f32.mrb[26].mxu0 }
 0x12d   : > { %v1062_v34 = vpop.f32.mrb[27].mxu0  ;;  %v793_v35 = vpop.f32.mrb[24].mxu1 }
 0x12e   : > { %865 = vst [vmem:[%s1341_s30 + $0x58] sm:$0xff] %v849_v31  ;;  %v1063_v36 = vadd.f32 %v1062_v34, %v1061_v33  ;;  %v794_v37 = vadd.f32 %v1060_v32, %v793_v35  ;;  %v795_v38 = vpop.f32.mrb[25].mxu1 }
 0x12f   : > { %v796_v39 = vpop.f32.mrb[26].mxu1 }
 0x130   : > { %v827_v40 = vmul.f32 %v1329_v0, %v794_v37  ;;  %v797_v41 = vadd.f32 %v1063_v36, %v796_v39  ;;  %v798_v42 = vpop.f32.mrb[27].mxu1 }
 0x132   : > { %v850_v43 = vadd.f32 %v1335_v4, %v827_v40  ;;  %v828_v44 = vmul.f32 %v1329_v0, %v797_v41  ;;  %v1064_v45 = vpop.f32.mrb[28].mxu0 }
 0x133   : > { %v1065_v46 = vpop.f32.mrb[29].mxu0 }
 0x134   : > { %866 = vst [vmem:[%s1341_s30 + $0x60] sm:$0xff] %v850_v43  ;;  %v851_v47 = vadd.f32 %v1335_v4, %v828_v44  ;;  %v1066_v48 = vadd.f32 %v1065_v46, %v1064_v45  ;;  %v1067_v49 = vpop.f32.mrb[30].mxu0 }
 0x135   : > { %v1068_v50 = vpop.f32.mrb[31].mxu0  ;;  %v801_v51 = vpop.f32.mrb[28].mxu1 }
 0x136   : > { %867 = vst [vmem:[%s1341_s30 + $0x68] sm:$0xff] %v851_v47  ;;  %v1069_v52 = vadd.f32 %v1068_v50, %v1067_v49  ;;  %v802_v53 = vadd.f32 %v1066_v48, %v801_v51  ;;  %v803_v54 = vpop.f32.mrb[29].mxu1 }
 0x137   : > { %v804_v55 = vpop.f32.mrb[30].mxu1 }
 0x138   : > { %v829_v56 = vmul.f32 %v1329_v0, %v802_v53  ;;  %v805_v57 = vadd.f32 %v1069_v52, %v804_v55  ;;  %v806_v58 = vpop.f32.mrb[31].mxu1 }
 0x13a   : > { %v852_v59 = vadd.f32 %v1335_v4, %v829_v56  ;;  %v830_v60 = vmul.f32 %v1329_v0, %v805_v57 }
 0x13c   : > { %868 = vst [vmem:[%s1341_s30 + $0x70] sm:$0xff] %v852_v59  ;;  %v853_v61 = vadd.f32 %v1335_v4, %v830_v60 }
 0x13e   : > { %869 = vst [vmem:[%s1341_s30 + $0x78] sm:$0xff] %v853_v61 }
 0x13f PF: > { %s14_s15 = sadd.s32 1, %s1158_s15  }
 0x140   : > { %p11_p4 = scmp.ge.s32.totalorder %s14_s15, 12  }
 0x142   :  { %13 = sbr.rel (!%p11_p4) target bundleno = 1 (0x1), region = 66 }

// kernel: snn_forward.8
= control target key start
LH: loop header
LB: loop body
LE: loop exit
PB: predicated region body
PF: predicated region fallthrough
CT: control target
= control target key end

     0   :  { %s852_s6 = smov 0   ;;  %s854_s7 = smov 0   ;;  %s1020_s0 = inlined_call_operand.vmem [shape: f32[10,32,128], index: 0, kind: input, shape index: {}]   ;;  %s1021_s1 = inlined_call_operand.vmem [shape: bf16[10,32,128], index: 1, kind: output, shape index: {}]  }
   0x1   :  { %s856_s8 = smov 0  }
   0x2 LB: > { %s641_s9 = sadd.s32 4294967295, %s839_s8   ;;  %s869_s10 = sadd.s32 1, %s839_s8   ;;  %s839_s8 = sphi %s856_s8, %s1025_s8   ;;  %s835_s7 = sphi %s854_s7, %s1024_s7   ;;  %s831_s6 = sphi %s852_s6, %s1023_s6  }
   0x3   : > { %s15_s11 = ssub.s32 %s839_s8, %s869_s10  ;;  %s18_s12 = sadd.s32 1, %s835_s7 }
   0x4   : > { %p16_p0 = scmp.eq.s32.totalorder %s15_s11, 0  ;;  %p25_p1 = scmp.ne.s32.totalorder %s835_s7, %s831_s6 }
   0x5   : > { %p26_p2 = scmp.eq.s32.totalorder %s839_s8, 0  ;;  %p55_p3 = scmp.eq.s32.totalorder %s641_s9, 1 }
   0x6   : > { %s880_s13 = scalar_select %p16_p0, %s835_s7, %s18_s12  }
   0x7   : > { %p27_p4 = por %p26_p2, %p25_p1  ;;  %p882_p5 = por %p55_p3, %p25_p1 }
   0x8   : > { %p644_p6 = scmp.ge.s32.totalorder %s839_s8, 2 }
   0xa   : > { %77 = sbr.rel (%p644_p6) target bundleno = 31 (0x1f), region = 16 }
  0x11   : > { %80 = sbr.rel (!%p27_p4) target bundleno = 31 (0x1f), region = 20  ;;  %s82_s15 = sand.u32 (%p27_p4), 1, %s835_s7  }
  0x12   : > { %s728_s16 = sshll.u32 (%p27_p4), %s839_s8, 4  ;;  %s789_s17 = smul.u32 (%p27_p4), 160, %s82_s15 }
  0x13   : > { %s892_s20 = scalar_lea.vmem (%p27_p4), %s1020_s0, %s728_s16 }
  0x14   : > { %v153_v0 = vld [vmem:[%s892_s20] sm:$0xff] (%p27_p4)  ;;  %v155_v1 = vld [vmem:[%s892_s20 + $0x8] sm:$0xff] (%p27_p4)  ;;  %s900_s21 = scalar_lea.vmem (%p27_p4), [#allocation2], %s789_s17 }
  0x15   : > { %v157_v2 = vld [vmem:[%s892_s20 + $0x20] sm:$0xff] (%p27_p4)  ;;  %v159_v3 = vld [vmem:[%s892_s20 + $0x28] sm:$0xff] (%p27_p4)  ;;  %154 = vst [vmem:[%s900_s21] sm:$0xff] (%p27_p4), %v153_v0  ;;  %156 = vst [vmem:[%s900_s21 + $0x8] sm:$0xff] (%p27_p4), %v155_v1 }
  0x16   : > { %v161_v4 = vld [vmem:[%s892_s20 + $0x40] sm:$0xff] (%p27_p4)  ;;  %v163_v5 = vld [vmem:[%s892_s20 + $0x48] sm:$0xff] (%p27_p4)  ;;  %158 = vst [vmem:[%s900_s21 + $0x10] sm:$0xff] (%p27_p4), %v157_v2  ;;  %160 = vst [vmem:[%s900_s21 + $0x18] sm:$0xff] (%p27_p4), %v159_v3 }
  0x17   : > { %162 = vst [vmem:[%s900_s21 + $0x20] sm:$0xff] (%p27_p4), %v161_v4  ;;  %164 = vst [vmem:[%s900_s21 + $0x28] sm:$0xff] (%p27_p4), %v163_v5  ;;  %v165_v6 = vld [vmem:[%s892_s20 + $0x60] sm:$0xff] (%p27_p4)  ;;  %v167_v7 = vld [vmem:[%s892_s20 + $0x68] sm:$0xff] (%p27_p4) }
  0x18   : > { %v169_v8 = vld [vmem:[%s892_s20 + $0x80] sm:$0xff]  ;;  %166 = vst [vmem:[%s900_s21 + $0x30] sm:$0xff] %v165_v6  ;;  %168 = vst [vmem:[%s900_s21 + $0x38] sm:$0xff] %v167_v7  ;;  %v171_v9 = vld [vmem:[%s892_s20 + $0x88] sm:$0xff] }
  0x19   : > { %170 = vst [vmem:[%s900_s21 + $0x40] sm:$0xff] %v169_v8  ;;  %v173_v10 = vld [vmem:[%s892_s20 + $0xa0] sm:$0xff]  ;;  %v175_v11 = vld [vmem:[%s892_s20 + $0xa8] sm:$0xff]  ;;  %172 = vst [vmem:[%s900_s21 + $0x48] sm:$0xff] %v171_v9 }
  0x1a   : > { %174 = vst [vmem:[%s900_s21 + $0x50] sm:$0xff] %v173_v10  ;;  %176 = vst [vmem:[%s900_s21 + $0x58] sm:$0xff] %v175_v11  ;;  %v177_v12 = vld [vmem:[%s892_s20 + $0xc0] sm:$0xff]  ;;  %v179_v13 = vld [vmem:[%s892_s20 + $0xc8] sm:$0xff] }
  0x1b   : > { %v181_v14 = vld [vmem:[%s892_s20 + $0xe0] sm:$0xff]  ;;  %178 = vst [vmem:[%s900_s21 + $0x60] sm:$0xff] %v177_v12  ;;  %180 = vst [vmem:[%s900_s21 + $0x68] sm:$0xff] %v179_v13  ;;  %v183_v15 = vld [vmem:[%s892_s20 + $0xe8] sm:$0xff] }
  0x1c   : > { %182 = vst [vmem:[%s900_s21 + $0x70] sm:$0xff] %v181_v14  ;;  %v185_v16 = vld [vmem:[%s892_s20 + $0x100] sm:$0xff]  ;;  %v187_v17 = vld [vmem:[%s892_s20 + $0x108] sm:$0xff]  ;;  %184 = vst [vmem:[%s900_s21 + $0x78] sm:$0xff] %v183_v15 }
  0x1d   : > { %186 = vst [vmem:[%s900_s21 + $0x80] sm:$0xff] %v185_v16  ;;  %188 = vst [vmem:[%s900_s21 + $0x88] sm:$0xff] %v187_v17  ;;  %v189_v18 = vld [vmem:[%s892_s20 + $0x120] sm:$0xff]  ;;  %v191_v19 = vld [vmem:[%s892_s20 + $0x128] sm:$0xff] }
  0x1e   : > { %190 = vst [vmem:[%s900_s21 + $0x90] sm:$0xff] %v189_v18  ;;  %192 = vst [vmem:[%s900_s21 + $0x98] sm:$0xff] %v191_v19 }
  0x1f PF: > { %p647_p7 = scmp.ge.s32.totalorder %s839_s8, 1  ;;  %p197_p8 = scmp.lt.s32.totalorder %s839_s8, 3 }
  0x21   : > { %p198_p9 = pnand %p647_p7, %p197_p8 }
  0x22   : > { %s204_s22 = sand.u32 (!%p198_p9), 1, %s831_s6   ;;  %v841_v24 = vmov (!%p198_p9), 0.0  }
  0x23   : > { %201 = sbr.rel (%p198_p9) target bundleno = 89 (0x59), region = 58 }
  0x24   : > { %s790_s23 = smul.u32 (!%p198_p9), 160, %s204_s22 }
  0x25   : > { %s791_s24 = smul.u32 (!%p198_p9), 80, %s204_s22 }
  0x26   : > { %s939_s25 = scalar_lea.vmem (!%p198_p9), [#allocation2], %s790_s23 }
  0x27   : > { %v224_v20 = vld [vmem:[%s939_s25] sm:$0xff] (!%p198_p9)  ;;  %v225_v21 = vld [vmem:[%s939_s25 + $0x8] sm:$0xff] (!%p198_p9)  ;;  %v652_v22 = vld [vmem:[%s939_s25 + $0x10] sm:$0xff] (!%p198_p9)  ;;  %s949_s26 = scalar_lea.vmem (!%p198_p9), [#allocation3], %s791_s24 }
  0x28   : > { %vm228_vm0 = vcmp.ge.f32.partialorder (!%p198_p9), %v224_v20, 1.0  ;;  %vm229_vm1 = vcmp.ge.f32.partialorder (!%p198_p9), %v225_v21, 1.0  ;;  %v653_v23 = vld [vmem:[%s939_s25 + $0x18] sm:$0xff] (!%p198_p9)  ;;  %v660_v32 = vld [vmem:[%s939_s25 + $0x20] sm:$0xff] (!%p198_p9)  ;;  %v661_v33 = vld [vmem:[%s939_s25 + $0x28] sm:$0xff] (!%p198_p9) }
  0x29   : > { %v648_v25 = vsel (!%p198_p9), %vm228_vm0, 1.0, %v841_v24  ;;  %v649_v26 = vsel (!%p198_p9), %vm229_vm1, 1.0, %v841_v24  ;;  %v244_v27 = vsel (!%p198_p9), %vm228_vm0, 0.0, %v224_v20  ;;  %v245_v28 = vsel (!%p198_p9), %vm229_vm1, 0.0, %v225_v21  ;;  %v668_v41 = vld [vmem:[%s939_s25 + $0x30] sm:$0xff] (!%p198_p9)  ;;  %v669_v42 = vld [vmem:[%s939_s25 + $0x38] sm:$0xff] (!%p198_p9) }
  0x2a   : > { %v751_v29 = vpack.c.bf16 %v649_v26, %v648_v25  ;;  %v249_v30 = vadd.f32 %v652_v22, %v244_v27  ;;  %v250_v31 = vadd.f32 %v653_v23, %v245_v28  ;;  %v676_v50 = vld [vmem:[%s939_s25 + $0x40] sm:$0xff]  ;;  %v677_v51 = vld [vmem:[%s939_s25 + $0x48] sm:$0xff]  ;;  %v684_v59 = vld [vmem:[%s939_s25 + $0x50] sm:$0xff]  ;;  %s749_s27 = sshll.u32 (%p882_p5), %s641_s9, 3 }
  0x2b   : > { %v685_v60 = vld [vmem:[%s939_s25 + $0x58] sm:$0xff]  ;;  %v692_v4 = vld [vmem:[%s939_s25 + $0x60] sm:$0xff]  ;;  %v693_v5 = vld [vmem:[%s939_s25 + $0x68] sm:$0xff]  ;;  %s469_s30 = scalar_lea.vmem (%p882_p5), %s1021_s1, %s749_s27 }
  0x2c   : > { %752 = vst [vmem:[%s949_s26] sm:$0xff] %v751_v29   ;;  %vm251_vm2 = vcmp.ge.f32.partialorder %v249_v30, 1.0  ;;  %vm252_vm3 = vcmp.ge.f32.partialorder %v250_v31, 1.0  ;;  %v700_v13 = vld [vmem:[%s939_s25 + $0x70] sm:$0xff]  ;;  %v701_v14 = vld [vmem:[%s939_s25 + $0x78] sm:$0xff]  ;;  %v708_v22 = vld [vmem:[%s939_s25 + $0x80] sm:$0xff] }
  0x2d   : > { %v654_v34 = vsel %vm251_vm2, 1.0, %v841_v24  ;;  %v655_v35 = vsel %vm252_vm3, 1.0, %v841_v24  ;;  %v268_v36 = vsel %vm251_vm2, 0.0, %v249_v30  ;;  %v269_v37 = vsel %vm252_vm3, 0.0, %v250_v31  ;;  %v709_v23 = vld [vmem:[%s939_s25 + $0x88] sm:$0xff] }
  0x2e   : > { %v754_v38 = vpack.c.bf16 %v655_v35, %v654_v34  ;;  %v273_v39 = vadd.f32 %v660_v32, %v268_v36  ;;  %v274_v40 = vadd.f32 %v661_v33, %v269_v37  ;;  %v716_v32 = vld [vmem:[%s939_s25 + $0x90] sm:$0xff]  ;;  %v717_v33 = vld [vmem:[%s939_s25 + $0x98] sm:$0xff] }
  0x30   : > { %780 = vst [vmem:[%s949_s26 + $0x8] sm:$0xff] %v754_v38   ;;  %vm275_vm4 = vcmp.ge.f32.partialorder %v273_v39, 1.0  ;;  %vm276_vm5 = vcmp.ge.f32.partialorder %v274_v40, 1.0 }
  0x31   : > { %v662_v43 = vsel %vm275_vm4, 1.0, %v841_v24  ;;  %v663_v44 = vsel %vm276_vm5, 1.0, %v841_v24  ;;  %v292_v45 = vsel %vm275_vm4, 0.0, %v273_v39  ;;  %v293_v46 = vsel %vm276_vm5, 0.0, %v274_v40 }
  0x32   : > { %v757_v47 = vpack.c.bf16 %v663_v44, %v662_v43  ;;  %v297_v48 = vadd.f32 %v668_v41, %v292_v45  ;;  %v298_v49 = vadd.f32 %v669_v42, %v293_v46 }
  0x33   : > { %v485_v44 = vld [vmem:[%s949_s26] sm:$0xff] (%p882_p5)  }
  0x34   : > { %781 = vst [vmem:[%s949_s26 + $0x10] sm:$0xff] %v757_v47   ;;  %vm299_vm6 = vcmp.ge.f32.partialorder %v297_v48, 1.0  ;;  %vm300_vm7 = vcmp.ge.f32.partialorder %v298_v49, 1.0  ;;  %486 = vst [vmem:[%s469_s30] sm:$0xff] (%p882_p5), %v485_v44  }
  0x35   : > { %v670_v52 = vsel %vm299_vm6, 1.0, %v841_v24  ;;  %v671_v53 = vsel %vm300_vm7, 1.0, %v841_v24  ;;  %v316_v54 = vsel %vm299_vm6, 0.0, %v297_v48  ;;  %v317_v55 = vsel %vm300_vm7, 0.0, %v298_v49 }
  0x36   : > { %v760_v56 = vpack.c.bf16 %v671_v53, %v670_v52  ;;  %v321_v57 = vadd.f32 %v676_v50, %v316_v54  ;;  %v322_v58 = vadd.f32 %v677_v51, %v317_v55 }
  0x37   : > { %v489_v45 = vld [vmem:[%s949_s26 + $0x8] sm:$0xff] (%p882_p5)  }
  0x38   : > { %782 = vst [vmem:[%s949_s26 + $0x18] sm:$0xff] %v760_v56   ;;  %vm323_vm8 = vcmp.ge.f32.partialorder %v321_v57, 1.0  ;;  %vm324_vm9 = vcmp.ge.f32.partialorder %v322_v58, 1.0  ;;  %490 = vst [vmem:[%s469_s30 + $0x10] sm:$0xff] (%p882_p5), %v489_v45  }
  0x39   : > { %v678_v61 = vsel %vm323_vm8, 1.0, %v841_v24  ;;  %v679_v62 = vsel %vm324_vm9, 1.0, %v841_v24  ;;  %v340_v63 = vsel %vm323_vm8, 0.0, %v321_v57  ;;  %v341_v0 = vsel %vm324_vm9, 0.0, %v322_v58 }
  0x3a   : > { %v763_v1 = vpack.c.bf16 %v679_v62, %v678_v61  ;;  %v345_v2 = vadd.f32 %v684_v59, %v340_v63  ;;  %v346_v3 = vadd.f32 %v685_v60, %v341_v0 }
  0x3c   : > { %783 = vst [vmem:[%s949_s26 + $0x20] sm:$0xff] %v763_v1   ;;  %vm347_vm10 = vcmp.ge.f32.partialorder %v345_v2, 1.0  ;;  %vm348_vm11 = vcmp.ge.f32.partialorder %v346_v3, 1.0 }
  0x3d   : > { %v686_v6 = vsel %vm347_vm10, 1.0, %v841_v24  ;;  %v687_v7 = vsel %vm348_vm11, 1.0, %v841_v24  ;;  %v364_v8 = vsel %vm347_vm10, 0.0, %v345_v2  ;;  %v365_v9 = vsel %vm348_vm11, 0.0, %v346_v3 }
  0x3e   : > { %v766_v10 = vpack.c.bf16 %v687_v7, %v686_v6  ;;  %v369_v11 = vadd.f32 %v692_v4, %v364_v8  ;;  %v370_v12 = vadd.f32 %v693_v5, %v365_v9 }
  0x3f   : > { %v497_v46 = vld [vmem:[%s949_s26 + $0x18] sm:$0xff] (%p882_p5)  }
  0x40   : > { %784 = vst [vmem:[%s949_s26 + $0x28] sm:$0xff] %v766_v10   ;;  %vm371_vm12 = vcmp.ge.f32.partialorder %v369_v11, 1.0  ;;  %vm372_vm13 = vcmp.ge.f32.partialorder %v370_v12, 1.0  ;;  %498 = vst [vmem:[%s469_s30 + $0x30] sm:$0xff] (%p882_p5), %v497_v46  }
  0x41   : > { %v694_v15 = vsel %vm371_vm12, 1.0, %v841_v24  ;;  %v695_v16 = vsel %vm372_vm13, 1.0, %v841_v24  ;;  %v388_v17 = vsel %vm371_vm12, 0.0, %v369_v11  ;;  %v389_v18 = vsel %vm372_vm13, 0.0, %v370_v12 }
  0x42   : > { %v769_v19 = vpack.c.bf16 %v695_v16, %v694_v15  ;;  %v393_v20 = vadd.f32 %v700_v13, %v388_v17  ;;  %v394_v21 = vadd.f32 %v701_v14, %v389_v18 }
  0x43   : > { %v501_v47 = vld [vmem:[%s949_s26 + $0x20] sm:$0xff] (%p882_p5)  }
  0x44   : > { %785 = vst [vmem:[%s949_s26 + $0x30] sm:$0xff] %v769_v19   ;;  %vm395_vm14 = vcmp.ge.f32.partialorder %v393_v20, 1.0  ;;  %vm396_vm15 = vcmp.ge.f32.partialorder %v394_v21, 1.0  ;;  %502 = vst [vmem:[%s469_s30 + $0x40] sm:$0xff] (%p882_p5), %v501_v47  }
  0x45   : > { %v702_v25 = vsel %vm395_vm14, 1.0, %v841_v24  ;;  %v703_v26 = vsel %vm396_vm15, 1.0, %v841_v24  ;;  %v412_v27 = vsel %vm395_vm14, 0.0, %v393_v20  ;;  %v413_v28 = vsel %vm396_vm15, 0.0, %v394_v21 }
  0x46   : > { %v772_v29 = vpack.c.bf16 %v703_v26, %v702_v25  ;;  %v417_v30 = vadd.f32 %v708_v22, %v412_v27  ;;  %v418_v31 = vadd.f32 %v709_v23, %v413_v28 }
  0x47   : > { %v505_v48 = vld [vmem:[%s949_s26 + $0x28] sm:$0xff] (%p882_p5)  }
  0x48   : > { %786 = vst [vmem:[%s949_s26 + $0x38] sm:$0xff] %v772_v29   ;;  %vm419_vm0 = vcmp.ge.f32.partialorder %v417_v30, 1.0  ;;  %vm420_vm1 = vcmp.ge.f32.partialorder %v418_v31, 1.0  ;;  %506 = vst [vmem:[%s469_s30 + $0x50] sm:$0xff] (%p882_p5), %v505_v48  }
  0x49   : > { %v710_v34 = vsel %vm419_vm0, 1.0, %v841_v24  ;;  %v711_v35 = vsel %vm420_vm1, 1.0, %v841_v24  ;;  %v436_v36 = vsel %vm419_vm0, 0.0, %v417_v30  ;;  %v437_v37 = vsel %vm420_vm1, 0.0, %v418_v31 }
  0x4a   : > { %v775_v38 = vpack.c.bf16 %v711_v35, %v710_v34  ;;  %v441_v39 = vadd.f32 %v716_v32, %v436_v36  ;;  %v442_v40 = vadd.f32 %v717_v33, %v437_v37  ;;  %466 = sbr.rel (!%p882_p5) target bundleno = 89 (0x59), region = 66 }
  0x4b   : > { %v509_v49 = vld [vmem:[%s949_s26 + $0x30] sm:$0xff] (%p882_p5)  }
  0x4c   : > { %787 = vst [vmem:[%s949_s26 + $0x40] sm:$0xff] %v775_v38   ;;  %vm443_vm2 = vcmp.ge.f32.partialorder %v441_v39, 1.0  ;;  %vm444_vm3 = vcmp.ge.f32.partialorder %v442_v40, 1.0  ;;  %510 = vst [vmem:[%s469_s30 + $0x60] sm:$0xff] (%p882_p5), %v509_v49  }
  0x4d   : > { %v718_v41 = vsel %vm443_vm2, 1.0, %v841_v24  ;;  %v719_v42 = vsel %vm444_vm3, 1.0, %v841_v24  ;;  %v493_v24 = vld [vmem:[%s949_s26 + $0x10] sm:$0xff] (%p882_p5)  }
  0x4e   : > { %v778_v43 = vpack.c.bf16 %v719_v42, %v718_v41  ;;  %494 = vst [vmem:[%s469_s30 + $0x20] sm:$0xff] (%p882_p5), %v493_v24  }
  0x4f   : > { %v513_v50 = vld [vmem:[%s949_s26 + $0x38] sm:$0xff] (%p882_p5)  }
  0x50   : > { %788 = vst [vmem:[%s949_s26 + $0x48] sm:$0xff] %v778_v43   ;;  %514 = vst [vmem:[%s469_s30 + $0x70] sm:$0xff] (%p882_p5), %v513_v50  }
  0x53   : > { %v517_v51 = vld [vmem:[%s949_s26 + $0x40] sm:$0xff]  }
  0x54   : > { %518 = vst [vmem:[%s469_s30 + $0x80] sm:$0xff] %v517_v51  }
  0x57   : > { %v521_v52 = vld [vmem:[%s949_s26 + $0x48] sm:$0xff]  }
  0x58   : > { %522 = vst [vmem:[%s469_s30 + $0x90] sm:$0xff] %v521_v52  }
  0x59 PF: > { %p8_p10 = scmp.ge.s32.totalorder %s869_s10, 4   ;;  %s1023_s6 = smov %s835_s7 }
  0x5a   : > { %s1024_s7 = smov %s880_s13  ;;  %s1025_s8 = smov %s869_s10 }
  0x5b   :  { %10 = sbr.rel (!%p8_p10) target bundleno = 2 (0x2), region = 156 }

// kernel: snn_forward.9
= control target key start
LH: loop header
LB: loop body
LE: loop exit
PB: predicated region body
PF: predicated region fallthrough
CT: control target
= control target key end

     0   :  { %s2507_s1 = inlined_call_operand.vmem [shape: bf16[512,128], index: 1, kind: input, shape index: {}]   ;;  %s2508_s0 = inlined_call_operand.vmem [shape: bf16[10,8,512], index: 0, kind: input, shape index: {}]   ;;  %s2509_s2 = inlined_call_operand.vmem [shape: f32[8,128], index: 2, kind: output, shape index: {}]  }
   0x1   :  { %v1933_v0 = vld [vmem:[%s2507_s1 + $0x40] sm:$0xff]   ;;  %v1956_v4 = vld [vmem:[%s2507_s1 + $0x48] sm:$0xff]   ;;  %v1980_v8 = vld [vmem:[%s2507_s1 + $0x50] sm:$0xff]  }
   0x2   :  { %v1938_v1 = vld [vmem:[%s2507_s1 + $0xc0] sm:$0xff]   ;;  %1401 = vmatprep.subr.bf16.mxu0 %v1933_v0  ;;  %v1962_v5 = vld [vmem:[%s2507_s1 + $0xc8] sm:$0xff]   ;;  %v1986_v9 = vld [vmem:[%s2507_s1 + $0xd0] sm:$0xff]  }
   0x3   :  { %v1944_v2 = vld [vmem:[%s2507_s1] sm:$0xff]   ;;  %1423 = vmatprep.subr.bf16.mxu1 %v1938_v1  ;;  %v1968_v6 = vld [vmem:[%s2507_s1 + $0x8] sm:$0xff]   ;;  %v1992_v10 = vld [vmem:[%s2507_s1 + $0x10] sm:$0xff]  }
   0x4   :  { %v1950_v3 = vld [vmem:[%s2507_s1 + $0x80] sm:$0xff]   ;;  %1402 = vmatpush3.bf16.msra.mxu0 %v1944_v2  ;;  %v1974_v7 = vld [vmem:[%s2507_s1 + $0x88] sm:$0xff]   ;;  %v1998_v11 = vld [vmem:[%s2507_s1 + $0x90] sm:$0xff]  }
   0x5   :  { %1424 = vmatpush3.bf16.msra.mxu1 %v1950_v3  ;;  %1403 = vmatprep.subr.bf16.mxu0 %v1956_v4  ;;  %v2004_v12 = vld [vmem:[%s2507_s1 + $0x58] sm:$0xff]   ;;  %v2028_v16 = vld [vmem:[%s2507_s1 + $0x60] sm:$0xff]   ;;  %v2052_v20 = vld [vmem:[%s2507_s1 + $0x68] sm:$0xff]  }
   0x6   :  { %1425 = vmatprep.subr.bf16.mxu1 %v1962_v5  ;;  %v2010_v13 = vld [vmem:[%s2507_s1 + $0xd8] sm:$0xff]   ;;  %v2034_v17 = vld [vmem:[%s2507_s1 + $0xe0] sm:$0xff]   ;;  %v2058_v21 = vld [vmem:[%s2507_s1 + $0xe8] sm:$0xff]  }
   0x7   :  { %v2016_v14 = vld [vmem:[%s2507_s1 + $0x18] sm:$0xff]   ;;  %v2040_v18 = vld [vmem:[%s2507_s1 + $0x20] sm:$0xff]   ;;  %v2064_v22 = vld [vmem:[%s2507_s1 + $0x28] sm:$0xff]  }
   0x8   :  { %1404 = vmatpush3.bf16.msra.mxu0 %v1968_v6  ;;  %v2022_v15 = vld [vmem:[%s2507_s1 + $0x98] sm:$0xff]   ;;  %v2046_v19 = vld [vmem:[%s2507_s1 + $0xa0] sm:$0xff]   ;;  %v2070_v23 = vld [vmem:[%s2507_s1 + $0xa8] sm:$0xff]  }
   0x9   :  { %1426 = vmatpush3.bf16.msra.mxu1 %v1974_v7  ;;  %1405 = vmatprep.subr.bf16.mxu0 %v1980_v8  ;;  %v2076_v24 = vld [vmem:[%s2507_s1 + $0x70] sm:$0xff]   ;;  %v2100_v28 = vld [vmem:[%s2507_s1 + $0x78] sm:$0xff]   ;;  %v76_v32 = vld [vmem:[%s2508_s0] sm:$0xff] }
   0xa   :  { %1427 = vmatprep.subr.bf16.mxu1 %v1986_v9  ;;  %v2082_v25 = vld [vmem:[%s2507_s1 + $0xf0] sm:$0xff]   ;;  %v2106_v29 = vld [vmem:[%s2507_s1 + $0xf8] sm:$0xff]   ;;  %v77_v33 = vld [vmem:[%s2508_s0 + $0x8] sm:$0xff]  ;;  %v1301_v35 = vcombine.low %v76_v32, %v76_v32  ;;  %v1302_v36 = vcombine.high %v76_v32, %v76_v32 }
   0xb   :  { %v2088_v26 = vld [vmem:[%s2507_s1 + $0x30] sm:$0xff]   ;;  %v2112_v30 = vld [vmem:[%s2507_s1 + $0x38] sm:$0xff]   ;;  %v1303_v37 = vcombine.low %v77_v33, %v77_v33  ;;  %v1304_v38 = vcombine.high %v77_v33, %v77_v33  ;;  %v1345_v44 = vld [vmem:[%s2508_s0 + $0x20] sm:$0xff] }
   0xc   :  { %1406 = vmatpush3.bf16.msra.mxu0 %v1992_v10  ;;  %v2094_v27 = vld [vmem:[%s2507_s1 + $0xb0] sm:$0xff]   ;;  %v2118_v31 = vld [vmem:[%s2507_s1 + $0xb8] sm:$0xff]   ;;  %316 = vmatprep.mubr.bf16.mxu0 %v1302_v36  ;;  %v1346_v45 = vld [vmem:[%s2508_s0 + $0x28] sm:$0xff]  ;;  %v1348_v46 = vcombine.high %v1345_v44, %v1345_v44  ;;  %v1347_v48 = vcombine.low %v1345_v44, %v1345_v44 }
   0xd   :  { %1428 = vmatpush3.bf16.msra.mxu1 %v1998_v11  ;;  %1407 = vmatprep.subr.bf16.mxu0 %v2004_v12  ;;  %v1338_v34 = vld [vmem:[%s2508_s0 + $0x10] sm:$0xff]  ;;  %v1339_v39 = vld [vmem:[%s2508_s0 + $0x18] sm:$0xff]  ;;  %v1350_v47 = vcombine.high %v1346_v45, %v1346_v45  ;;  %v1349_v49 = vcombine.low %v1346_v45, %v1346_v45  ;;  %v1359_v56 = vld [vmem:[%s2508_s0 + $0x40] sm:$0xff] }
   0xe   :  { %1429 = vmatprep.subr.bf16.mxu1 %v2010_v13  ;;  %356 = vmatprep.mubr.bf16.mxu1 %v1304_v38  ;;  %v1341_v40 = vcombine.high %v1338_v34, %v1338_v34  ;;  %v1343_v41 = vcombine.high %v1339_v39, %v1339_v39  ;;  %v1340_v42 = vcombine.low %v1338_v34, %v1338_v34  ;;  %v1352_v50 = vld [vmem:[%s2508_s0 + $0x30] sm:$0xff]  ;;  %v1353_v51 = vld [vmem:[%s2508_s0 + $0x38] sm:$0xff]  ;;  %v1360_v57 = vld [vmem:[%s2508_s0 + $0x48] sm:$0xff] }
   0xf   :  { %v1342_v43 = vcombine.low %v1339_v39, %v1339_v39  ;;  %v1355_v52 = vcombine.high %v1352_v50, %v1352_v50  ;;  %v1357_v53 = vcombine.high %v1353_v51, %v1353_v51  ;;  %v1354_v54 = vcombine.low %v1352_v50, %v1352_v50  ;;  %v1366_v62 = vld [vmem:[%s2508_s0 + $0x50] sm:$0xff]  ;;  %v1367_v63 = vld [vmem:[%s2508_s0 + $0x58] sm:$0xff]  ;;  %v1373_v36 = vld [vmem:[%s2508_s0 + $0x60] sm:$0xff] }
  0x10   :  { %1408 = vmatpush3.bf16.msra.mxu0 %v2016_v14  ;;  %v1356_v55 = vcombine.low %v1353_v51, %v1353_v51  ;;  %v1362_v58 = vcombine.high %v1359_v56, %v1359_v56  ;;  %v1364_v59 = vcombine.high %v1360_v57, %v1360_v57  ;;  %v1361_v60 = vcombine.low %v1359_v56, %v1359_v56 }
  0x11   :  { %1430 = vmatpush3.bf16.msra.mxu1 %v2022_v15  ;;  %1409 = vmatprep.subr.bf16.mxu0 %v2028_v16  ;;  %v1363_v61 = vcombine.low %v1360_v57, %v1360_v57  ;;  %v1369_v32 = vcombine.high %v1366_v62, %v1366_v62  ;;  %v1371_v33 = vcombine.high %v1367_v63, %v1367_v63 }
  0x12   :  { %1431 = vmatprep.subr.bf16.mxu1 %v2034_v17  ;;  %v1368_v34 = vcombine.low %v1366_v62, %v1366_v62  ;;  %v1376_v38 = vcombine.high %v1373_v36, %v1373_v36 }
  0x14   :  { %1410 = vmatpush3.bf16.msra.mxu0 %v2040_v18 }
  0x15   :  { %1432 = vmatpush3.bf16.msra.mxu1 %v2046_v19  ;;  %1411 = vmatprep.subr.bf16.mxu0 %v2052_v20 }
  0x16   :  { %1433 = vmatprep.subr.bf16.mxu1 %v2058_v21 }
  0x18   :  { %1412 = vmatpush3.bf16.msra.mxu0 %v2064_v22 }
  0x19   :  { %1434 = vmatpush3.bf16.msra.mxu1 %v2070_v23  ;;  %1413 = vmatprep.subr.bf16.mxu0 %v2076_v24 }
  0x1a   :  { %1435 = vmatprep.subr.bf16.mxu1 %v2082_v25 }
  0x1c   :  { %1414 = vmatpush3.bf16.msra.mxu0 %v2088_v26 }
  0x1d   :  { %1436 = vmatpush3.bf16.msra.mxu1 %v2094_v27  ;;  %1415 = vmatprep.subr.bf16.mxu0 %v2100_v28 }
  0x1e   :  { %1437 = vmatprep.subr.bf16.mxu1 %v2106_v29 }
  0x20   :  { %1416 = vmatpush3.bf16.msra.mxu0 %v2112_v30 }
  0x21   :  { %1438 = vmatpush3.bf16.msra.mxu1 %v2118_v31  ;;  %1445 = vmatprep.subr.bf16.mxu0 %v1933_v0 }
  0x22   :  { %1467 = vmatprep.subr.bf16.mxu1 %v1938_v1 }
  0x23   :  { %317 = vmatmul.mubr.bf16.vlgmr.msra.gmra.mrb[0].mxu0 %v1301_v35  ;;  %v1370_v35 = vcombine.low %v1367_v63, %v1367_v63 }
  0x24   :  { %357 = vmatmul.mubr.bf16.vlgmr.msra.gmra.mrb[0].mxu1 %v1303_v37  ;;  %1446 = vmatpush3.bf16.msra.mxu0 %v1944_v2  ;;  %v1374_v37 = vld [vmem:[%s2508_s0 + $0x68] sm:$0xff] }
  0x25   :  { %1468 = vmatpush3.bf16.msra.mxu1 %v1950_v3  ;;  %1447 = vmatprep.subr.bf16.mxu0 %v1956_v4  ;;  %v1378_v39 = vcombine.high %v1374_v37, %v1374_v37 }
  0x26   :  { %1469 = vmatprep.subr.bf16.mxu1 %v1962_v5  ;;  %418 = vmatprep.mubr.bf16.mxu0 %v1341_v40  ;;  %v1375_v40 = vcombine.low %v1373_v36, %v1373_v36 }
  0x27   :  { %458 = vmatprep.mubr.bf16.mxu1 %v1343_v41  ;;  %v1377_v41 = vcombine.low %v1374_v37, %v1374_v37 }
  0x28   :  { %1448 = vmatpush3.bf16.msra.mxu0 %v1968_v6 }
  0x29   :  { %1470 = vmatpush3.bf16.msra.mxu1 %v1974_v7  ;;  %1449 = vmatprep.subr.bf16.mxu0 %v1980_v8 }
  0x2a   :  { %1471 = vmatprep.subr.bf16.mxu1 %v1986_v9 }
  0x2c   :  { %1450 = vmatpush3.bf16.msra.mxu0 %v1992_v10 }
  0x2d   :  { %1472 = vmatpush3.bf16.msra.mxu1 %v1998_v11  ;;  %1451 = vmatprep.subr.bf16.mxu0 %v2004_v12 }
  0x2e   :  { %1473 = vmatprep.subr.bf16.mxu1 %v2010_v13 }
  0x30   :  { %1452 = vmatpush3.bf16.msra.mxu0 %v2016_v14 }
  0x31   :  { %1474 = vmatpush3.bf16.msra.mxu1 %v2022_v15  ;;  %1453 = vmatprep.subr.bf16.mxu0 %v2028_v16 }
  0x32   :  { %1475 = vmatprep.subr.bf16.mxu1 %v2034_v17 }
  0x34   :  { %1454 = vmatpush3.bf16.msra.mxu0 %v2040_v18 }
  0x35   :  { %1476 = vmatpush3.bf16.msra.mxu1 %v2046_v19  ;;  %1455 = vmatprep.subr.bf16.mxu0 %v2052_v20 }
  0x36   :  { %1477 = vmatprep.subr.bf16.mxu1 %v2058_v21 }
  0x38   :  { %1456 = vmatpush3.bf16.msra.mxu0 %v2064_v22 }
  0x39   :  { %1478 = vmatpush3.bf16.msra.mxu1 %v2070_v23  ;;  %1457 = vmatprep.subr.bf16.mxu0 %v2076_v24 }
  0x3a   :  { %1479 = vmatprep.subr.bf16.mxu1 %v2082_v25 }
  0x3c   :  { %1458 = vmatpush3.bf16.msra.mxu0 %v2088_v26 }
  0x3d   :  { %1480 = vmatpush3.bf16.msra.mxu1 %v2094_v27  ;;  %1459 = vmatprep.subr.bf16.mxu0 %v2100_v28 }
  0x3e   :  { %1481 = vmatprep.subr.bf16.mxu1 %v2106_v29 }
  0x40   :  { %1460 = vmatpush3.bf16.msra.mxu0 %v2112_v30 }
  0x41   :  { %1482 = vmatpush3.bf16.msra.mxu1 %v2118_v31  ;;  %1489 = vmatprep.subr.bf16.mxu0 %v1933_v0 }
  0x42   :  { %1511 = vmatprep.subr.bf16.mxu1 %v1938_v1 }
  0x43   :  { %419 = vmatmul.mubr.bf16.vlgmr.msra.gmra.mrb[4].mxu0 %v1340_v42  ;;  %v1380_v42 = vld [vmem:[%s2508_s0 + $0x70] sm:$0xff] }
  0x44   :  { %459 = vmatmul.mubr.bf16.vlgmr.msra.gmra.mrb[4].mxu1 %v1342_v43  ;;  %1490 = vmatpush3.bf16.msra.mxu0 %v1944_v2  ;;  %v1381_v43 = vld [vmem:[%s2508_s0 + $0x78] sm:$0xff]  ;;  %v1383_v44 = vcombine.high %v1380_v42, %v1380_v42  ;;  %v1382_v57 = vcombine.low %v1380_v42, %v1380_v42 }
  0x45   :  { %1512 = vmatpush3.bf16.msra.mxu1 %v1950_v3  ;;  %1491 = vmatprep.subr.bf16.mxu0 %v1956_v4  ;;  %v1385_v45 = vcombine.high %v1381_v43, %v1381_v43 }
  0x46   :  { %1513 = vmatprep.subr.bf16.mxu1 %v1962_v5  ;;  %521 = vmatprep.mubr.bf16.mxu0 %v1348_v46 }
  0x47   :  { %561 = vmatprep.mubr.bf16.mxu1 %v1350_v47 }
  0x48   :  { %1492 = vmatpush3.bf16.msra.mxu0 %v1968_v6 }
  0x49   :  { %1514 = vmatpush3.bf16.msra.mxu1 %v1974_v7  ;;  %1493 = vmatprep.subr.bf16.mxu0 %v1980_v8 }
  0x4a   :  { %1515 = vmatprep.subr.bf16.mxu1 %v1986_v9 }
  0x4c   :  { %1494 = vmatpush3.bf16.msra.mxu0 %v1992_v10 }
  0x4d   :  { %1516 = vmatpush3.bf16.msra.mxu1 %v1998_v11  ;;  %1495 = vmatprep.subr.bf16.mxu0 %v2004_v12 }
  0x4e   :  { %1517 = vmatprep.subr.bf16.mxu1 %v2010_v13 }
  0x50   :  { %1496 = vmatpush3.bf16.msra.mxu0 %v2016_v14 }
  0x51   :  { %1518 = vmatpush3.bf16.msra.mxu1 %v2022_v15  ;;  %1497 = vmatprep.subr.bf16.mxu0 %v2028_v16 }
  0x52   :  { %1519 = vmatprep.subr.bf16.mxu1 %v2034_v17 }
  0x54   :  { %1498 = vmatpush3.bf16.msra.mxu0 %v2040_v18 }
  0x55   :  { %1520 = vmatpush3.bf16.msra.mxu1 %v2046_v19  ;;  %1499 = vmatprep.subr.bf16.mxu0 %v2052_v20 }
  0x56   :  { %1521 = vmatprep.subr.bf16.mxu1 %v2058_v21 }
  0x58   :  { %1500 = vmatpush3.bf16.msra.mxu0 %v2064_v22 }
  0x59   :  { %1522 = vmatpush3.bf16.msra.mxu1 %v2070_v23  ;;  %1501 = vmatprep.subr.bf16.mxu0 %v2076_v24 }
  0x5a   :  { %1523 = vmatprep.subr.bf16.mxu1 %v2082_v25 }
  0x5c   :  { %1502 = vmatpush3.bf16.msra.mxu0 %v2088_v26 }
  0x5d   :  { %1524 = vmatpush3.bf16.msra.mxu1 %v2094_v27  ;;  %1503 = vmatprep.subr.bf16.mxu0 %v2100_v28 }
  0x5e   :  { %1525 = vmatprep.subr.bf16.mxu1 %v2106_v29 }
  0x60   :  { %1504 = vmatpush3.bf16.msra.mxu0 %v2112_v30 }
  0x61   :  { %1526 = vmatpush3.bf16.msra.mxu1 %v2118_v31  ;;  %1533 = vmatprep.subr.bf16.mxu0 %v1933_v0 }
  0x62   :  { %1555 = vmatprep.subr.bf16.mxu1 %v1938_v1 }
  0x63   :  { %522 = vmatmul.mubr.bf16.vlgmr.msra.gmra.mrb[8].mxu0 %v1347_v48 }
  0x64   :  { %562 = vmatmul.mubr.bf16.vlgmr.msra.gmra.mrb[8].mxu1 %v1349_v49  ;;  %1534 = vmatpush3.bf16.msra.mxu0 %v1944_v2 }
  0x65   :  { %1556 = vmatpush3.bf16.msra.mxu1 %v1950_v3  ;;  %1535 = vmatprep.subr.bf16.mxu0 %v1956_v4 }
  0x66   :  { %1557 = vmatprep.subr.bf16.mxu1 %v1962_v5  ;;  %624 = vmatprep.mubr.bf16.mxu0 %v1355_v52 }
  0x67   :  { %664 = vmatprep.mubr.bf16.mxu1 %v1357_v53 }
  0x68   :  { %1536 = vmatpush3.bf16.msra.mxu0 %v1968_v6 }
  0x69   :  { %1558 = vmatpush3.bf16.msra.mxu1 %v1974_v7  ;;  %1537 = vmatprep.subr.bf16.mxu0 %v1980_v8 }
  0x6a   :  { %1559 = vmatprep.subr.bf16.mxu1 %v1986_v9 }
  0x6c   :  { %1538 = vmatpush3.bf16.msra.mxu0 %v1992_v10 }
  0x6d   :  { %1560 = vmatpush3.bf16.msra.mxu1 %v1998_v11  ;;  %1539 = vmatprep.subr.bf16.mxu0 %v2004_v12 }
  0x6e   :  { %1561 = vmatprep.subr.bf16.mxu1 %v2010_v13 }
  0x70   :  { %1540 = vmatpush3.bf16.msra.mxu0 %v2016_v14 }
  0x71   :  { %1562 = vmatpush3.bf16.msra.mxu1 %v2022_v15  ;;  %1541 = vmatprep.subr.bf16.mxu0 %v2028_v16 }
  0x72   :  { %1563 = vmatprep.subr.bf16.mxu1 %v2034_v17 }
  0x74   :  { %1542 = vmatpush3.bf16.msra.mxu0 %v2040_v18 }
  0x75   :  { %1564 = vmatpush3.bf16.msra.mxu1 %v2046_v19  ;;  %1543 = vmatprep.subr.bf16.mxu0 %v2052_v20 }
  0x76   :  { %1565 = vmatprep.subr.bf16.mxu1 %v2058_v21 }
  0x78   :  { %1544 = vmatpush3.bf16.msra.mxu0 %v2064_v22 }
  0x79   :  { %1566 = vmatpush3.bf16.msra.mxu1 %v2070_v23  ;;  %1545 = vmatprep.subr.bf16.mxu0 %v2076_v24 }
  0x7a   :  { %1567 = vmatprep.subr.bf16.mxu1 %v2082_v25 }
  0x7c   :  { %1546 = vmatpush3.bf16.msra.mxu0 %v2088_v26 }
  0x7d   :  { %1568 = vmatpush3.bf16.msra.mxu1 %v2094_v27  ;;  %1547 = vmatprep.subr.bf16.mxu0 %v2100_v28 }
  0x7e   :  { %1569 = vmatprep.subr.bf16.mxu1 %v2106_v29 }
  0x80   :  { %1548 = vmatpush3.bf16.msra.mxu0 %v2112_v30 }
  0x81   :  { %1570 = vmatpush3.bf16.msra.mxu1 %v2118_v31  ;;  %1577 = vmatprep.subr.bf16.mxu0 %v1933_v0 }
  0x82   :  { %1599 = vmatprep.subr.bf16.mxu1 %v1938_v1 }
  0x83   :  { %625 = vmatmul.mubr.bf16.vlgmr.msra.gmra.mrb[12].mxu0 %v1354_v54 }
  0x84   :  { %665 = vmatmul.mubr.bf16.vlgmr.msra.gmra.mrb[12].mxu1 %v1356_v55  ;;  %1578 = vmatpush3.bf16.msra.mxu0 %v1944_v2 }
  0x85   :  { %1600 = vmatpush3.bf16.msra.mxu1 %v1950_v3  ;;  %1579 = vmatprep.subr.bf16.mxu0 %v1956_v4 }
  0x86   :  { %1601 = vmatprep.subr.bf16.mxu1 %v1962_v5  ;;  %727 = vmatprep.mubr.bf16.mxu0 %v1362_v58  ;;  %v1384_v58 = vcombine.low %v1381_v43, %v1381_v43 }
  0x87   :  { %767 = vmatprep.mubr.bf16.mxu1 %v1364_v59  ;;  %v2397_v59 = vld [vmem:[%s2508_s0 + $0x80] sm:$0xff] }
  0x88   :  { %1580 = vmatpush3.bf16.msra.mxu0 %v1968_v6 }
  0x89   :  { %1602 = vmatpush3.bf16.msra.mxu1 %v1974_v7  ;;  %1581 = vmatprep.subr.bf16.mxu0 %v1980_v8 }
  0x8a   :  { %1603 = vmatprep.subr.bf16.mxu1 %v1986_v9 }
  0x8c   :  { %1582 = vmatpush3.bf16.msra.mxu0 %v1992_v10 }
  0x8d   :  { %1604 = vmatpush3.bf16.msra.mxu1 %v1998_v11  ;;  %1583 = vmatprep.subr.bf16.mxu0 %v2004_v12 }
  0x8e   :  { %1605 = vmatprep.subr.bf16.mxu1 %v2010_v13 }
  0x90   :  { %1584 = vmatpush3.bf16.msra.mxu0 %v2016_v14 }
  0x91   :  { %1606 = vmatpush3.bf16.msra.mxu1 %v2022_v15  ;;  %1585 = vmatprep.subr.bf16.mxu0 %v2028_v16 }
  0x92   :  { %1607 = vmatprep.subr.bf16.mxu1 %v2034_v17 }
  0x94   :  { %1586 = vmatpush3.bf16.msra.mxu0 %v2040_v18 }
  0x95   :  { %1608 = vmatpush3.bf16.msra.mxu1 %v2046_v19  ;;  %1587 = vmatprep.subr.bf16.mxu0 %v2052_v20 }
  0x96   :  { %1609 = vmatprep.subr.bf16.mxu1 %v2058_v21 }
  0x98   :  { %1588 = vmatpush3.bf16.msra.mxu0 %v2064_v22 }
  0x99   :  { %1610 = vmatpush3.bf16.msra.mxu1 %v2070_v23  ;;  %1589 = vmatprep.subr.bf16.mxu0 %v2076_v24 }
  0x9a   :  { %1611 = vmatprep.subr.bf16.mxu1 %v2082_v25 }
  0x9c   :  { %1590 = vmatpush3.bf16.msra.mxu0 %v2088_v26 }
  0x9d   :  { %1612 = vmatpush3.bf16.msra.mxu1 %v2094_v27  ;;  %1591 = vmatprep.subr.bf16.mxu0 %v2100_v28 }
  0x9e   :  { %1613 = vmatprep.subr.bf16.mxu1 %v2106_v29 }
  0xa0   :  { %1592 = vmatpush3.bf16.msra.mxu0 %v2112_v30 }
  0xa1   :  { %1614 = vmatpush3.bf16.msra.mxu1 %v2118_v31  ;;  %1621 = vmatprep.subr.bf16.mxu0 %v1933_v0 }
  0xa2   :  { %1643 = vmatprep.subr.bf16.mxu1 %v1938_v1 }
  0xa3   :  { %728 = vmatmul.mubr.bf16.vlgmr.msra.gmra.mrb[16].mxu0 %v1361_v60  ;;  %v2402_v60 = vld [vmem:[%s2508_s0 + $0x88] sm:$0xff] }
  0xa4   :  { %768 = vmatmul.mubr.bf16.vlgmr.msra.gmra.mrb[16].mxu1 %v1363_v61  ;;  %1622 = vmatpush3.bf16.msra.mxu0 %v1944_v2  ;;  %v1390_v61 = vcombine.high %v2397_v59, %v2397_v59  ;;  %v1392_v62 = vcombine.high %v2402_v60, %v2402_v60 }
  0xa5   :  { %1644 = vmatpush3.bf16.msra.mxu1 %v1950_v3  ;;  %1623 = vmatprep.subr.bf16.mxu0 %v1956_v4 }
  0xa6   :  { %1645 = vmatprep.subr.bf16.mxu1 %v1962_v5  ;;  %830 = vmatprep.mubr.bf16.mxu0 %v1369_v32 }
  0xa7   :  { %870 = vmatprep.mubr.bf16.mxu1 %v1371_v33 }
  0xa8   :  { %1624 = vmatpush3.bf16.msra.mxu0 %v1968_v6 }
  0xa9   :  { %1646 = vmatpush3.bf16.msra.mxu1 %v1974_v7  ;;  %1625 = vmatprep.subr.bf16.mxu0 %v1980_v8 }
  0xaa   :  { %1647 = vmatprep.subr.bf16.mxu1 %v1986_v9 }
  0xac   :  { %1626 = vmatpush3.bf16.msra.mxu0 %v1992_v10 }
  0xad   :  { %1648 = vmatpush3.bf16.msra.mxu1 %v1998_v11  ;;  %1627 = vmatprep.subr.bf16.mxu0 %v2004_v12 }
  0xae   :  { %1649 = vmatprep.subr.bf16.mxu1 %v2010_v13 }
  0xb0   :  { %1628 = vmatpush3.bf16.msra.mxu0 %v2016_v14 }
  0xb1   :  { %1650 = vmatpush3.bf16.msra.mxu1 %v2022_v15  ;;  %1629 = vmatprep.subr.bf16.mxu0 %v2028_v16 }
  0xb2   :  { %1651 = vmatprep.subr.bf16.mxu1 %v2034_v17 }
  0xb4   :  { %1630 = vmatpush3.bf16.msra.mxu0 %v2040_v18 }
  0xb5   :  { %1652 = vmatpush3.bf16.msra.mxu1 %v2046_v19  ;;  %1631 = vmatprep.subr.bf16.mxu0 %v2052_v20 }
  0xb6   :  { %1653 = vmatprep.subr.bf16.mxu1 %v2058_v21 }
  0xb8   :  { %1632 = vmatpush3.bf16.msra.mxu0 %v2064_v22 }
  0xb9   :  { %1654 = vmatpush3.bf16.msra.mxu1 %v2070_v23  ;;  %1633 = vmatprep.subr.bf16.mxu0 %v2076_v24 }
  0xba   :  { %1655 = vmatprep.subr.bf16.mxu1 %v2082_v25 }
  0xbc   :  { %1634 = vmatpush3.bf16.msra.mxu0 %v2088_v26 }
  0xbd   :  { %1656 = vmatpush3.bf16.msra.mxu1 %v2094_v27  ;;  %1635 = vmatprep.subr.bf16.mxu0 %v2100_v28 }
  0xbe   :  { %1657 = vmatprep.subr.bf16.mxu1 %v2106_v29 }
  0xc0   :  { %1636 = vmatpush3.bf16.msra.mxu0 %v2112_v30 }
  0xc1   :  { %1658 = vmatpush3.bf16.msra.mxu1 %v2118_v31  ;;  %1665 = vmatprep.subr.bf16.mxu0 %v1933_v0 }
  0xc2   :  { %1687 = vmatprep.subr.bf16.mxu1 %v1938_v1 }
  0xc3   :  { %831 = vmatmul.mubr.bf16.vlgmr.msra.gmra.mrb[20].mxu0 %v1368_v34 }
  0xc4   :  { %871 = vmatmul.mubr.bf16.vlgmr.msra.gmra.mrb[20].mxu1 %v1370_v35  ;;  %1666 = vmatpush3.bf16.msra.mxu0 %v1944_v2 }
  0xc5   :  { %1688 = vmatpush3.bf16.msra.mxu1 %v1950_v3  ;;  %1667 = vmatprep.subr.bf16.mxu0 %v1956_v4 }
  0xc6   :  { %1689 = vmatprep.subr.bf16.mxu1 %v1962_v5  ;;  %933 = vmatprep.mubr.bf16.mxu0 %v1376_v38 }
  0xc7   :  { %973 = vmatprep.mubr.bf16.mxu1 %v1378_v39 }
  0xc8   :  { %1668 = vmatpush3.bf16.msra.mxu0 %v1968_v6 }
  0xc9   :  { %1690 = vmatpush3.bf16.msra.mxu1 %v1974_v7  ;;  %1669 = vmatprep.subr.bf16.mxu0 %v1980_v8 }
  0xca   :  { %1691 = vmatprep.subr.bf16.mxu1 %v1986_v9 }
  0xcc   :  { %1670 = vmatpush3.bf16.msra.mxu0 %v1992_v10 }
  0xcd   :  { %1692 = vmatpush3.bf16.msra.mxu1 %v1998_v11  ;;  %1671 = vmatprep.subr.bf16.mxu0 %v2004_v12 }
  0xce   :  { %1693 = vmatprep.subr.bf16.mxu1 %v2010_v13 }
  0xd0   :  { %1672 = vmatpush3.bf16.msra.mxu0 %v2016_v14 }
  0xd1   :  { %1694 = vmatpush3.bf16.msra.mxu1 %v2022_v15  ;;  %1673 = vmatprep.subr.bf16.mxu0 %v2028_v16 }
  0xd2   :  { %1695 = vmatprep.subr.bf16.mxu1 %v2034_v17 }
  0xd4   :  { %1674 = vmatpush3.bf16.msra.mxu0 %v2040_v18 }
  0xd5   :  { %1696 = vmatpush3.bf16.msra.mxu1 %v2046_v19  ;;  %1675 = vmatprep.subr.bf16.mxu0 %v2052_v20 }
  0xd6   :  { %1697 = vmatprep.subr.bf16.mxu1 %v2058_v21 }
  0xd8   :  { %1676 = vmatpush3.bf16.msra.mxu0 %v2064_v22 }
  0xd9   :  { %1698 = vmatpush3.bf16.msra.mxu1 %v2070_v23  ;;  %1677 = vmatprep.subr.bf16.mxu0 %v2076_v24 }
  0xda   :  { %1699 = vmatprep.subr.bf16.mxu1 %v2082_v25 }
  0xdc   :  { %1678 = vmatpush3.bf16.msra.mxu0 %v2088_v26 }
  0xdd   :  { %1700 = vmatpush3.bf16.msra.mxu1 %v2094_v27  ;;  %1679 = vmatprep.subr.bf16.mxu0 %v2100_v28 }
  0xde   :  { %1701 = vmatprep.subr.bf16.mxu1 %v2106_v29 }
  0xe0   :  { %1680 = vmatpush3.bf16.msra.mxu0 %v2112_v30 }
  0xe1   :  { %1702 = vmatpush3.bf16.msra.mxu1 %v2118_v31  ;;  %1709 = vmatprep.subr.bf16.mxu0 %v1933_v0 }
  0xe2   :  { %1731 = vmatprep.subr.bf16.mxu1 %v1938_v1 }
  0xe3   :  { %934 = vmatmul.mubr.bf16.vlgmr.msra.gmra.mrb[24].mxu0 %v1375_v40 }
  0xe4   :  { %974 = vmatmul.mubr.bf16.vlgmr.msra.gmra.mrb[24].mxu1 %v1377_v41  ;;  %1710 = vmatpush3.bf16.msra.mxu0 %v1944_v2 }
  0xe5   :  { %1732 = vmatpush3.bf16.msra.mxu1 %v1950_v3  ;;  %1711 = vmatprep.subr.bf16.mxu0 %v1956_v4 }
  0xe6   :  { %1733 = vmatprep.subr.bf16.mxu1 %v1962_v5  ;;  %1036 = vmatprep.mubr.bf16.mxu0 %v1383_v44  ;;  %v1914_v44 = vmov 0.0  }
  0xe7   :  { %1076 = vmatprep.mubr.bf16.mxu1 %v1385_v45 }
  0xe8   :  { %1712 = vmatpush3.bf16.msra.mxu0 %v1968_v6 }
  0xe9   :  { %1734 = vmatpush3.bf16.msra.mxu1 %v1974_v7  ;;  %1713 = vmatprep.subr.bf16.mxu0 %v1980_v8 }
  0xea   :  { %1735 = vmatprep.subr.bf16.mxu1 %v1986_v9 }
  0xec   :  { %1714 = vmatpush3.bf16.msra.mxu0 %v1992_v10 }
  0xed   :  { %1736 = vmatpush3.bf16.msra.mxu1 %v1998_v11  ;;  %1715 = vmatprep.subr.bf16.mxu0 %v2004_v12 }
  0xee   :  { %1737 = vmatprep.subr.bf16.mxu1 %v2010_v13 }
  0xf0   :  { %1716 = vmatpush3.bf16.msra.mxu0 %v2016_v14 }
  0xf1   :  { %1738 = vmatpush3.bf16.msra.mxu1 %v2022_v15  ;;  %1717 = vmatprep.subr.bf16.mxu0 %v2028_v16 }
  0xf2   :  { %1739 = vmatprep.subr.bf16.mxu1 %v2034_v17 }
  0xf4   :  { %1718 = vmatpush3.bf16.msra.mxu0 %v2040_v18 }
  0xf5   :  { %1740 = vmatpush3.bf16.msra.mxu1 %v2046_v19  ;;  %1719 = vmatprep.subr.bf16.mxu0 %v2052_v20 }
  0xf6   :  { %1741 = vmatprep.subr.bf16.mxu1 %v2058_v21  ;;  %v1417_v46 = vpop.f32.mrb[0].mxu0 }
  0xf7   :  { %v1439_v47 = vpop.f32.mrb[0].mxu1  ;;  %v1418_v48 = vpop.f32.mrb[1].mxu0 }
  0xf8   :  { %v1440_v49 = vpop.f32.mrb[1].mxu1  ;;  %v1419_v50 = vadd.f32 %v1418_v48, %v1417_v46  ;;  %v1420_v52 = vpop.f32.mrb[2].mxu0  ;;  %1720 = vmatpush3.bf16.msra.mxu0 %v2064_v22  ;;  %v1389_v46 = vcombine.low %v2397_v59, %v2397_v59 }
  0xf9   :  { %v1441_v51 = vadd.f32 %v1440_v49, %v1439_v47  ;;  %v1442_v53 = vpop.f32.mrb[2].mxu1  ;;  %1742 = vmatpush3.bf16.msra.mxu1 %v2070_v23  ;;  %v1421_v54 = vpop.f32.mrb[3].mxu0  ;;  %1721 = vmatprep.subr.bf16.mxu0 %v2076_v24  ;;  %v1391_v47 = vcombine.low %v2402_v60, %v2402_v60  ;;  %v1394_v49 = vld [vmem:[%s2508_s0 + $0x90] sm:$0xff] }
  0xfa   :  { %v1443_v55 = vpop.f32.mrb[3].mxu1  ;;  %1743 = vmatprep.subr.bf16.mxu1 %v2082_v25  ;;  %v1397_v52 = vcombine.high %v1394_v49, %v1394_v49 }
  0xfb   :  { %v2388_v56 = vadd.f32 %v1441_v51, %v1419_v50  ;;  %v1395_v50 = vld [vmem:[%s2508_s0 + $0x98] sm:$0xff] }
  0xfc   :  { %1722 = vmatpush3.bf16.msra.mxu0 %v2088_v26  ;;  %v1399_v53 = vcombine.high %v1395_v50, %v1395_v50 }
  0xfd   :  { %1744 = vmatpush3.bf16.msra.mxu1 %v2094_v27  ;;  %1723 = vmatprep.subr.bf16.mxu0 %v2100_v28  ;;  %vm364_vm0 = vcmp.ge.f32.partialorder %v2388_v56, 1.0 }
  0xfe   :  { %1745 = vmatprep.subr.bf16.mxu1 %v2106_v29  ;;  %v368_v42 = vsel %vm364_vm0, 0.0, %v2388_v56  ;;  %v1337_v45 = vsel %vm364_vm0, 1.0, %v1914_v44 }
 0x100   :  { %1724 = vmatpush3.bf16.msra.mxu0 %v2112_v30 }
 0x101   :  { %1746 = vmatpush3.bf16.msra.mxu1 %v2118_v31  ;;  %1753 = vmatprep.subr.bf16.mxu0 %v1933_v0 }
 0x102   :  { %1775 = vmatprep.subr.bf16.mxu1 %v1938_v1 }
 0x103   :  { %1037 = vmatmul.mubr.bf16.vlgmr.msra.gmra.mrb[28].mxu0 %v1382_v57 }
 0x104   :  { %1077 = vmatmul.mubr.bf16.vlgmr.msra.gmra.mrb[28].mxu1 %v1384_v58  ;;  %1754 = vmatpush3.bf16.msra.mxu0 %v1944_v2 }
 0x105   :  { %1776 = vmatpush3.bf16.msra.mxu1 %v1950_v3  ;;  %1755 = vmatprep.subr.bf16.mxu0 %v1956_v4 }
 0x106   :  { %1777 = vmatprep.subr.bf16.mxu1 %v1962_v5  ;;  %1139 = vmatprep.mubr.bf16.mxu0 %v1390_v61 }
 0x107   :  { %1179 = vmatprep.mubr.bf16.mxu1 %v1392_v62 }
 0x108   :  { %1756 = vmatpush3.bf16.msra.mxu0 %v1968_v6 }
 0x109   :  { %1778 = vmatpush3.bf16.msra.mxu1 %v1974_v7  ;;  %1757 = vmatprep.subr.bf16.mxu0 %v1980_v8 }
 0x10a   :  { %1779 = vmatprep.subr.bf16.mxu1 %v1986_v9 }
 0x10c   :  { %1758 = vmatpush3.bf16.msra.mxu0 %v1992_v10 }
 0x10d   :  { %1780 = vmatpush3.bf16.msra.mxu1 %v1998_v11  ;;  %1759 = vmatprep.subr.bf16.mxu0 %v2004_v12 }
 0x10e   :  { %1781 = vmatprep.subr.bf16.mxu1 %v2010_v13 }
 0x110   :  { %1760 = vmatpush3.bf16.msra.mxu0 %v2016_v14 }
 0x111   :  { %1782 = vmatpush3.bf16.msra.mxu1 %v2022_v15  ;;  %1761 = vmatprep.subr.bf16.mxu0 %v2028_v16 }
 0x112   :  { %1783 = vmatprep.subr.bf16.mxu1 %v2034_v17 }
 0x114   :  { %1762 = vmatpush3.bf16.msra.mxu0 %v2040_v18 }
 0x115   :  { %1784 = vmatpush3.bf16.msra.mxu1 %v2046_v19  ;;  %1763 = vmatprep.subr.bf16.mxu0 %v2052_v20 }
 0x116   :  { %1785 = vmatprep.subr.bf16.mxu1 %v2058_v21  ;;  %v1461_v63 = vpop.f32.mrb[4].mxu0 }
 0x117   :  { %v1483_v32 = vpop.f32.mrb[4].mxu1  ;;  %v1462_v33 = vpop.f32.mrb[5].mxu0 }
 0x118   :  { %v1484_v34 = vpop.f32.mrb[5].mxu1  ;;  %v1463_v35 = vadd.f32 %v1462_v33, %v1461_v63  ;;  %v1464_v37 = vpop.f32.mrb[6].mxu0  ;;  %1764 = vmatpush3.bf16.msra.mxu0 %v2064_v22 }
 0x119   :  { %v1485_v36 = vadd.f32 %v1484_v34, %v1483_v32  ;;  %v1486_v38 = vpop.f32.mrb[6].mxu1  ;;  %1786 = vmatpush3.bf16.msra.mxu1 %v2070_v23  ;;  %v1465_v39 = vpop.f32.mrb[7].mxu0  ;;  %1765 = vmatprep.subr.bf16.mxu0 %v2076_v24 }
 0x11a   :  { %v1487_v40 = vpop.f32.mrb[7].mxu1  ;;  %1787 = vmatprep.subr.bf16.mxu1 %v2082_v25 }
 0x11b   :  { %v461_v41 = vadd.f32 %v1485_v36, %v1463_v35 }
 0x11c   :  { %1766 = vmatpush3.bf16.msra.mxu0 %v2088_v26 }
 0x11d   :  { %v466_v43 = vadd.f32 %v461_v41, %v368_v42  ;;  %1788 = vmatpush3.bf16.msra.mxu1 %v2094_v27  ;;  %1767 = vmatprep.subr.bf16.mxu0 %v2100_v28 }
 0x11e   :  { %1789 = vmatprep.subr.bf16.mxu1 %v2106_v29 }
 0x11f   :  { %vm467_vm1 = vcmp.ge.f32.partialorder %v466_v43, 1.0 }
 0x120   :  { %v1344_v48 = vsel %vm467_vm1, 1.0, %v1914_v44  ;;  %1768 = vmatpush3.bf16.msra.mxu0 %v2112_v30 }
 0x121   :  { %1790 = vmatpush3.bf16.msra.mxu1 %v2118_v31  ;;  %v470_v51 = vadd.f32 %v1344_v48, %v1337_v45  ;;  %1797 = vmatprep.subr.bf16.mxu0 %v1933_v0 }
 0x122   :  { %1819 = vmatprep.subr.bf16.mxu1 %v1938_v1 }
 0x123   :  { %1140 = vmatmul.mubr.bf16.vlgmr.msra.gmra.mrb[32].mxu0 %v1389_v46 }
 0x124   :  { %1180 = vmatmul.mubr.bf16.vlgmr.msra.gmra.mrb[32].mxu1 %v1391_v47  ;;  %1798 = vmatpush3.bf16.msra.mxu0 %v1944_v2 }
 0x125   :  { %1820 = vmatpush3.bf16.msra.mxu1 %v1950_v3  ;;  %1799 = vmatprep.subr.bf16.mxu0 %v1956_v4 }
 0x126   :  { %1821 = vmatprep.subr.bf16.mxu1 %v1962_v5  ;;  %1242 = vmatprep.mubr.bf16.mxu0 %v1397_v52 }
 0x127   :  { %1282 = vmatprep.mubr.bf16.mxu1 %v1399_v53 }
 0x128   :  { %1800 = vmatpush3.bf16.msra.mxu0 %v1968_v6 }
 0x129   :  { %1822 = vmatpush3.bf16.msra.mxu1 %v1974_v7  ;;  %1801 = vmatprep.subr.bf16.mxu0 %v1980_v8 }
 0x12a   :  { %1823 = vmatprep.subr.bf16.mxu1 %v1986_v9 }
 0x12c   :  { %1802 = vmatpush3.bf16.msra.mxu0 %v1992_v10 }
 0x12d   :  { %1824 = vmatpush3.bf16.msra.mxu1 %v1998_v11  ;;  %1803 = vmatprep.subr.bf16.mxu0 %v2004_v12  ;;  %v471_v11 = vsel %vm467_vm1, 0.0, %v466_v43 }
 0x12e   :  { %1825 = vmatprep.subr.bf16.mxu1 %v2010_v13  ;;  %v1396_v13 = vcombine.low %v1394_v49, %v1394_v49 }
 0x130   :  { %1804 = vmatpush3.bf16.msra.mxu0 %v2016_v14  ;;  %v1398_v14 = vcombine.low %v1395_v50, %v1395_v50 }
 0x131   :  { %1826 = vmatpush3.bf16.msra.mxu1 %v2022_v15  ;;  %1805 = vmatprep.subr.bf16.mxu0 %v2028_v16 }
 0x132   :  { %1827 = vmatprep.subr.bf16.mxu1 %v2034_v17 }
 0x134   :  { %1806 = vmatpush3.bf16.msra.mxu0 %v2040_v18 }
 0x135   :  { %1828 = vmatpush3.bf16.msra.mxu1 %v2046_v19  ;;  %1807 = vmatprep.subr.bf16.mxu0 %v2052_v20 }
 0x136   :  { %1829 = vmatprep.subr.bf16.mxu1 %v2058_v21  ;;  %v1505_v0 = vpop.f32.mrb[8].mxu0 }
 0x137   :  { %v1527_v1 = vpop.f32.mrb[8].mxu1  ;;  %v1506_v2 = vpop.f32.mrb[9].mxu0 }
 0x138   :  { %v1528_v3 = vpop.f32.mrb[9].mxu1  ;;  %v1507_v4 = vadd.f32 %v1506_v2, %v1505_v0  ;;  %v1508_v6 = vpop.f32.mrb[10].mxu0  ;;  %1808 = vmatpush3.bf16.msra.mxu0 %v2064_v22 }
 0x139   :  { %v1529_v5 = vadd.f32 %v1528_v3, %v1527_v1  ;;  %v1530_v7 = vpop.f32.mrb[10].mxu1  ;;  %1830 = vmatpush3.bf16.msra.mxu1 %v2070_v23  ;;  %v1509_v8 = vpop.f32.mrb[11].mxu0  ;;  %1809 = vmatprep.subr.bf16.mxu0 %v2076_v24 }
 0x13a   :  { %v1531_v9 = vpop.f32.mrb[11].mxu1  ;;  %1831 = vmatprep.subr.bf16.mxu1 %v2082_v25 }
 0x13b   :  { %v564_v10 = vadd.f32 %v1529_v5, %v1507_v4 }
 0x13c   :  { %1810 = vmatpush3.bf16.msra.mxu0 %v2088_v26 }
 0x13d   :  { %v569_v12 = vadd.f32 %v564_v10, %v471_v11  ;;  %1832 = vmatpush3.bf16.msra.mxu1 %v2094_v27  ;;  %1811 = vmatprep.subr.bf16.mxu0 %v2100_v28 }
 0x13e   :  { %1833 = vmatprep.subr.bf16.mxu1 %v2106_v29 }
 0x13f   :  { %vm570_vm2 = vcmp.ge.f32.partialorder %v569_v12, 1.0 }
 0x140   :  { %v1351_v15 = vsel %vm570_vm2, 1.0, %v1914_v44  ;;  %1812 = vmatpush3.bf16.msra.mxu0 %v2112_v30  ;;  %v574_v28 = vsel %vm570_vm2, 0.0, %v569_v12 }
 0x141   :  { %1834 = vmatpush3.bf16.msra.mxu1 %v2118_v31  ;;  %v573_v16 = vadd.f32 %v1351_v15, %v470_v51 }
 0x143   :  { %1243 = vmatmul.mubr.bf16.vlgmr.msra.gmra.mrb[36].mxu0 %v1396_v13 }
 0x144   :  { %1283 = vmatmul.mubr.bf16.vlgmr.msra.gmra.mrb[36].mxu1 %v1398_v14 }
 0x156   :  { %v1549_v17 = vpop.f32.mrb[12].mxu0 }
 0x157   :  { %v1571_v18 = vpop.f32.mrb[12].mxu1  ;;  %v1550_v19 = vpop.f32.mrb[13].mxu0 }
 0x158   :  { %v1572_v20 = vpop.f32.mrb[13].mxu1  ;;  %v1551_v21 = vadd.f32 %v1550_v19, %v1549_v17  ;;  %v1552_v23 = vpop.f32.mrb[14].mxu0 }
 0x159   :  { %v1573_v22 = vadd.f32 %v1572_v20, %v1571_v18  ;;  %v1574_v24 = vpop.f32.mrb[14].mxu1  ;;  %v1553_v25 = vpop.f32.mrb[15].mxu0 }
 0x15a   :  { %v1575_v26 = vpop.f32.mrb[15].mxu1 }
 0x15b   :  { %v667_v27 = vadd.f32 %v1573_v22, %v1551_v21 }
 0x15d   :  { %v672_v29 = vadd.f32 %v667_v27, %v574_v28 }
 0x15f   :  { %vm673_vm3 = vcmp.ge.f32.partialorder %v672_v29, 1.0 }
 0x160   :  { %v1358_v30 = vsel %vm673_vm3, 1.0, %v1914_v44  ;;  %v677_v33 = vsel %vm673_vm3, 0.0, %v672_v29 }
 0x161   :  { %v676_v31 = vadd.f32 %v1358_v30, %v573_v16 }
 0x176   :  { %v1593_v54 = vpop.f32.mrb[16].mxu0 }
 0x177   :  { %v1615_v55 = vpop.f32.mrb[16].mxu1  ;;  %v1594_v56 = vpop.f32.mrb[17].mxu0 }
 0x178   :  { %v1616_v57 = vpop.f32.mrb[17].mxu1  ;;  %v1595_v58 = vadd.f32 %v1594_v56, %v1593_v54  ;;  %v1596_v60 = vpop.f32.mrb[18].mxu0 }
 0x179   :  { %v1617_v59 = vadd.f32 %v1616_v57, %v1615_v55  ;;  %v1618_v61 = vpop.f32.mrb[18].mxu1  ;;  %v1597_v62 = vpop.f32.mrb[19].mxu0 }
 0x17a   :  { %v1619_v63 = vpop.f32.mrb[19].mxu1 }
 0x17b   :  { %v770_v32 = vadd.f32 %v1617_v59, %v1595_v58 }
 0x17d   :  { %v775_v34 = vadd.f32 %v770_v32, %v677_v33 }
 0x17f   :  { %vm776_vm4 = vcmp.ge.f32.partialorder %v775_v34, 1.0 }
 0x180   :  { %v1365_v35 = vsel %vm776_vm4, 1.0, %v1914_v44  ;;  %v780_v49 = vsel %vm776_vm4, 0.0, %v775_v34 }
 0x181   :  { %v779_v36 = vadd.f32 %v1365_v35, %v676_v31 }
 0x196   :  { %v1637_v37 = vpop.f32.mrb[20].mxu0 }
 0x197   :  { %v1659_v38 = vpop.f32.mrb[20].mxu1  ;;  %v1638_v39 = vpop.f32.mrb[21].mxu0 }
 0x198   :  { %v1660_v40 = vpop.f32.mrb[21].mxu1  ;;  %v1639_v41 = vadd.f32 %v1638_v39, %v1637_v37  ;;  %v1640_v43 = vpop.f32.mrb[22].mxu0 }
 0x199   :  { %v1661_v42 = vadd.f32 %v1660_v40, %v1659_v38  ;;  %v1662_v45 = vpop.f32.mrb[22].mxu1  ;;  %v1641_v46 = vpop.f32.mrb[23].mxu0 }
 0x19a   :  { %v1663_v47 = vpop.f32.mrb[23].mxu1 }
 0x19b   :  { %v873_v48 = vadd.f32 %v1661_v42, %v1639_v41 }
 0x19d   :  { %v878_v50 = vadd.f32 %v873_v48, %v780_v49 }
 0x19f   :  { %vm879_vm5 = vcmp.ge.f32.partialorder %v878_v50, 1.0 }
 0x1a0   :  { %v1372_v51 = vsel %vm879_vm5, 1.0, %v1914_v44  ;;  %v883_v10 = vsel %vm879_vm5, 0.0, %v878_v50 }
 0x1a1   :  { %v882_v52 = vadd.f32 %v1372_v51, %v779_v36 }
 0x1b6   :  { %v1681_v53 = vpop.f32.mrb[24].mxu0 }
 0x1b7   :  { %v1703_v0 = vpop.f32.mrb[24].mxu1  ;;  %v1682_v1 = vpop.f32.mrb[25].mxu0 }
 0x1b8   :  { %v1704_v2 = vpop.f32.mrb[25].mxu1  ;;  %v1683_v3 = vadd.f32 %v1682_v1, %v1681_v53  ;;  %v1684_v5 = vpop.f32.mrb[26].mxu0 }
 0x1b9   :  { %v1705_v4 = vadd.f32 %v1704_v2, %v1703_v0  ;;  %v1706_v6 = vpop.f32.mrb[26].mxu1  ;;  %v1685_v7 = vpop.f32.mrb[27].mxu0 }
 0x1ba   :  { %v1707_v8 = vpop.f32.mrb[27].mxu1 }
 0x1bb   :  { %v976_v9 = vadd.f32 %v1705_v4, %v1683_v3 }
 0x1bd   :  { %v981_v11 = vadd.f32 %v976_v9, %v883_v10 }
 0x1bf   :  { %vm982_vm6 = vcmp.ge.f32.partialorder %v981_v11, 1.0 }
 0x1c0   :  { %v1379_v12 = vsel %vm982_vm6, 1.0, %v1914_v44  ;;  %v986_v25 = vsel %vm982_vm6, 0.0, %v981_v11 }
 0x1c1   :  { %v985_v13 = vadd.f32 %v1379_v12, %v882_v52 }
 0x1d6   :  { %v1725_v14 = vpop.f32.mrb[28].mxu0 }
 0x1d7   :  { %v1747_v15 = vpop.f32.mrb[28].mxu1  ;;  %v1726_v16 = vpop.f32.mrb[29].mxu0 }
 0x1d8   :  { %v1748_v17 = vpop.f32.mrb[29].mxu1  ;;  %v1727_v18 = vadd.f32 %v1726_v16, %v1725_v14  ;;  %v1728_v20 = vpop.f32.mrb[30].mxu0 }
 0x1d9   :  { %v1749_v19 = vadd.f32 %v1748_v17, %v1747_v15  ;;  %v1750_v21 = vpop.f32.mrb[30].mxu1  ;;  %v1729_v22 = vpop.f32.mrb[31].mxu0 }
 0x1da   :  { %v1751_v23 = vpop.f32.mrb[31].mxu1 }
 0x1db   :  { %v1079_v24 = vadd.f32 %v1749_v19, %v1727_v18 }
 0x1dd   :  { %v1084_v26 = vadd.f32 %v1079_v24, %v986_v25 }
 0x1df   :  { %vm1085_vm7 = vcmp.ge.f32.partialorder %v1084_v26, 1.0 }
 0x1e0   :  { %v1386_v27 = vsel %vm1085_vm7, 1.0, %v1914_v44  ;;  %v1089_v62 = vsel %vm1085_vm7, 0.0, %v1084_v26 }
 0x1e1   :  { %v1088_v28 = vadd.f32 %v1386_v27, %v985_v13 }
 0x1f6   :  { %v1769_v29 = vpop.f32.mrb[32].mxu0 }
 0x1f7   :  { %v1791_v30 = vpop.f32.mrb[32].mxu1  ;;  %v1770_v31 = vpop.f32.mrb[33].mxu0 }
 0x1f8   :  { %v1792_v54 = vpop.f32.mrb[33].mxu1  ;;  %v1771_v55 = vadd.f32 %v1770_v31, %v1769_v29  ;;  %v1772_v57 = vpop.f32.mrb[34].mxu0 }
 0x1f9   :  { %v1793_v56 = vadd.f32 %v1792_v54, %v1791_v30  ;;  %v1794_v58 = vpop.f32.mrb[34].mxu1  ;;  %v1773_v59 = vpop.f32.mrb[35].mxu0 }
 0x1fa   :  { %v1795_v60 = vpop.f32.mrb[35].mxu1 }
 0x1fb   :  { %v1182_v61 = vadd.f32 %v1793_v56, %v1771_v55 }
 0x1fd   :  { %v1187_v63 = vadd.f32 %v1182_v61, %v1089_v62 }
 0x1ff   :  { %vm1188_vm8 = vcmp.ge.f32.partialorder %v1187_v63, 1.0 }
 0x200   :  { %v1393_v32 = vsel %vm1188_vm8, 1.0, %v1914_v44  ;;  %v1192_v46 = vsel %vm1188_vm8, 0.0, %v1187_v63 }
 0x201   :  { %v1191_v33 = vadd.f32 %v1393_v32, %v1088_v28 }
 0x216   :  { %v1813_v34 = vpop.f32.mrb[36].mxu0 }
 0x217   :  { %v1835_v35 = vpop.f32.mrb[36].mxu1  ;;  %v1814_v36 = vpop.f32.mrb[37].mxu0 }
 0x218   :  { %v1836_v37 = vpop.f32.mrb[37].mxu1  ;;  %v1815_v38 = vadd.f32 %v1814_v36, %v1813_v34  ;;  %v1816_v40 = vpop.f32.mrb[38].mxu0 }
 0x219   :  { %v1837_v39 = vadd.f32 %v1836_v37, %v1835_v35  ;;  %v1838_v41 = vpop.f32.mrb[38].mxu1  ;;  %v1817_v42 = vpop.f32.mrb[39].mxu0 }
 0x21a   :  { %v1839_v43 = vpop.f32.mrb[39].mxu1 }
 0x21b   :  { %v1285_v45 = vadd.f32 %v1837_v39, %v1815_v38 }
 0x21d   :  { %v1290_v47 = vadd.f32 %v1285_v45, %v1192_v46 }
 0x21f   :  { %vm1291_vm9 = vcmp.ge.f32.partialorder %v1290_v47, 1.0 }
 0x220   :  { %v1400_v48 = vsel %vm1291_vm9, 1.0, %v1914_v44 }
 0x221   :  { %v1294_v49 = vadd.f32 %v1400_v48, %v1191_v33 }
 0x223   :  { %v1295_v50 = vmul.f32 0.1, %v1294_v49 }
 0x225   :  { %1296 = vst [vmem:[%s2509_s2] sm:$0xff] %v1295_v50 }

</bundles_post_ra>
